<compile_context>
chip_gen: v5e
topology: v5e:2x2
jax: 0.10.0
libtpu: 0.0.40
codegen_flags: <defaults>
</compile_context>

<pallas_src>
import math

import jax
import jax.numpy as jnp
from jax.experimental import pallas as pl
from jax.experimental.pallas import tpu as pltpu

LEAKY_SLOPE = 0.01
BN_EPS = 1e-5

# (in, out) sizes of the six Linear layers, and which are followed by BN.
_LAYER_DIMS = [(773, 1024), (1024, 512), (512, 256), (256, 128), (128, 64), (64, 1968)]
_HAS_BN = [True, True, False, False, False, False]

F_IN = 773       # input feature width (kept unpadded: full-array last dim is exempt)
OUT = 1968       # true output width
OUT_PAD = 2048   # padded output width (16 * 128, lane-aligned -> unmasked stores)


def _round_up(x, m):
    return ((x + m - 1) // m) * m


def _cdiv(a, b):
    return (a + b - 1) // b


def _mlp_kernel(x_ref, *rest):
    """rest = (w1, b1, w2, b2, ..., w6, b6, o_ref)."""
    o_ref = rest[-1]
    wb = rest[:-1]
    n_layers = len(wb) // 2

    h = x_ref[...]                                  # bf16 (TB, 773), no layer-0 cast
    for li in range(n_layers):
        w = wb[2 * li][...]                         # bf16 [in, out] (BN/bias pre-folded)
        b = wb[2 * li + 1][...]                     # f32  [1, out]
        # bf16 MXU inputs, f32 accumulation; elementwise stays f32 (v5e-friendly).
        acc = jnp.dot(h, w, preferred_element_type=jnp.float32) + b
        if li < n_layers - 1:
            acc = jnp.where(acc > 0, acc, LEAKY_SLOPE * acc)   # LeakyReLU (Dropout = id)
            h = acc.astype(jnp.bfloat16)            # bf16 inputs for next MXU layer
        else:
            o_ref[...] = acc.astype(o_ref.dtype)    # bf16 output tile


def init_raw_params(key):
    """Deterministic init matching the PyTorch module's __init__ (f32, unfolded)."""
    raw = []
    for (fan_in, fan_out), has_bn in zip(_LAYER_DIMS, _HAS_BN):
        key, wk = jax.random.split(key)
        bound = math.sqrt(6.0 / (fan_in + fan_out))  # xavier_uniform_
        w = jax.random.uniform(wk, (fan_in, fan_out), jnp.float32, -bound, bound)
        b = jnp.full((1, fan_out), 0.01, jnp.float32)  # bias.data.fill_(0.01)
        if has_bn:
            gamma = jnp.ones((1, fan_out), jnp.float32)
            beta = jnp.zeros((1, fan_out), jnp.float32)
            running_mean = jnp.zeros((1, fan_out), jnp.float32)
            running_var = jnp.ones((1, fan_out), jnp.float32)
            raw.append((w, b, (gamma, beta, running_mean, running_var)))
        else:
            raw.append((w, b, None))
    return raw


def prepare_params(raw):
    """Fold eval-mode BN into W/b, pad only the output head to 2048, cast W to bf16."""
    params = []
    n = len(raw)
    for li, (w, b, bn) in enumerate(raw):
        if bn is not None:
            gamma, beta, running_mean, running_var = bn
            scale = gamma / jnp.sqrt(running_var + BN_EPS)   # [1, out]
            shift = beta - running_mean * scale              # [1, out]
            w = w * scale                                    # column-scale
            b = b * scale + shift
        if li == n - 1:
            fi, fo = w.shape
            w = jnp.zeros((fi, OUT_PAD), jnp.float32).at[:, :fo].set(w)
            b = jnp.zeros((1, OUT_PAD), jnp.float32).at[:, :fo].set(b)
        params.append(w.astype(jnp.bfloat16))   # weights bf16 (native MXU dtype)
        params.append(b.astype(jnp.float32))    # biases stay f32
    return params


def _tpu_vmem_limit_bytes():
    """Generation-dependent scoped-VMEM limit; conservative fallback if unknown."""
    try:
        cap = int(pltpu.get_tpu_info().vmem_capacity_bytes)
    except Exception:
        cap = 0
    if cap >= 128 * 1024 * 1024:
        return 64 * 1024 * 1024                     # v5e / v6e (128 MiB physical)
    if cap > 0:
        return min(40 * 1024 * 1024, (cap * 3) // 5)  # v7x-class (64 MiB physical)
    return 32 * 1024 * 1024                         # unknown: safe everywhere


def necromindx_forward(x, params, *, tb=512):
    """x: (B, 773) f32; params: prepared (folded / head-padded / bf16). Returns (B, 1968) f32."""
    B, F = x.shape
    assert F == F_IN, F

    # Balanced batch tiling (multiples of 8 sublanes); guarantee >= 2 grid steps
    # when the batch allows so dual-TC chips use both cores and the pipeline can
    # overlap DMA with compute. E.g. B=300 -> 2 tiles of 152 (not 2 of 256).
    n_tiles = max(1, _cdiv(B, tb))
    if n_tiles == 1 and B > 8:
        n_tiles = 2
    tb_eff = _round_up(_cdiv(B, n_tiles), 8)
    B_pad = _round_up(B, tb_eff)
    grid = (B_pad // tb_eff,)

    # bf16 input; pad batch rows only. No feature-dim HBM pad copy (773 is the
    # full-array last dim, so the BlockSpec accepts it directly).
    x_bf = x.astype(jnp.bfloat16)
    if B_pad != B:
        x_bf = jnp.pad(x_bf, ((0, B_pad - B), (0, 0)))

    in_specs = [pl.BlockSpec((tb_eff, F_IN), lambda i: (i, 0))]
    for p in params:
        # Constant index_map -> weights/biases DMA'd once, VMEM-resident across all
        # batch tiles; single-buffered since the block never changes.
        in_specs.append(
            pl.BlockSpec(p.shape, lambda i: (0, 0), pipeline_mode=pl.Buffered(1))
        )

    out_spec = pl.BlockSpec((tb_eff, OUT_PAD), lambda i: (i, 0))
    out_shape = jax.ShapeDtypeStruct((B_pad, OUT_PAD), jnp.bfloat16)

    out = pl.pallas_call(
        _mlp_kernel,
        out_shape=out_shape,
        grid=grid,
        in_specs=in_specs,
        out_specs=out_spec,
        compiler_params=pltpu.CompilerParams(
            dimension_semantics=("parallel",),
            vmem_limit_bytes=_tpu_vmem_limit_bytes(),
        ),
    )(x_bf, *params)

    return out[:B, :OUT].astype(jnp.float32)


def _reference_forward(x, params):
    """Plain-JAX reference mirroring the kernel math (bf16 activations, f32 accum)."""
    h = x.astype(jnp.bfloat16)
    n_layers = len(params) // 2
    for li in range(n_layers):
        w = params[2 * li]
        b = params[2 * li + 1]
        h = jnp.dot(h, w, preferred_element_type=jnp.float32) + b
        if li < n_layers - 1:
            h = jnp.where(h > 0, h, LEAKY_SLOPE * h).astype(jnp.bfloat16)
    return h.astype(jnp.bfloat16)[:, :OUT].astype(jnp.float32)


if __name__ == "__main__":
    key = jax.random.PRNGKey(0)
    pkey, xkey, xkey2 = jax.random.split(key, 3)

    raw = init_raw_params(pkey)
    params = prepare_params(raw)

    # Small batch (single grid step: B=2 -> one 8-row tile).
    batch = 2
    x = jax.random.normal(xkey, (batch, F_IN), jnp.float32)
    out = jax.block_until_ready(necromindx_forward(x, params))
    assert out.shape == (batch, OUT), out.shape
    ref = _reference_forward(x, params)
    assert jnp.allclose(out, ref, rtol=2e-2, atol=2e-2), "mismatch vs JAX reference (B=2)"

    # Larger ragged batch (exercises balanced tiling: B=300 -> 2 tiles of 152).
    batch2 = 300
    x2 = jax.random.normal(xkey2, (batch2, F_IN), jnp.float32)
    out2 = jax.block_until_ready(necromindx_forward(x2, params))
    assert out2.shape == (batch2, OUT), out2.shape
    ref2 = _reference_forward(x2, params)
    assert jnp.allclose(out2, ref2, rtol=2e-2, atol=2e-2), "mismatch vs JAX reference (B=300)"

    print("KERNEL_OK")
</pallas_src>

<mosaic_0001>
module attributes {stable_mosaic.version = 11 : i64} {
  func.func @_mlp_kernel(%arg0: i32, %arg1: memref<8x773xbf16, #tpu.memory_space<vmem>>, %arg2: memref<773x1024xbf16, #tpu.memory_space<vmem>>, %arg3: memref<1x1024xf32, #tpu.memory_space<vmem>>, %arg4: memref<1024x512xbf16, #tpu.memory_space<vmem>>, %arg5: memref<1x512xf32, #tpu.memory_space<vmem>>, %arg6: memref<512x256xbf16, #tpu.memory_space<vmem>>, %arg7: memref<1x256xf32, #tpu.memory_space<vmem>>, %arg8: memref<256x128xbf16, #tpu.memory_space<vmem>>, %arg9: memref<1x128xf32, #tpu.memory_space<vmem>>, %arg10: memref<128x64xbf16, #tpu.memory_space<vmem>>, %arg11: memref<1x64xf32, #tpu.memory_space<vmem>>, %arg12: memref<64x2048xbf16, #tpu.memory_space<vmem>>, %arg13: memref<1x2048xf32, #tpu.memory_space<vmem>>, %arg14: memref<8x2048xbf16, #tpu.memory_space<vmem>>) attributes {dimension_semantics = [#tpu.dimension_semantics<parallel>], iteration_bounds = array<i64: 1>, scalar_prefetch = 0 : i64, scratch_operands = 0 : i64, tpu.core_type = #tpu.core_type<tc>, window_params = [{transform_indices = @transform_0, window_bounds = array<i64: 8, 773>}, {pipeline_mode = #tpu.pipeline_mode<synchronous>, transform_indices = @transform_1, window_bounds = array<i64: 773, 1024>}, {pipeline_mode = #tpu.pipeline_mode<synchronous>, transform_indices = @transform_2, window_bounds = array<i64: 1, 1024>}, {pipeline_mode = #tpu.pipeline_mode<synchronous>, transform_indices = @transform_3, window_bounds = array<i64: 1024, 512>}, {pipeline_mode = #tpu.pipeline_mode<synchronous>, transform_indices = @transform_4, window_bounds = array<i64: 1, 512>}, {pipeline_mode = #tpu.pipeline_mode<synchronous>, transform_indices = @transform_5, window_bounds = array<i64: 512, 256>}, {pipeline_mode = #tpu.pipeline_mode<synchronous>, transform_indices = @transform_6, window_bounds = array<i64: 1, 256>}, {pipeline_mode = #tpu.pipeline_mode<synchronous>, transform_indices = @transform_7, window_bounds = array<i64: 256, 128>}, {pipeline_mode = #tpu.pipeline_mode<synchronous>, transform_indices = @transform_8, window_bounds = array<i64: 1, 128>}, {pipeline_mode = #tpu.pipeline_mode<synchronous>, transform_indices = @transform_9, window_bounds = array<i64: 128, 64>}, {pipeline_mode = #tpu.pipeline_mode<synchronous>, transform_indices = @transform_10, window_bounds = array<i64: 1, 64>}, {pipeline_mode = #tpu.pipeline_mode<synchronous>, transform_indices = @transform_11, window_bounds = array<i64: 64, 2048>}, {pipeline_mode = #tpu.pipeline_mode<synchronous>, transform_indices = @transform_12, window_bounds = array<i64: 1, 2048>}, {transform_indices = @transform_13, window_bounds = array<i64: 8, 2048>}]} {
    %c0 = arith.constant 0 : index
    %c0_0 = arith.constant 0 : index
    %0 = vector.load %arg1[%c0, %c0_0] : memref<8x773xbf16, #tpu.memory_space<vmem>>, vector<8x773xbf16>
    %c0_1 = arith.constant 0 : index
    %c0_2 = arith.constant 0 : index
    %1 = vector.load %arg2[%c0_1, %c0_2] : memref<773x1024xbf16, #tpu.memory_space<vmem>>, vector<773x1024xbf16>
    %c0_3 = arith.constant 0 : index
    %c0_4 = arith.constant 0 : index
    %2 = vector.load %arg3[%c0_3, %c0_4] : memref<1x1024xf32, #tpu.memory_space<vmem>>, vector<1x1024xf32>
    %cst = arith.constant dense<0.000000e+00> : vector<8x1024xf32>
    %3 = tpu.matmul %0, %1, %cst {dimension_numbers = #tpu.dot_dimension_numbers<[1], [0], [0], [1], [0, 0, 1, 1], [], []>} : vector<8x773xbf16>, vector<773x1024xbf16>, vector<8x1024xf32> -> vector<8x1024xf32>
    %4 = vector.broadcast %2 : vector<1x1024xf32> to vector<8x1024xf32>
    %5 = arith.addf %3, %4 : vector<8x1024xf32>
    %cst_5 = arith.constant 0.000000e+00 : f32
    %6 = vector.broadcast %cst_5 : f32 to vector<8x1024xf32>
    %7 = arith.cmpf ogt, %5, %6 : vector<8x1024xf32>
    %cst_6 = arith.constant 0.00999999977 : f32
    %8 = vector.broadcast %cst_6 : f32 to vector<8x1024xf32>
    %9 = arith.mulf %8, %5 : vector<8x1024xf32>
    %10 = arith.select %7, %5, %9 : vector<8x1024xi1>, vector<8x1024xf32>
    %11 = arith.truncf %10 : vector<8x1024xf32> to vector<8x1024xbf16>
    %c0_7 = arith.constant 0 : index
    %c0_8 = arith.constant 0 : index
    %12 = vector.load %arg4[%c0_7, %c0_8] : memref<1024x512xbf16, #tpu.memory_space<vmem>>, vector<1024x512xbf16>
    %c0_9 = arith.constant 0 : index
    %c0_10 = arith.constant 0 : index
    %13 = vector.load %arg5[%c0_9, %c0_10] : memref<1x512xf32, #tpu.memory_space<vmem>>, vector<1x512xf32>
    %cst_11 = arith.constant dense<0.000000e+00> : vector<8x512xf32>
    %14 = tpu.matmul %11, %12, %cst_11 {dimension_numbers = #tpu.dot_dimension_numbers<[1], [0], [0], [1], [0, 0, 1, 1], [], []>} : vector<8x1024xbf16>, vector<1024x512xbf16>, vector<8x512xf32> -> vector<8x512xf32>
    %15 = vector.broadcast %13 : vector<1x512xf32> to vector<8x512xf32>
    %16 = arith.addf %14, %15 : vector<8x512xf32>
    %cst_12 = arith.constant 0.000000e+00 : f32
    %17 = vector.broadcast %cst_12 : f32 to vector<8x512xf32>
    %18 = arith.cmpf ogt, %16, %17 : vector<8x512xf32>
    %cst_13 = arith.constant 0.00999999977 : f32
    %19 = vector.broadcast %cst_13 : f32 to vector<8x512xf32>
    %20 = arith.mulf %19, %16 : vector<8x512xf32>
    %21 = arith.select %18, %16, %20 : vector<8x512xi1>, vector<8x512xf32>
    %22 = arith.truncf %21 : vector<8x512xf32> to vector<8x512xbf16>
    %c0_14 = arith.constant 0 : index
    %c0_15 = arith.constant 0 : index
    %23 = vector.load %arg6[%c0_14, %c0_15] : memref<512x256xbf16, #tpu.memory_space<vmem>>, vector<512x256xbf16>
    %c0_16 = arith.constant 0 : index
    %c0_17 = arith.constant 0 : index
    %24 = vector.load %arg7[%c0_16, %c0_17] : memref<1x256xf32, #tpu.memory_space<vmem>>, vector<1x256xf32>
    %cst_18 = arith.constant dense<0.000000e+00> : vector<8x256xf32>
    %25 = tpu.matmul %22, %23, %cst_18 {dimension_numbers = #tpu.dot_dimension_numbers<[1], [0], [0], [1], [0, 0, 1, 1], [], []>} : vector<8x512xbf16>, vector<512x256xbf16>, vector<8x256xf32> -> vector<8x256xf32>
    %26 = vector.broadcast %24 : vector<1x256xf32> to vector<8x256xf32>
    %27 = arith.addf %25, %26 : vector<8x256xf32>
    %cst_19 = arith.constant 0.000000e+00 : f32
    %28 = vector.broadcast %cst_19 : f32 to vector<8x256xf32>
    %29 = arith.cmpf ogt, %27, %28 : vector<8x256xf32>
    %cst_20 = arith.constant 0.00999999977 : f32
    %30 = vector.broadcast %cst_20 : f32 to vector<8x256xf32>
    %31 = arith.mulf %30, %27 : vector<8x256xf32>
    %32 = arith.select %29, %27, %31 : vector<8x256xi1>, vector<8x256xf32>
    %33 = arith.truncf %32 : vector<8x256xf32> to vector<8x256xbf16>
    %c0_21 = arith.constant 0 : index
    %c0_22 = arith.constant 0 : index
    %34 = vector.load %arg8[%c0_21, %c0_22] : memref<256x128xbf16, #tpu.memory_space<vmem>>, vector<256x128xbf16>
    %c0_23 = arith.constant 0 : index
    %c0_24 = arith.constant 0 : index
    %35 = vector.load %arg9[%c0_23, %c0_24] : memref<1x128xf32, #tpu.memory_space<vmem>>, vector<1x128xf32>
    %cst_25 = arith.constant dense<0.000000e+00> : vector<8x128xf32>
    %36 = tpu.matmul %33, %34, %cst_25 {dimension_numbers = #tpu.dot_dimension_numbers<[1], [0], [0], [1], [0, 0, 1, 1], [], []>} : vector<8x256xbf16>, vector<256x128xbf16>, vector<8x128xf32> -> vector<8x128xf32>
    %37 = vector.broadcast %35 : vector<1x128xf32> to vector<8x128xf32>
    %38 = arith.addf %36, %37 : vector<8x128xf32>
    %cst_26 = arith.constant 0.000000e+00 : f32
    %39 = vector.broadcast %cst_26 : f32 to vector<8x128xf32>
    %40 = arith.cmpf ogt, %38, %39 : vector<8x128xf32>
    %cst_27 = arith.constant 0.00999999977 : f32
    %41 = vector.broadcast %cst_27 : f32 to vector<8x128xf32>
    %42 = arith.mulf %41, %38 : vector<8x128xf32>
    %43 = arith.select %40, %38, %42 : vector<8x128xi1>, vector<8x128xf32>
    %44 = arith.truncf %43 : vector<8x128xf32> to vector<8x128xbf16>
    %c0_28 = arith.constant 0 : index
    %c0_29 = arith.constant 0 : index
    %45 = vector.load %arg10[%c0_28, %c0_29] : memref<128x64xbf16, #tpu.memory_space<vmem>>, vector<128x64xbf16>
    %c0_30 = arith.constant 0 : index
    %c0_31 = arith.constant 0 : index
    %46 = vector.load %arg11[%c0_30, %c0_31] : memref<1x64xf32, #tpu.memory_space<vmem>>, vector<1x64xf32>
    %cst_32 = arith.constant dense<0.000000e+00> : vector<8x64xf32>
    %47 = tpu.matmul %44, %45, %cst_32 {dimension_numbers = #tpu.dot_dimension_numbers<[1], [0], [0], [1], [0, 0, 1, 1], [], []>} : vector<8x128xbf16>, vector<128x64xbf16>, vector<8x64xf32> -> vector<8x64xf32>
    %48 = vector.broadcast %46 : vector<1x64xf32> to vector<8x64xf32>
    %49 = arith.addf %47, %48 : vector<8x64xf32>
    %cst_33 = arith.constant 0.000000e+00 : f32
    %50 = vector.broadcast %cst_33 : f32 to vector<8x64xf32>
    %51 = arith.cmpf ogt, %49, %50 : vector<8x64xf32>
    %cst_34 = arith.constant 0.00999999977 : f32
    %52 = vector.broadcast %cst_34 : f32 to vector<8x64xf32>
    %53 = arith.mulf %52, %49 : vector<8x64xf32>
    %54 = arith.select %51, %49, %53 : vector<8x64xi1>, vector<8x64xf32>
    %55 = arith.truncf %54 : vector<8x64xf32> to vector<8x64xbf16>
    %c0_35 = arith.constant 0 : index
    %c0_36 = arith.constant 0 : index
    %56 = vector.load %arg12[%c0_35, %c0_36] : memref<64x2048xbf16, #tpu.memory_space<vmem>>, vector<64x2048xbf16>
    %c0_37 = arith.constant 0 : index
    %c0_38 = arith.constant 0 : index
    %57 = vector.load %arg13[%c0_37, %c0_38] : memref<1x2048xf32, #tpu.memory_space<vmem>>, vector<1x2048xf32>
    %cst_39 = arith.constant dense<0.000000e+00> : vector<8x2048xf32>
    %58 = tpu.matmul %55, %56, %cst_39 {dimension_numbers = #tpu.dot_dimension_numbers<[1], [0], [0], [1], [0, 0, 1, 1], [], []>} : vector<8x64xbf16>, vector<64x2048xbf16>, vector<8x2048xf32> -> vector<8x2048xf32>
    %59 = vector.broadcast %57 : vector<1x2048xf32> to vector<8x2048xf32>
    %60 = arith.addf %58, %59 : vector<8x2048xf32>
    %61 = arith.truncf %60 : vector<8x2048xf32> to vector<8x2048xbf16>
    %c0_40 = arith.constant 0 : index
    %c0_41 = arith.constant 0 : index
    %62 = vector.load %arg14[%c0_40, %c0_41] : memref<8x2048xbf16, #tpu.memory_space<vmem>>, vector<8x2048xbf16>
    tpu.vector_store %arg14[%c0_40, %c0_41], %61 {strides = array<i32>} : memref<8x2048xbf16, #tpu.memory_space<vmem>>, vector<8x2048xbf16>,
    return
  }
  func.func @transform_0(%arg0: i32) -> (i32, i32) {
    %c0_i32 = arith.constant 0 : i32
    %c0_i32_0 = arith.constant 0 : i32
    return %arg0, %c0_i32 : i32, i32
  }
  func.func @transform_1(%arg0: i32) -> (i32, i32) {
    %c0_i32 = arith.constant 0 : i32
    %c0_i32_0 = arith.constant 0 : i32
    %c0_i32_1 = arith.constant 0 : i32
    return %c0_i32, %c0_i32_0 : i32, i32
  }
  func.func @transform_2(%arg0: i32) -> (i32, i32) {
    %c0_i32 = arith.constant 0 : i32
    %c0_i32_0 = arith.constant 0 : i32
    %c0_i32_1 = arith.constant 0 : i32
    return %c0_i32, %c0_i32_0 : i32, i32
  }
  func.func @transform_3(%arg0: i32) -> (i32, i32) {
    %c0_i32 = arith.constant 0 : i32
    %c0_i32_0 = arith.constant 0 : i32
    %c0_i32_1 = arith.constant 0 : i32
    return %c0_i32, %c0_i32_0 : i32, i32
  }
  func.func @transform_4(%arg0: i32) -> (i32, i32) {
    %c0_i32 = arith.constant 0 : i32
    %c0_i32_0 = arith.constant 0 : i32
    %c0_i32_1 = arith.constant 0 : i32
    return %c0_i32, %c0_i32_0 : i32, i32
  }
  func.func @transform_5(%arg0: i32) -> (i32, i32) {
    %c0_i32 = arith.constant 0 : i32
    %c0_i32_0 = arith.constant 0 : i32
    %c0_i32_1 = arith.constant 0 : i32
    return %c0_i32, %c0_i32_0 : i32, i32
  }
  func.func @transform_6(%arg0: i32) -> (i32, i32) {
    %c0_i32 = arith.constant 0 : i32
    %c0_i32_0 = arith.constant 0 : i32
    %c0_i32_1 = arith.constant 0 : i32
    return %c0_i32, %c0_i32_0 : i32, i32
  }
  func.func @transform_7(%arg0: i32) -> (i32, i32) {
    %c0_i32 = arith.constant 0 : i32
    %c0_i32_0 = arith.constant 0 : i32
    %c0_i32_1 = arith.constant 0 : i32
    return %c0_i32, %c0_i32_0 : i32, i32
  }
  func.func @transform_8(%arg0: i32) -> (i32, i32) {
    %c0_i32 = arith.constant 0 : i32
    %c0_i32_0 = arith.constant 0 : i32
    %c0_i32_1 = arith.constant 0 : i32
    return %c0_i32, %c0_i32_0 : i32, i32
  }
  func.func @transform_9(%arg0: i32) -> (i32, i32) {
    %c0_i32 = arith.constant 0 : i32
    %c0_i32_0 = arith.constant 0 : i32
    %c0_i32_1 = arith.constant 0 : i32
    return %c0_i32, %c0_i32_0 : i32, i32
  }
  func.func @transform_10(%arg0: i32) -> (i32, i32) {
    %c0_i32 = arith.constant 0 : i32
    %c0_i32_0 = arith.constant 0 : i32
    %c0_i32_1 = arith.constant 0 : i32
    return %c0_i32, %c0_i32_0 : i32, i32
  }
  func.func @transform_11(%arg0: i32) -> (i32, i32) {
    %c0_i32 = arith.constant 0 : i32
    %c0_i32_0 = arith.constant 0 : i32
    %c0_i32_1 = arith.constant 0 : i32
    return %c0_i32, %c0_i32_0 : i32, i32
  }
  func.func @transform_12(%arg0: i32) -> (i32, i32) {
    %c0_i32 = arith.constant 0 : i32
    %c0_i32_0 = arith.constant 0 : i32
    %c0_i32_1 = arith.constant 0 : i32
    return %c0_i32, %c0_i32_0 : i32, i32
  }
  func.func @transform_13(%arg0: i32) -> (i32, i32) {
    %c0_i32 = arith.constant 0 : i32
    %c0_i32_0 = arith.constant 0 : i32
    return %arg0, %c0_i32 : i32, i32
  }
}

</mosaic_0001>

<bundles_post_ra>
// kernel: tpu_custom_call.1
= control target key start
LH: loop header
LB: loop body
LE: loop exit
PB: predicated region body
PF: predicated region fallthrough
CT: control target
= control target key end

     0   :  { %18 = vsyncpa [#allocation3], 0  ;;  %s11634_s0 = inlined_call_operand.hbm [shape: bf16[8,773], index: 0, kind: input, shape index: {}]   ;;  %s11635_s1 = inlined_call_operand.hbm [shape: bf16[773,1024], index: 1, kind: input, shape index: {}]   ;;  %s11636_s2 = inlined_call_operand.hbm [shape: f32[1,1024], index: 2, kind: input, shape index: {}]   ;;  %s11637_s3 = inlined_call_operand.hbm [shape: bf16[1024,512], index: 3, kind: input, shape index: {}]   ;;  %s11638_s4 = inlined_call_operand.hbm [shape: f32[1,512], index: 4, kind: input, shape index: {}]   ;;  %s11639_s5 = inlined_call_operand.hbm [shape: bf16[512,256], index: 5, kind: input, shape index: {}]   ;;  %s11640_s6 = inlined_call_operand.hbm [shape: f32[1,256], index: 6, kind: input, shape index: {}]   ;;  %s11641_s7 = inlined_call_operand.hbm [shape: bf16[256,128], index: 7, kind: input, shape index: {}]   ;;  %s11642_s8 = inlined_call_operand.hbm [shape: f32[1,128], index: 8, kind: input, shape index: {}]   ;;  %s11643_s9 = inlined_call_operand.vmem [shape: bf16[128,64], index: 9, kind: input, shape index: {}]   ;;  %s11644_s10 = inlined_call_operand.hbm [shape: f32[1,64], index: 10, kind: input, shape index: {}]   ;;  %s11645_s11 = inlined_call_operand.hbm [shape: bf16[64,2048], index: 11, kind: input, shape index: {}]   ;;  %s11646_s12 = inlined_call_operand.hbm [shape: f32[1,2048], index: 12, kind: input, shape index: {}]   ;;  %s11647_s13 = inlined_call_operand.hbm [shape: bf16[8,2048], index: 13, kind: output, shape index: {}]  }
   0x1   :  { %19 = vsyncpa [#allocation6], 0 }
   0x2   :  { %20 = vsyncpa [#allocation9], 0 }
   0x3   :  { %21 = vsyncpa [#allocation12], 0 }
   0x4   :  { %22 = vsyncpa [#allocation15], 0 }
   0x5   :  { %23 = vsyncpa [#allocation18], 0 }
   0x6   :  { %24 = vsyncpa [#allocation21], 0  ;;  %s41_s27 = sshll.u32 %s11635_s1, 4  ;;  %s42_s27 = int_to_ptr.hbm [resolvable:$true] %s41_s27 }
   0x7   :  { %25 = vsyncpa [#allocation4], 0  ;;  %s11123_s28 = smov [#allocation5]   ;;  %s65_s15 = sshll.u32 %s11637_s3, 4  ;;  %s66_s15 = int_to_ptr.hbm [resolvable:$true] %s65_s15 }
   0x8   :  { %s43_s29 = sshll.u32 %s11123_s28, 4  ;;  %s11124_s16 = smov 512   ;;  %s44_s29 = int_to_ptr.vmem [resolvable:$true] %s43_s29 }
   0x9   :  { %s11125_s17 = smov 32   ;;  %s11126_s18 = smov [#allocation8]  }
   0xa   :  { %49 = dma.hbm_to_vmem [thread:$0]  %s42_s27, 49664, %s44_s29, [#allocation6], %s11124_s16, %s11124_s16, %s11125_s17  }
   0xb   :  { %s67_s19 = sshll.u32 %s11126_s18, 4  ;;  %s11127_s20 = smov 256   ;;  %s68_s19 = int_to_ptr.vmem [resolvable:$true] %s67_s19 }
   0xc   :  { %s11128_s21 = smov 16   ;;  %s89_s23 = sshll.u32 %s11639_s5, 4  ;;  %s90_s23 = int_to_ptr.hbm [resolvable:$true] %s89_s23 }
   0xd   :  { %73 = dma.hbm_to_vmem [thread:$0]  %s66_s15, 32768, %s68_s19, [#allocation9], %s11127_s20, %s11127_s20, %s11128_s21  }
   0xe   :  { %s11129_s24 = smov [#allocation11]   ;;  %s113_s28 = sshll.u32 %s11641_s7, 4  ;;  %s114_s28 = int_to_ptr.hbm [resolvable:$true] %s113_s28 }
   0xf   :  { %s91_s25 = sshll.u32 %s11129_s24, 4  ;;  %s11130_s27 = smov 128   ;;  %s92_s25 = int_to_ptr.vmem [resolvable:$true] %s91_s25 }
  0x10   :  { %s11131_s29 = smov 8   ;;  %s11132_s30 = smov [#allocation14]  }
  0x11   :  { %97 = dma.hbm_to_vmem [thread:$0]  %s90_s23, 8192, %s92_s25, [#allocation12], %s11130_s27, %s11130_s27, %s11131_s29  }
  0x12   :  { %s115_s14 = sshll.u32 %s11132_s30, 4  ;;  %s11133_s15 = smov 64   ;;  %s116_s14 = int_to_ptr.vmem [resolvable:$true] %s115_s14 }
  0x13   :  { %s11134_s16 = smov 4   ;;  %s140_s18 = sshll.u32 %s11644_s10, 4  ;;  %s141_s18 = int_to_ptr.hbm [resolvable:$true] %s140_s18 }
  0x14   :  { %121 = dma.hbm_to_vmem [thread:$0]  %s114_s28, 2048, %s116_s14, [#allocation15], %s11133_s15, %s11133_s15, %s11134_s16  }
  0x15   :  { %s11135_s19 = smov [#allocation17]   ;;  %s31_s1 = sshll.u32 %s11634_s0, 4  ;;  %s32_s1 = int_to_ptr.hbm [resolvable:$true] %s31_s1 }
  0x16   :  { %s142_s20 = sshll.u32 %s11135_s19, 4  ;;  %s11136_s22 = smov [#allocation2]   ;;  %s143_s20 = int_to_ptr.vmem [resolvable:$true] %s142_s20 }
  0x17   :  { %145 = dma.hbm_to_vmem [thread:$0]  %s141_s18, 16, %s143_s20, [#allocation18]  }
  0x18   :  { %s33_s23 = sshll.u32 %s11136_s22, 4  ;;  %s55_s26 = sshll.u32 %s11636_s2, 4  ;;  %s34_s23 = int_to_ptr.vmem [resolvable:$true] %s33_s23  ;;  %s56_s26 = int_to_ptr.hbm [resolvable:$true] %s55_s26 }
  0x19   :  { %36 = dma.hbm_to_vmem [thread:$0]  %s32_s1, 448, %s34_s23, [#allocation3]  }
  0x1a   :  { %s79_s28 = sshll.u32 %s11638_s4, 4  ;;  %s11137_s27 = smov [#allocation7]   ;;  %s80_s28 = int_to_ptr.hbm [resolvable:$true] %s79_s28 }
  0x1b   :  { %s57_s29 = sshll.u32 %s11137_s27, 4  ;;  %s11138_s0 = smov [#allocation10]   ;;  %s58_s29 = int_to_ptr.vmem [resolvable:$true] %s57_s29 }
  0x1c   :  { %60 = dma.hbm_to_vmem [thread:$0]  %s56_s26, 128, %s58_s29, [#allocation6]  }
  0x1d   :  { %s81_s30 = sshll.u32 %s11138_s0, 4  ;;  %s103_s5 = sshll.u32 %s11640_s6, 4  ;;  %s82_s30 = int_to_ptr.vmem [resolvable:$true] %s81_s30  ;;  %s104_s5 = int_to_ptr.hbm [resolvable:$true] %s103_s5 }
  0x1e   :  { %84 = dma.hbm_to_vmem [thread:$0]  %s80_s28, 64, %s82_s30, [#allocation9]  }
  0x1f   :  { %s127_s18 = sshll.u32 %s11642_s8, 4  ;;  %s11139_s19 = smov [#allocation13]   ;;  %s128_s18 = int_to_ptr.hbm [resolvable:$true] %s127_s18 }
  0x20   :  { %s105_s4 = sshll.u32 %s11139_s19, 4  ;;  %s11140_s20 = smov [#allocation16]   ;;  %s106_s4 = int_to_ptr.vmem [resolvable:$true] %s105_s4 }
  0x21   :  { %108 = dma.hbm_to_vmem [thread:$0]  %s104_s5, 32, %s106_s4, [#allocation12]  }
  0x22   :  { %s129_s7 = sshll.u32 %s11140_s20, 4  ;;  %s150_s22 = sshll.u32 %s11645_s11, 4  ;;  %s130_s7 = int_to_ptr.vmem [resolvable:$true] %s129_s7  ;;  %s151_s22 = int_to_ptr.hbm [resolvable:$true] %s150_s22 }
  0x23   :  { %132 = dma.hbm_to_vmem [thread:$0]  %s128_s18, 16, %s130_s7, [#allocation15]  }
  0x24   :  { %s11141_s6 = smov [#allocation19]   ;;  %s164_s8 = sshll.u32 %s11646_s12, 4  ;;  %s165_s8 = int_to_ptr.hbm [resolvable:$true] %s164_s8 }
  0x25   :  { %s152_s23 = sshll.u32 %s11141_s6, 4  ;;  %s11142_s26 = smov 1024   ;;  %s153_s23 = int_to_ptr.vmem [resolvable:$true] %s152_s23 }
  0x26   :  { %158 = dma.hbm_to_vmem [thread:$0]  %s151_s22, 8192, %s153_s23, [#allocation18], %s11142_s26, %s11142_s26, %s11133_s15  }
  0x27   :  { %s11143_s10 = smov [#allocation20]  }
  0x28   :  { %s166_s3 = sshll.u32 %s11143_s10, 4  ;;  %s167_s3 = int_to_ptr.vmem [resolvable:$true] %s166_s3 }
  0x29   :  { %169 = dma.hbm_to_vmem [thread:$0]  %s165_s8, 256, %s167_s3, [#allocation21]  }
  0x2a   :  { %11107 = dma.done.wait [#allocation3], 448  }
  0x2b   :  { %11108 = vsyncadd [#allocation3], 4294966848 }
  0x2c   :  { %11109 = dma.done.wait [#allocation6], 49792  }
  0x2d   :  { %11110 = vsyncadd [#allocation6], 4294917504 }
  0x2e   :  { %11111 = dma.done.wait [#allocation9], 32832  }
  0x2f   :  { %11112 = vsyncadd [#allocation9], 4294934464 }
  0x30   :  { %11113 = dma.done.wait [#allocation12], 8224  }
  0x31   :  { %11114 = vsyncadd [#allocation12], 4294959072 }
  0x32   :  { %11115 = dma.done.wait [#allocation15], 2064  }
  0x33   :  { %11116 = vsyncadd [#allocation15], 4294965232 }
  0x34   :  { %11117 = dma.done.wait [#allocation18], 8208  }
  0x35   :  { %11118 = vsyncadd [#allocation18], 4294959088 }
  0x36   :  { %11119 = dma.done.wait [#allocation21], 256  }
  0x37   :  { %11120 = vsyncadd [#allocation21], 4294967040  ;;  %v7009_v0 = vld [vmem:[#allocation5 + $0x1c0] sm:$0xf]  ;;  %vm2597_vm0 = vcmask 1041408   ;;  %vm2598_vm1 = vcmask 1042432  }
  0x38   :  { %v10035_v1 = vld [vmem:[#allocation5 + $0x1dc] sm:$0xf0]  ;;  %vm2593_vm2 = vcmask 39936   ;;  %s6767_s1 = sshll.u32 %s11647_s13, 4  ;;  %s6768_s1 = int_to_ptr.hbm [resolvable:$true] %s6767_s1 }
  0x39   :  { %v7265_v2 = vld [vmem:[#allocation5 + $0x3c0] sm:$0xf]  ;;  %v7010_v3 = vor.u32 %v10035_v1, %v7009_v0 }
  0x3a   :  { %v10099_v4 = vld [vmem:[#allocation5 + $0x3dc] sm:$0xf0] }
  0x3b   :  { %v7521_v5 = vld [vmem:[#allocation5 + $0x5c0] sm:$0xf]  ;;  %v7266_v7 = vor.u32 %v10099_v4, %v7265_v2  ;;  %2625 = vmatpush.bf16.msra.mxu0 %v7010_v3 }
  0x3c   :  { %v10163_v6 = vld [vmem:[#allocation5 + $0x5dc] sm:$0xf0] }
  0x3d   :  { %v7522_v8 = vor.u32 %v10163_v6, %v7521_v5  ;;  %v7777_v9 = vld [vmem:[#allocation5 + $0x7c0] sm:$0xf]  ;;  %2638 = vmatpush.bf16.msra.mxu1 %v7266_v7 }
  0x3e   :  { %v10227_v10 = vld [vmem:[#allocation5 + $0x7dc] sm:$0xf0] }
  0x3f   :  { %v6977_v11 = vld [vmem:[#allocation5 + $0x180] sm:$0xf]  ;;  %v7778_v12 = vor.u32 %v10227_v10, %v7777_v9  ;;  %2651 = vmatpush.bf16.msra.mxu2 %v7522_v8 }
  0x40   :  { %v10027_v13 = vld [vmem:[#allocation5 + $0x19c] sm:$0xf0] }
  0x41   :  { %v7233_v14 = vld [vmem:[#allocation5 + $0x380] sm:$0xf]  ;;  %v6978_v16 = vor.u32 %v10027_v13, %v6977_v11  ;;  %2664 = vmatpush.bf16.msra.mxu3 %v7778_v12 }
  0x42   :  { %v10091_v15 = vld [vmem:[#allocation5 + $0x39c] sm:$0xf0] }
  0x43   :  { %v7234_v17 = vor.u32 %v10091_v15, %v7233_v14  ;;  %v7489_v18 = vld [vmem:[#allocation5 + $0x580] sm:$0xf]  ;;  %2626 = vmatpush.bf16.msra.mxu0 %v6978_v16 }
  0x44   :  { %v10155_v19 = vld [vmem:[#allocation5 + $0x59c] sm:$0xf0] }
  0x45   :  { %v7745_v20 = vld [vmem:[#allocation5 + $0x780] sm:$0xf]  ;;  %v7490_v21 = vor.u32 %v10155_v19, %v7489_v18  ;;  %2639 = vmatpush.bf16.msra.mxu1 %v7234_v17 }
  0x46   :  { %v10219_v22 = vld [vmem:[#allocation5 + $0x79c] sm:$0xf0] }
  0x47   :  { %v6945_v23 = vld [vmem:[#allocation5 + $0x140] sm:$0xf]  ;;  %v7746_v25 = vor.u32 %v10219_v22, %v7745_v20  ;;  %2652 = vmatpush.bf16.msra.mxu2 %v7490_v21 }
  0x48   :  { %v10019_v24 = vld [vmem:[#allocation5 + $0x15c] sm:$0xf0] }
  0x49   :  { %v7201_v26 = vld [vmem:[#allocation5 + $0x340] sm:$0xf]  ;;  %v6946_v29 = vor.u32 %v10019_v24, %v6945_v23  ;;  %2665 = vmatpush.bf16.msra.mxu3 %v7746_v25 }
  0x4a   :  { %v10083_v27 = vld [vmem:[#allocation5 + $0x35c] sm:$0xf0] }
  0x4b   :  { %v7457_v28 = vld [vmem:[#allocation5 + $0x540] sm:$0xf]  ;;  %v7202_v33 = vor.u32 %v10083_v27, %v7201_v26  ;;  %2627 = vmatpush.bf16.msra.mxu0 %v6946_v29  ;;  %v220_v27 = vld [vmem:[#allocation2 + $0x8] sm:$0xff] }
  0x4c   :  { %v10147_v30 = vld [vmem:[#allocation5 + $0x55c] sm:$0xf0] }
  0x4d   :  { %v7713_v31 = vld [vmem:[#allocation5 + $0x740] sm:$0xf]  ;;  %v7458_v34 = vor.u32 %v10147_v30, %v7457_v28  ;;  %2640 = vmatpush.bf16.msra.mxu1 %v7202_v33 }
  0x4e   :  { %v10211_v32 = vld [vmem:[#allocation5 + $0x75c] sm:$0xf0] }
  0x4f   :  { %v6913_v35 = vld [vmem:[#allocation5 + $0x100] sm:$0xf]  ;;  %v7714_v38 = vor.u32 %v10211_v32, %v7713_v31  ;;  %2653 = vmatpush.bf16.msra.mxu2 %v7458_v34  ;;  %v219_v32 = vld [vmem:[#allocation2] sm:$0xff] }
  0x50   :  { %v10011_v36 = vld [vmem:[#allocation5 + $0x11c] sm:$0xf0] }
  0x51   :  { %v7169_v37 = vld [vmem:[#allocation5 + $0x300] sm:$0xf]  ;;  %v6914_v44 = vor.u32 %v10011_v36, %v6913_v35  ;;  %2666 = vmatpush.bf16.msra.mxu3 %v7714_v38  ;;  %v11144_v35 = vmov 65535  }
  0x52   :  { %v10075_v39 = vld [vmem:[#allocation5 + $0x31c] sm:$0xf0]  ;;  %v2599_v36 = vsel %vm2597_vm0, 4294967295, %v11144_v35 }
  0x53   :  { %v7425_v40 = vld [vmem:[#allocation5 + $0x500] sm:$0xf]  ;;  %v7170_v45 = vor.u32 %v10075_v39, %v7169_v37  ;;  %2628 = vmatpush.bf16.msra.mxu0 %v6914_v44  ;;  %v10031_v39 = vld [vmem:[#allocation5 + $0x1c4] sm:$0xf] }
  0x54   :  { %v10139_v41 = vld [vmem:[#allocation5 + $0x51c] sm:$0xf0] }
  0x55   :  { %v7681_v42 = vld [vmem:[#allocation5 + $0x700] sm:$0xf]  ;;  %v7426_v46 = vor.u32 %v10139_v41, %v7425_v40  ;;  %2641 = vmatpush.bf16.msra.mxu1 %v7170_v45  ;;  %v7011_v40 = vld [vmem:[#allocation5 + $0x1e0] sm:$0xf0]  ;;  %v635_v41 = vunpack.c.l.b16 %v220_v27 }
  0x56   :  { %v10203_v43 = vld [vmem:[#allocation5 + $0x71c] sm:$0xf0] }
  0x57   :  { %v6881_v47 = vld [vmem:[#allocation5 + $0xc0] sm:$0xf]  ;;  %v7682_v50 = vor.u32 %v10203_v43, %v7681_v42  ;;  %2654 = vmatpush.bf16.msra.mxu2 %v7426_v46  ;;  %v633_v42 = vunpack.c.l.b16 %v219_v32  ;;  %v636_v46 = vunpack.c.h.b16 %v220_v27  ;;  %v222_v27 = vld [vmem:[#allocation2 + $0x18] sm:$0xf] }
  0x58   :  { %v10003_v48 = vld [vmem:[#allocation5 + $0xdc] sm:$0xf0] }
  0x59   :  { %v7137_v49 = vld [vmem:[#allocation5 + $0x2c0] sm:$0xf]  ;;  %v6882_v56 = vor.u32 %v10003_v48, %v6881_v47  ;;  %2667 = vmatpush.bf16.msra.mxu3 %v7682_v50  ;;  %v10095_v50 = vld [vmem:[#allocation5 + $0x3c4] sm:$0xf] }
  0x5a   :  { %v10067_v51 = vld [vmem:[#allocation5 + $0x2dc] sm:$0xf0] }
  0x5b   :  { %v7393_v52 = vld [vmem:[#allocation5 + $0x4c0] sm:$0xf]  ;;  %v7138_v57 = vor.u32 %v10067_v51, %v7137_v49  ;;  %2629 = vmatpush.bf16.msra.mxu0 %v6882_v56  ;;  %v11260_v49 = vsel %vm2598_vm1, %v2599_v36, 0  ;;  %v7267_v51 = vld [vmem:[#allocation5 + $0x3e0] sm:$0xf0] }
  0x5c   :  { %v10131_v53 = vld [vmem:[#allocation5 + $0x4dc] sm:$0xf0] }
  0x5d   :  { %v7649_v54 = vld [vmem:[#allocation5 + $0x6c0] sm:$0xf]  ;;  %v7394_v58 = vor.u32 %v10131_v53, %v7393_v52  ;;  %2642 = vmatpush.bf16.msra.mxu1 %v7138_v57  ;;  %v7014_v53 = vor.u32 %v10031_v39, %v7011_v40  ;;  %v11262_v57 = vpack.c.b16 %v635_v41, %v635_v41  ;;  %v6883_v39 = vld [vmem:[#allocation5 + $0xe0] sm:$0xf0]  ;;  %v639_v40 = vunpack.c.l.b16 %v222_v27 }
  0x5e   :  { %v10195_v55 = vld [vmem:[#allocation5 + $0x6dc] sm:$0xf0] }
  0x5f   :  { %v6849_v59 = vld [vmem:[#allocation5 + $0x80] sm:$0xf]  ;;  %v7650_v62 = vor.u32 %v10195_v55, %v7649_v54  ;;  %2655 = vmatpush.bf16.msra.mxu2 %v7394_v58 }
  0x60   :  { %v9995_v60 = vld [vmem:[#allocation5 + $0x9c] sm:$0xf0] }
  0x61   :  { %v7105_v61 = vld [vmem:[#allocation5 + $0x280] sm:$0xf]  ;;  %v6850_v4 = vor.u32 %v9995_v60, %v6849_v59  ;;  %2668 = vmatpush.bf16.msra.mxu3 %v7650_v62  ;;  %v10023_v59 = vld [vmem:[#allocation5 + $0x184] sm:$0xf]  ;;  %v634_v62 = vunpack.c.h.b16 %v219_v32 }
  0x62   :  { %v10059_v63 = vld [vmem:[#allocation5 + $0x29c] sm:$0xf0]  ;;  %v6979_v60 = vld [vmem:[#allocation5 + $0x1a0] sm:$0xf0] }
  0x63   :  { %v7361_v0 = vld [vmem:[#allocation5 + $0x480] sm:$0xf]  ;;  %v7106_v6 = vor.u32 %v10059_v63, %v7105_v61  ;;  %2630 = vmatpush.bf16.msra.mxu0 %v6850_v4  ;;  %v11264_v61 = vpack.c.b16 %v633_v42, %v633_v42  ;;  %v7235_v4 = vld [vmem:[#allocation5 + $0x3a0] sm:$0xf0] }
  0x64   :  { %v10123_v1 = vld [vmem:[#allocation5 + $0x49c] sm:$0xf0] }
  0x65   :  { %v7617_v2 = vld [vmem:[#allocation5 + $0x680] sm:$0xf]  ;;  %v7362_v7 = vor.u32 %v10123_v1, %v7361_v0  ;;  %2643 = vmatpush.bf16.msra.mxu1 %v7106_v6  ;;  %v11267_v0 = vpack.c.b16 %v636_v46, %v636_v46  ;;  %v7270_v1 = vor.u32 %v10095_v50, %v7267_v51  ;;  %v6982_v6 = vor.u32 %v10023_v59, %v6979_v60  ;;  %v7107_v59 = vld [vmem:[#allocation5 + $0x2a0] sm:$0xf0] }
  0x66   :  { %v10187_v3 = vld [vmem:[#allocation5 + $0x69c] sm:$0xf0] }
  0x67   :  { %v6817_v5 = vld [vmem:[#allocation5 + $0x40] sm:$0xf]  ;;  %v7618_v11 = vor.u32 %v10187_v3, %v7617_v2  ;;  %2656 = vmatpush.bf16.msra.mxu2 %v7362_v7  ;;  %v10087_v3 = vld [vmem:[#allocation5 + $0x384] sm:$0xf] }
  0x68   :  { %v9987_v8 = vld [vmem:[#allocation5 + $0x5c] sm:$0xf0] }
  0x69   :  { %v7073_v9 = vld [vmem:[#allocation5 + $0x240] sm:$0xf]  ;;  %v6818_v18 = vor.u32 %v9987_v8, %v6817_v5  ;;  %2669 = vmatpush.bf16.msra.mxu3 %v7618_v11  ;;  %v10015_v11 = vld [vmem:[#allocation5 + $0x144] sm:$0xf] }
  0x6a   :  { %v10051_v10 = vld [vmem:[#allocation5 + $0x25c] sm:$0xf0] }
  0x6b   :  { %v7329_v12 = vld [vmem:[#allocation5 + $0x440] sm:$0xf]  ;;  %v7074_v23 = vor.u32 %v10051_v10, %v7073_v9  ;;  %2631 = vmatpush.bf16.msra.mxu0 %v6818_v18 }
  0x6c   :  { %v10115_v13 = vld [vmem:[#allocation5 + $0x45c] sm:$0xf0] }
  0x6d   :  { %v7585_v14 = vld [vmem:[#allocation5 + $0x640] sm:$0xf]  ;;  %v7330_v24 = vor.u32 %v10115_v13, %v7329_v12  ;;  %2644 = vmatpush.bf16.msra.mxu1 %v7074_v23  ;;  %v6947_v12 = vld [vmem:[#allocation5 + $0x160] sm:$0xf0]  ;;  %v11271_v13 = vpack.c.b16 %v634_v62, %v634_v62 }
  0x6e   :  { %v10179_v15 = vld [vmem:[#allocation5 + $0x65c] sm:$0xf0] }
  0x6f   :  { %v6785_v16 = vld [vmem:[#allocation5] sm:$0xf]  ;;  %v7586_v29 = vor.u32 %v10179_v15, %v7585_v14  ;;  %2657 = vmatpush.bf16.msra.mxu2 %v7330_v24  ;;  %v7238_v14 = vor.u32 %v10087_v3, %v7235_v4  ;;  %v9983_v4 = vld [vmem:[#allocation5 + $0x44] sm:$0xf] }
  0x70   :  { %v9979_v17 = vld [vmem:[#allocation5 + $0x1c] sm:$0xf0] }
  0x71   :  { %v7041_v19 = vld [vmem:[#allocation5 + $0x200] sm:$0xf]  ;;  %v6786_v37 = vor.u32 %v9979_v17, %v6785_v16  ;;  %2670 = vmatpush.bf16.msra.mxu3 %v7586_v29  ;;  %v10079_v16 = vld [vmem:[#allocation5 + $0x344] sm:$0xf] }
  0x72   :  { %v10043_v20 = vld [vmem:[#allocation5 + $0x21c] sm:$0xf0]  ;;  %v7203_v17 = vld [vmem:[#allocation5 + $0x360] sm:$0xf0] }
  0x73   :  { %v7297_v21 = vld [vmem:[#allocation5 + $0x400] sm:$0xf]  ;;  %v7042_v43 = vor.u32 %v10043_v20, %v7041_v19  ;;  %2632 = vmatpush.bf16.msra.mxu0 %v6786_v37  ;;  %v6950_v19 = vor.u32 %v10015_v11, %v6947_v12  ;;  %v221_v11 = vld [vmem:[#allocation2 + $0x10] sm:$0xff] }
  0x74   :  { %v11255_v22 = vld [vmem:[#allocation5 + $0xc00] sm:$0x77] }
  0x75   :  { %v10107_v25 = vld [vmem:[#allocation5 + $0x41c] sm:$0xf0]  ;;  %v1809_v28 = vunpack.c.l.b16 %v11255_v22  ;;  %2645 = vmatpush.bf16.msra.mxu1 %v7042_v43  ;;  %v10063_v43 = vld [vmem:[#allocation5 + $0x2c4] sm:$0xf] }
  0x76   :  { %v7553_v26 = vld [vmem:[#allocation5 + $0x600] sm:$0xf]  ;;  %v7298_v44 = vor.u32 %v10107_v25, %v7297_v21  ;;  %2633 = vmatmul.bf16.vlgmr.msra.gmra.mxu0 %v11264_v61  ;;  %v10007_v25 = vld [vmem:[#allocation5 + $0x104] sm:$0xf] }
  0x77   :  { %v10171_v30 = vld [vmem:[#allocation5 + $0x61c] sm:$0xf0]  ;;  %v2201_v45 = vpack.c.b16 %v1809_v28, %v1809_v28  ;;  %v7206_v28 = vor.u32 %v10079_v16, %v7203_v17 }
  0x78   :  { %v8033_v31 = vld [vmem:[#allocation5 + $0x9c0] sm:$0xf]  ;;  %v7554_v47 = vor.u32 %v10171_v30, %v7553_v26  ;;  %2658 = vmatpush.bf16.msra.mxu2 %v7298_v44  ;;  %2646 = vmatmul.bf16.vlgmr.msra.gmra.mxu1 %v11271_v13  ;;  %v6915_v26 = vld [vmem:[#allocation5 + $0x120] sm:$0xf0] }
  0x79   :  { %v10291_v33 = vld [vmem:[#allocation5 + $0x9dc] sm:$0xf0]  ;;  %v2602_v63 = vand.u32 %v11260_v49, %v2201_v45  ;;  %v10071_v30 = vld [vmem:[#allocation5 + $0x304] sm:$0xf] }
  0x7a   :  { %v8289_v34 = vld [vmem:[#allocation5 + $0xbc0] sm:$0xf]  ;;  %v8034_v48 = vor.u32 %v10291_v33, %v8033_v31  ;;  %2671 = vmatpush.bf16.msra.mxu3 %v7554_v47  ;;  %v7171_v31 = vld [vmem:[#allocation5 + $0x320] sm:$0xf0]  ;;  %v6918_v33 = vor.u32 %v10007_v25, %v6915_v26  ;;  %v637_v25 = vunpack.c.l.b16 %v221_v11 }
  0x7b   :  { %v10355_v38 = vld [vmem:[#allocation5 + $0xbdc] sm:$0xf0]  ;;  %2659 = vmatmul.bf16.vlgmr.msra.gmra.mxu2 %v11262_v57  ;;  %v7174_v41 = vor.u32 %v10071_v30, %v7171_v31  ;;  %v7139_v44 = vld [vmem:[#allocation5 + $0x2e0] sm:$0xf0]  ;;  %v638_v30 = vunpack.c.h.b16 %v221_v11 }
  0x7c   :  { %v8290_v52 = vor.u32 %v10355_v38, %v8289_v34  ;;  %v8001_v54 = vld [vmem:[#allocation5 + $0x980] sm:$0xf]  ;;  %2677 = vmatpush.bf16.msrb.mxu0 %v8034_v48  ;;  %2710 = vmatpush.bf16.msrb.mxu2 %v2602_v63  ;;  %v9999_v38 = vld [vmem:[#allocation5 + $0xc4] sm:$0xf] }
  0x7d   :  { %v10283_v55 = vld [vmem:[#allocation5 + $0x99c] sm:$0xf0]  ;;  %2672 = vmatmul.bf16.vlgmr.msra.gmra.mxu3 %v11267_v0  ;;  %v6886_v46 = vor.u32 %v9999_v38, %v6883_v39  ;;  %v8291_v38 = vld [vmem:[#allocation5 + $0xbe0] sm:$0xf0] }
  0x7e   :  { %v8257_v56 = vld [vmem:[#allocation5 + $0xb80] sm:$0xf]  ;;  %v8002_v2 = vor.u32 %v10283_v55, %v8001_v54  ;;  %2690 = vmatpush.bf16.msrb.mxu1 %v8290_v52  ;;  %2716 = vmatpush.bf16.msrb.mxu3 %v7014_v53  ;;  %v9991_v52 = vld [vmem:[#allocation5 + $0x84] sm:$0xf]  ;;  %v11275_v54 = vpack.c.b16 %v639_v40, %v639_v40  ;;  %v7142_v55 = vor.u32 %v10063_v43, %v7139_v44 }
  0x7f   :  { %v10347_v58 = vld [vmem:[#allocation5 + $0xb9c] sm:$0xf0]  ;;  %v6851_v53 = vld [vmem:[#allocation5 + $0xa0] sm:$0xf0] }
  0x80   :  { %v8258_v5 = vor.u32 %v10347_v58, %v8257_v56  ;;  %v7969_v7 = vld [vmem:[#allocation5 + $0x940] sm:$0xf]  ;;  %2729 = vmatpush.bf16.msra.mxu2 %v7270_v1  ;;  %2678 = vmatpush.bf16.msrb.mxu0 %v8002_v2  ;;  %v10055_v58 = vld [vmem:[#allocation5 + $0x284] sm:$0xf]  ;;  %v6854_v62 = vor.u32 %v9991_v52, %v6851_v53 }
  0x81   :  { %v10275_v8 = vld [vmem:[#allocation5 + $0x95c] sm:$0xf0]  ;;  %v10151_v39 = vld [vmem:[#allocation5 + $0x584] sm:$0xf] }
  0x82   :  { %v8225_v9 = vld [vmem:[#allocation5 + $0xb40] sm:$0xf]  ;;  %v7970_v15 = vor.u32 %v10275_v8, %v7969_v7  ;;  %2691 = vmatpush.bf16.msrb.mxu1 %v8258_v5  ;;  %2717 = vmatpush.bf16.msrb.mxu3 %v6982_v6  ;;  %v6819_v5 = vld [vmem:[#allocation5 + $0x60] sm:$0xf0]  ;;  %v7110_v7 = vor.u32 %v10055_v58, %v7107_v59 }
  0x83   :  { %v10339_v10 = vld [vmem:[#allocation5 + $0xb5c] sm:$0xf0]  ;;  %v10047_v6 = vld [vmem:[#allocation5 + $0x244] sm:$0xf] }
  0x84   :  { %v8226_v18 = vor.u32 %v10339_v10, %v8225_v9  ;;  %v7937_v20 = vld [vmem:[#allocation5 + $0x900] sm:$0xf]  ;;  %2730 = vmatpush.bf16.msra.mxu2 %v7238_v14  ;;  %2679 = vmatpush.bf16.msrb.mxu0 %v7970_v15  ;;  %v7075_v9 = vld [vmem:[#allocation5 + $0x260] sm:$0xf0]  ;;  %v6822_v14 = vor.u32 %v9983_v4, %v6819_v5 }
  0x85   :  { %v10267_v21 = vld [vmem:[#allocation5 + $0x91c] sm:$0xf0]  ;;  %v7078_v26 = vor.u32 %v10047_v6, %v7075_v9  ;;  %v10215_v43 = vld [vmem:[#allocation5 + $0x784] sm:$0xf] }
  0x86   :  { %v8193_v23 = vld [vmem:[#allocation5 + $0xb00] sm:$0xf]  ;;  %v7938_v29 = vor.u32 %v10267_v21, %v7937_v20  ;;  %2692 = vmatpush.bf16.msrb.mxu1 %v8226_v18  ;;  %2718 = vmatpush.bf16.msrb.mxu3 %v6950_v19  ;;  %v9975_v18 = vld [vmem:[#allocation5 + $0x4] sm:$0xf] }
  0x87   :  { %v10331_v24 = vld [vmem:[#allocation5 + $0xb1c] sm:$0xf0]  ;;  %v6787_v19 = vld [vmem:[#allocation5 + $0x20] sm:$0xf0] }
  0x88   :  { %v8194_v32 = vor.u32 %v10331_v24, %v8193_v23  ;;  %v7905_v34 = vld [vmem:[#allocation5 + $0x8c0] sm:$0xf]  ;;  %2731 = vmatpush.bf16.msra.mxu2 %v7206_v28  ;;  %2680 = vmatpush.bf16.msrb.mxu0 %v7938_v29  ;;  %v10159_v20 = vld [vmem:[#allocation5 + $0x5c4] sm:$0xf] }
  0x89   :  { %v10259_v35 = vld [vmem:[#allocation5 + $0x8dc] sm:$0xf0]  ;;  %v7523_v21 = vld [vmem:[#allocation5 + $0x5e0] sm:$0xf0] }
  0x8a   :  { %v8161_v36 = vld [vmem:[#allocation5 + $0xac0] sm:$0xf]  ;;  %v7906_v42 = vor.u32 %v10259_v35, %v7905_v34  ;;  %2693 = vmatpush.bf16.msrb.mxu1 %v8194_v32  ;;  %2719 = vmatpush.bf16.msrb.mxu3 %v6918_v33  ;;  %v10223_v23 = vld [vmem:[#allocation5 + $0x7c4] sm:$0xf]  ;;  %v6790_v32 = vor.u32 %v9975_v18, %v6787_v19  ;;  %v7526_v35 = vor.u32 %v10159_v20, %v7523_v21 }
  0x8b   :  { %v10323_v37 = vld [vmem:[#allocation5 + $0xadc] sm:$0xf0]  ;;  %8319 = vmatmul.msk.bf16.vlgmr.msrb.gmra.mxu2 %vm2593_vm2, %v11275_v54  ;;  %v7779_v24 = vld [vmem:[#allocation5 + $0x7e0] sm:$0xf0] }
  0x8c   :  { %v8162_v45 = vor.u32 %v10323_v37, %v8161_v36  ;;  %v7873_v47 = vld [vmem:[#allocation5 + $0x880] sm:$0xf]  ;;  %2732 = vmatpush.bf16.msra.mxu2 %v7174_v41  ;;  %2681 = vmatpush.bf16.msrb.mxu0 %v7906_v42  ;;  %v10287_v28 = vld [vmem:[#allocation5 + $0x9c4] sm:$0xf]  ;;  %v7782_v36 = vor.u32 %v10223_v23, %v7779_v24  ;;  %v11279_v41 = vpack.c.b16 %v637_v25, %v637_v25 }
  0x8d   :  { %v10251_v48 = vld [vmem:[#allocation5 + $0x89c] sm:$0xf0]  ;;  %v8035_v29 = vld [vmem:[#allocation5 + $0x9e0] sm:$0xf0] }
  0x8e   :  { %v8129_v50 = vld [vmem:[#allocation5 + $0xa80] sm:$0xf]  ;;  %v7874_v56 = vor.u32 %v10251_v48, %v7873_v47  ;;  %2694 = vmatpush.bf16.msrb.mxu1 %v8162_v45  ;;  %2720 = vmatpush.bf16.msrb.mxu3 %v6886_v46  ;;  %v10039_v33 = vld [vmem:[#allocation5 + $0x204] sm:$0xf]  ;;  %v8038_v40 = vor.u32 %v10287_v28, %v8035_v29  ;;  %v11281_v46 = vpack.c.b16 %v638_v30, %v638_v30 }
  0x8f   :  { %v10315_v51 = vld [vmem:[#allocation5 + $0xa9c] sm:$0xf0]  ;;  %v7043_v34 = vld [vmem:[#allocation5 + $0x220] sm:$0xf0] }
  0x90   :  { %v8130_v60 = vor.u32 %v10315_v51, %v8129_v50  ;;  %v7841_v63 = vld [vmem:[#allocation5 + $0x840] sm:$0xf]  ;;  %2733 = vmatpush.bf16.msra.mxu2 %v7142_v55  ;;  %2682 = vmatpush.bf16.msrb.mxu0 %v7874_v56  ;;  %v10351_v37 = vld [vmem:[#allocation5 + $0xbc4] sm:$0xf]  ;;  %v7046_v45 = vor.u32 %v10039_v33, %v7043_v34 }
  0x91   :  { %v10243_v1 = vld [vmem:[#allocation5 + $0x85c] sm:$0xf0]  ;;  %v7491_v42 = vld [vmem:[#allocation5 + $0x5a0] sm:$0xf0]  ;;  %v8294_v50 = vor.u32 %v10351_v37, %v8291_v38 }
  0x92   :  { %v8097_v2 = vld [vmem:[#allocation5 + $0xa40] sm:$0xf]  ;;  %v7842_v8 = vor.u32 %v10243_v1, %v7841_v63  ;;  %2695 = vmatpush.bf16.msrb.mxu1 %v8130_v60  ;;  %2721 = vmatpush.bf16.msrb.mxu3 %v6854_v62  ;;  %v7747_v44 = vld [vmem:[#allocation5 + $0x7a0] sm:$0xf0]  ;;  %v7494_v51 = vor.u32 %v10151_v39, %v7491_v42 }
  0x93   :  { %v10307_v3 = vld [vmem:[#allocation5 + $0xa5c] sm:$0xf0]  ;;  %v10279_v47 = vld [vmem:[#allocation5 + $0x984] sm:$0xf]  ;;  %v7750_v52 = vor.u32 %v10215_v43, %v7747_v44 }
  0x94   :  { %v7809_v10 = vld [vmem:[#allocation5 + $0x800] sm:$0xf]  ;;  %v8098_v12 = vor.u32 %v10307_v3, %v8097_v2  ;;  %2734 = vmatpush.bf16.msra.mxu2 %v7110_v7  ;;  %2683 = vmatpush.bf16.msrb.mxu0 %v7842_v8  ;;  %v8003_v48 = vld [vmem:[#allocation5 + $0x9a0] sm:$0xf0] }
  0x95   :  { %v10235_v15 = vld [vmem:[#allocation5 + $0x81c] sm:$0xf0]  ;;  %v10343_v53 = vld [vmem:[#allocation5 + $0xb84] sm:$0xf]  ;;  %v8006_v58 = vor.u32 %v10279_v47, %v8003_v48 }
  0x96   :  { %v8065_v16 = vld [vmem:[#allocation5 + $0xa00] sm:$0xf]  ;;  %v7810_v27 = vor.u32 %v10235_v15, %v7809_v10  ;;  %2696 = vmatpush.bf16.msrb.mxu1 %v8098_v12  ;;  %2722 = vmatpush.bf16.msrb.mxu3 %v6822_v14  ;;  %v8259_v55 = vld [vmem:[#allocation5 + $0xba0] sm:$0xf0] }
  0x97   :  { %v10299_v17 = vld [vmem:[#allocation5 + $0xa1c] sm:$0xf0]  ;;  %v10143_v56 = vld [vmem:[#allocation5 + $0x544] sm:$0xf]  ;;  %v8262_v2 = vor.u32 %v10343_v53, %v8259_v55  ;;  %v1810_v53 = vunpack.c.h.b16 %v11255_v22  ;;  %v7017_v22 = vld [vmem:[#allocation5 + $0x1c8] sm:$0xf] }
  0x98   :  { %v8066_v31 = vor.u32 %v10299_v17, %v8065_v16  ;;  %2735 = vmatpush.bf16.msra.mxu2 %v7078_v26  ;;  %2684 = vmatpush.bf16.msrb.mxu0 %v7810_v27  ;;  %v7459_v59 = vld [vmem:[#allocation5 + $0x560] sm:$0xf0] }
  0x99   :  { %v10207_v60 = vld [vmem:[#allocation5 + $0x744] sm:$0xf]  ;;  %v7462_v3 = vor.u32 %v10143_v56, %v7459_v59 }
  0x9a   :  { %2697 = vmatpush.bf16.msrb.mxu1 %v8066_v31  ;;  %2723 = vmatpush.bf16.msrb.mxu3 %v6790_v32  ;;  %v7715_v62 = vld [vmem:[#allocation5 + $0x760] sm:$0xf0] }
  0x9b   :  { %2685 = vmatmul.bf16.vlgmr.msrb.gmra.mxu0 %v11279_v41  ;;  %v10271_v63 = vld [vmem:[#allocation5 + $0x944] sm:$0xf]  ;;  %v7718_v4 = vor.u32 %v10207_v60, %v7715_v62 }
  0x9c   :  { %2742 = vmatpush.bf16.msra.mxu0 %v7526_v35  ;;  %2736 = vmatpush.bf16.msra.mxu2 %v7046_v45  ;;  %v7971_v1 = vld [vmem:[#allocation5 + $0x960] sm:$0xf0] }
  0x9d   :  { %2698 = vmatmul.bf16.vlgmr.msrb.gmra.mxu1 %v11281_v46  ;;  %2724 = vmatmul.bf16.vlgmr.msrb.gmra.mxu3 %v11264_v61  ;;  %v10335_v5 = vld [vmem:[#allocation5 + $0xb44] sm:$0xf]  ;;  %v7974_v8 = vor.u32 %v10271_v63, %v7971_v1 }
  0x9e   :  { %2755 = vmatpush.bf16.msra.mxu1 %v7782_v36  ;;  %2768 = vmatpush.bf16.msra.mxu3 %v8038_v40  ;;  %v8227_v6 = vld [vmem:[#allocation5 + $0xb60] sm:$0xf0] }
  0x9f   :  { %v10135_v7 = vld [vmem:[#allocation5 + $0x504] sm:$0xf]  ;;  %2737 = vmatmul.bf16.vlgmr.msra.gmra.mxu2 %v11271_v13  ;;  %v8230_v15 = vor.u32 %v10335_v5, %v8227_v6 }
  0xa0   :  { %2781 = vmatpush.bf16.msrb.mxu2 %v8294_v50  ;;  %2743 = vmatpush.bf16.msra.mxu0 %v7494_v51  ;;  %v7427_v9 = vld [vmem:[#allocation5 + $0x520] sm:$0xf0] }
  0xa1   :  { %v10199_v10 = vld [vmem:[#allocation5 + $0x704] sm:$0xf]  ;;  %v7430_v16 = vor.u32 %v10135_v7, %v7427_v9  ;;  %v2202_v7 = vpack.c.b16 %v1810_v53, %v1810_v53  ;;  %v10036_v9 = vld [vmem:[#allocation5 + $0x1e4] sm:$0xf0] }
  0xa2   :  { %2756 = vmatpush.bf16.msra.mxu1 %v7750_v52  ;;  %2769 = vmatpush.bf16.msra.mxu3 %v8006_v58  ;;  %v7683_v11 = vld [vmem:[#allocation5 + $0x720] sm:$0xf0]  ;;  %v10212_v53 = vld [vmem:[#allocation5 + $0x764] sm:$0xf0] }
  0xa3   :  { %v10263_v12 = vld [vmem:[#allocation5 + $0x904] sm:$0xf]  ;;  %v7686_v17 = vor.u32 %v10199_v10, %v7683_v11  ;;  %v7273_v11 = vld [vmem:[#allocation5 + $0x3c8] sm:$0xf] }
  0xa4   :  { %v7939_v14 = vld [vmem:[#allocation5 + $0x920] sm:$0xf0]  ;;  %2782 = vmatpush.bf16.msrb.mxu2 %v8262_v2  ;;  %2744 = vmatpush.bf16.msra.mxu0 %v7462_v3 }
  0xa5   :  { %v10327_v18 = vld [vmem:[#allocation5 + $0xb04] sm:$0xf]  ;;  %v7942_v21 = vor.u32 %v10263_v12, %v7939_v14  ;;  %v10100_v12 = vld [vmem:[#allocation5 + $0x3e4] sm:$0xf0] }
  0xa6   :  { %2757 = vmatpush.bf16.msra.mxu1 %v7718_v4  ;;  %v8195_v19 = vld [vmem:[#allocation5 + $0xb20] sm:$0xf0]  ;;  %2770 = vmatpush.bf16.msra.mxu3 %v7974_v8 }
  0xa7   :  { %v10127_v20 = vld [vmem:[#allocation5 + $0x4c4] sm:$0xf]  ;;  %v8198_v28 = vor.u32 %v10327_v18, %v8195_v19  ;;  %v7529_v18 = vld [vmem:[#allocation5 + $0x5c8] sm:$0xf] }
  0xa8   :  { %v7395_v23 = vld [vmem:[#allocation5 + $0x4e0] sm:$0xf0]  ;;  %2783 = vmatpush.bf16.msrb.mxu2 %v8230_v15  ;;  %2745 = vmatpush.bf16.msra.mxu0 %v7430_v16 }
  0xa9   :  { %v10191_v24 = vld [vmem:[#allocation5 + $0x6c4] sm:$0xf]  ;;  %v7398_v29 = vor.u32 %v10127_v20, %v7395_v23  ;;  %v7018_v20 = vor.u32 %v10036_v9, %v7017_v22  ;;  %v7785_v23 = vld [vmem:[#allocation5 + $0x7c8] sm:$0xf] }
  0xaa   :  { %v7651_v25 = vld [vmem:[#allocation5 + $0x6e0] sm:$0xf0]  ;;  %2758 = vmatpush.bf16.msra.mxu1 %v7686_v17  ;;  %2771 = vmatpush.bf16.msra.mxu3 %v7942_v21  ;;  %v10164_v21 = vld [vmem:[#allocation5 + $0x5e4] sm:$0xf0] }
  0xab   :  { %v10255_v26 = vld [vmem:[#allocation5 + $0x8c4] sm:$0xf]  ;;  %v7654_v30 = vor.u32 %v10191_v24, %v7651_v25  ;;  %v10228_v24 = vld [vmem:[#allocation5 + $0x7e4] sm:$0xf0]  ;;  %v7274_v25 = vor.u32 %v10100_v12, %v7273_v11 }
  0xac   :  { %v7907_v27 = vld [vmem:[#allocation5 + $0x8e0] sm:$0xf0]  ;;  %2784 = vmatpush.bf16.msrb.mxu2 %v8198_v28  ;;  %2746 = vmatpush.bf16.msra.mxu0 %v7398_v29  ;;  %v10028_v28 = vld [vmem:[#allocation5 + $0x1a4] sm:$0xf0] }
  0xad   :  { %v10319_v31 = vld [vmem:[#allocation5 + $0xac4] sm:$0xf]  ;;  %v7910_v34 = vor.u32 %v10255_v26, %v7907_v27  ;;  %v2605_v26 = vand.u32 %v11260_v49, %v2202_v7  ;;  %v6985_v27 = vld [vmem:[#allocation5 + $0x188] sm:$0xf] }
  0xae   :  { %v8163_v32 = vld [vmem:[#allocation5 + $0xae0] sm:$0xf0]  ;;  %2759 = vmatpush.bf16.msra.mxu1 %v7654_v30  ;;  %v7241_v30 = vld [vmem:[#allocation5 + $0x388] sm:$0xf] }
  0xaf   :  { %v10119_v33 = vld [vmem:[#allocation5 + $0x484] sm:$0xf]  ;;  %v8166_v40 = vor.u32 %v10319_v31, %v8163_v32  ;;  %2772 = vmatpush.bf16.msra.mxu3 %v7910_v34  ;;  %v10092_v31 = vld [vmem:[#allocation5 + $0x3a4] sm:$0xf0]  ;;  %v7530_v32 = vor.u32 %v10164_v21, %v7529_v18 }
  0xb0   :  { %v7363_v35 = vld [vmem:[#allocation5 + $0x4a0] sm:$0xf0]  ;;  %v7497_v34 = vld [vmem:[#allocation5 + $0x588] sm:$0xf] }
  0xb1   :  { %v10183_v36 = vld [vmem:[#allocation5 + $0x684] sm:$0xf]  ;;  %v7366_v43 = vor.u32 %v10119_v33, %v7363_v35  ;;  %2785 = vmatpush.bf16.msrb.mxu2 %v8166_v40  ;;  %v7786_v33 = vor.u32 %v10228_v24, %v7785_v23  ;;  %v6986_v35 = vor.u32 %v10028_v28, %v6985_v27  ;;  %v6953_v40 = vld [vmem:[#allocation5 + $0x148] sm:$0xf] }
  0xb2   :  { %v7619_v37 = vld [vmem:[#allocation5 + $0x6a0] sm:$0xf0]  ;;  %v6889_v7 = vld [vmem:[#allocation5 + $0xc8] sm:$0xf] }
  0xb3   :  { %v10247_v38 = vld [vmem:[#allocation5 + $0x884] sm:$0xf]  ;;  %v7622_v44 = vor.u32 %v10183_v36, %v7619_v37  ;;  %2747 = vmatpush.bf16.msra.mxu0 %v7366_v43  ;;  %v10156_v36 = vld [vmem:[#allocation5 + $0x5a4] sm:$0xf0] }
  0xb4   :  { %v7875_v39 = vld [vmem:[#allocation5 + $0x8a0] sm:$0xf0]  ;;  %v7753_v37 = vld [vmem:[#allocation5 + $0x788] sm:$0xf] }
  0xb5   :  { %v10311_v42 = vld [vmem:[#allocation5 + $0xa84] sm:$0xf]  ;;  %v7878_v50 = vor.u32 %v10247_v38, %v7875_v39  ;;  %2760 = vmatpush.bf16.msra.mxu1 %v7622_v44  ;;  %v10220_v38 = vld [vmem:[#allocation5 + $0x7a4] sm:$0xf0]  ;;  %v7242_v39 = vor.u32 %v10092_v31, %v7241_v30 }
  0xb6   :  { %v8131_v45 = vld [vmem:[#allocation5 + $0xaa0] sm:$0xf0]  ;;  %v7209_v43 = vld [vmem:[#allocation5 + $0x348] sm:$0xf] }
  0xb7   :  { %v10111_v47 = vld [vmem:[#allocation5 + $0x444] sm:$0xf]  ;;  %v8134_v58 = vor.u32 %v10311_v42, %v8131_v45  ;;  %2773 = vmatpush.bf16.msra.mxu3 %v7878_v50  ;;  %v10020_v42 = vld [vmem:[#allocation5 + $0x164] sm:$0xf0]  ;;  %v7498_v45 = vor.u32 %v10156_v36, %v7497_v34 }
  0xb8   :  { %v7331_v48 = vld [vmem:[#allocation5 + $0x460] sm:$0xf0]  ;;  %v10084_v44 = vld [vmem:[#allocation5 + $0x364] sm:$0xf0]  ;;  %v6954_v50 = vor.u32 %v10020_v42, %v6953_v40 }
  0xb9   :  { %v10175_v51 = vld [vmem:[#allocation5 + $0x644] sm:$0xf]  ;;  %v7334_v62 = vor.u32 %v10111_v47, %v7331_v48  ;;  %2786 = vmatpush.bf16.msrb.mxu2 %v8134_v58  ;;  %v7754_v47 = vor.u32 %v10220_v38, %v7753_v37  ;;  %v7465_v48 = vld [vmem:[#allocation5 + $0x548] sm:$0xf] }
  0xba   :  { %v7587_v52 = vld [vmem:[#allocation5 + $0x660] sm:$0xf0]  ;;  %v10012_v58 = vld [vmem:[#allocation5 + $0x124] sm:$0xf0] }
  0xbb   :  { %v10239_v55 = vld [vmem:[#allocation5 + $0x844] sm:$0xf]  ;;  %v7590_v63 = vor.u32 %v10175_v51, %v7587_v52  ;;  %2748 = vmatpush.bf16.msra.mxu0 %v7334_v62  ;;  %v10148_v51 = vld [vmem:[#allocation5 + $0x564] sm:$0xf0] }
  0xbc   :  { %v7843_v56 = vld [vmem:[#allocation5 + $0x860] sm:$0xf0]  ;;  %v7721_v52 = vld [vmem:[#allocation5 + $0x748] sm:$0xf]  ;;  %v7466_v62 = vor.u32 %v10148_v51, %v7465_v48 }
  0xbd   :  { %v10303_v59 = vld [vmem:[#allocation5 + $0xa44] sm:$0xf]  ;;  %v7846_v3 = vor.u32 %v10239_v55, %v7843_v56  ;;  %2761 = vmatpush.bf16.msra.mxu1 %v7590_v63  ;;  %v7210_v55 = vor.u32 %v10084_v44, %v7209_v43  ;;  %v6921_v56 = vld [vmem:[#allocation5 + $0x108] sm:$0xf]  ;;  %v7722_v63 = vor.u32 %v10212_v53, %v7721_v52 }
  0xbe   :  { %v8099_v60 = vld [vmem:[#allocation5 + $0xa60] sm:$0xf0]  ;;  %v7145_v22 = vld [vmem:[#allocation5 + $0x2c8] sm:$0xf] }
  0xbf   :  { %v10103_v1 = vld [vmem:[#allocation5 + $0x404] sm:$0xf]  ;;  %v8102_v10 = vor.u32 %v10303_v59, %v8099_v60  ;;  %2774 = vmatpush.bf16.msra.mxu3 %v7846_v3  ;;  %v7177_v59 = vld [vmem:[#allocation5 + $0x308] sm:$0xf] }
  0xc0   :  { %v7299_v2 = vld [vmem:[#allocation5 + $0x420] sm:$0xf0]  ;;  %v10076_v60 = vld [vmem:[#allocation5 + $0x324] sm:$0xf0] }
  0xc1   :  { %v10167_v4 = vld [vmem:[#allocation5 + $0x604] sm:$0xf]  ;;  %v7302_v14 = vor.u32 %v10103_v1, %v7299_v2  ;;  %2787 = vmatpush.bf16.msrb.mxu2 %v8102_v10  ;;  %v7433_v1 = vld [vmem:[#allocation5 + $0x508] sm:$0xf]  ;;  %v6922_v2 = vor.u32 %v10012_v58, %v6921_v56 }
  0xc2   :  { %v7555_v5 = vld [vmem:[#allocation5 + $0x620] sm:$0xf0]  ;;  %v10140_v3 = vld [vmem:[#allocation5 + $0x524] sm:$0xf0] }
  0xc3   :  { %v10231_v6 = vld [vmem:[#allocation5 + $0x804] sm:$0xf]  ;;  %v7558_v15 = vor.u32 %v10167_v4, %v7555_v5  ;;  %2749 = vmatpush.bf16.msra.mxu0 %v7302_v14  ;;  %v7689_v4 = vld [vmem:[#allocation5 + $0x708] sm:$0xf]  ;;  %v7434_v10 = vor.u32 %v10140_v3, %v7433_v1 }
  0xc4   :  { %v7811_v8 = vld [vmem:[#allocation5 + $0x820] sm:$0xf0]  ;;  %v10204_v5 = vld [vmem:[#allocation5 + $0x724] sm:$0xf0] }
  0xc5   :  { %v10295_v16 = vld [vmem:[#allocation5 + $0xa04] sm:$0xf]  ;;  %v7814_v19 = vor.u32 %v10231_v6, %v7811_v8  ;;  %2762 = vmatpush.bf16.msra.mxu1 %v7558_v15  ;;  %v7178_v6 = vor.u32 %v10076_v60, %v7177_v59  ;;  %v10004_v8 = vld [vmem:[#allocation5 + $0xe4] sm:$0xf0]  ;;  %v7690_v11 = vor.u32 %v10204_v5, %v7689_v4 }
  0xc6   :  { %v8067_v17 = vld [vmem:[#allocation5 + $0xa20] sm:$0xf0]  ;;  %2750 = vmatmul.bf16.vlgmr.msra.gmra.mxu0 %v11262_v57  ;;  %v10068_v9 = vld [vmem:[#allocation5 + $0x2e4] sm:$0xf0]  ;;  %v6890_v14 = vor.u32 %v10004_v8, %v6889_v7  ;;  %v10032_v7 = vld [vmem:[#allocation5 + $0x1cc] sm:$0xf] }
  0xc7   :  { %v8070_v29 = vor.u32 %v10295_v16, %v8067_v17  ;;  %2775 = vmatpush.bf16.msra.mxu3 %v7814_v19  ;;  %2801 = vmatpush.bf16.msrb.mxu0 %v2605_v26  ;;  %v7401_v12 = vld [vmem:[#allocation5 + $0x4c8] sm:$0xf]  ;;  %v7146_v18 = vor.u32 %v10068_v9, %v7145_v22  ;;  %v7019_v8 = vld [vmem:[#allocation5 + $0x1e8] sm:$0xf0] }
  0xc8   :  { %2763 = vmatmul.bf16.vlgmr.msra.gmra.mxu1 %v11267_v0  ;;  %v10132_v15 = vld [vmem:[#allocation5 + $0x4e4] sm:$0xf0] }
  0xc9   :  { %2807 = vmatpush.bf16.msrb.mxu1 %v7018_v20  ;;  %2788 = vmatpush.bf16.msrb.mxu2 %v8070_v29  ;;  %v7657_v16 = vld [vmem:[#allocation5 + $0x6c8] sm:$0xf]  ;;  %v7402_v24 = vor.u32 %v10132_v15, %v7401_v12 }
  0xca   :  { %2776 = vmatmul.bf16.vlgmr.msra.gmra.mxu3 %v11279_v41  ;;  %v10196_v17 = vld [vmem:[#allocation5 + $0x6e4] sm:$0xf0] }
  0xcb   :  { %2820 = vmatpush.bf16.msrb.mxu3 %v7274_v25  ;;  %2833 = vmatpush.bf16.msra.mxu0 %v7530_v32  ;;  %v6857_v19 = vld [vmem:[#allocation5 + $0x88] sm:$0xf]  ;;  %v7658_v25 = vor.u32 %v10196_v17, %v7657_v16  ;;  %v7022_v16 = vor.u32 %v10032_v7, %v7019_v8 }
  0xcc   :  { %2789 = vmatmul.bf16.vlgmr.msrb.gmra.mxu2 %v11281_v46  ;;  %v9996_v20 = vld [vmem:[#allocation5 + $0xa4] sm:$0xf0] }
  0xcd   :  { %2846 = vmatpush.bf16.msra.mxu2 %v7786_v33  ;;  %2808 = vmatpush.bf16.msrb.mxu1 %v6986_v35  ;;  %v7113_v21 = vld [vmem:[#allocation5 + $0x288] sm:$0xf]  ;;  %v6858_v27 = vor.u32 %v9996_v20, %v6857_v19  ;;  %v7275_v19 = vld [vmem:[#allocation5 + $0x3e8] sm:$0xf0] }
  0xce   :  { %v10060_v23 = vld [vmem:[#allocation5 + $0x2a4] sm:$0xf0] }
  0xcf   :  { %2821 = vmatpush.bf16.msrb.mxu3 %v7242_v39  ;;  %2834 = vmatpush.bf16.msra.mxu0 %v7498_v45  ;;  %v7369_v26 = vld [vmem:[#allocation5 + $0x488] sm:$0xf]  ;;  %v7114_v31 = vor.u32 %v10060_v23, %v7113_v21  ;;  %v10024_v21 = vld [vmem:[#allocation5 + $0x18c] sm:$0xf] }
  0xd0   :  { %v10124_v28 = vld [vmem:[#allocation5 + $0x4a4] sm:$0xf0]  ;;  %v6987_v23 = vld [vmem:[#allocation5 + $0x1a8] sm:$0xf0] }
  0xd1   :  { %2847 = vmatpush.bf16.msra.mxu2 %v7754_v47  ;;  %2809 = vmatpush.bf16.msrb.mxu1 %v6954_v50  ;;  %v7625_v29 = vld [vmem:[#allocation5 + $0x688] sm:$0xf]  ;;  %v7370_v37 = vor.u32 %v10124_v28, %v7369_v26 }
  0xd2   :  { %v10188_v30 = vld [vmem:[#allocation5 + $0x6a4] sm:$0xf0] }
  0xd3   :  { %2822 = vmatpush.bf16.msrb.mxu3 %v7210_v55  ;;  %2835 = vmatpush.bf16.msra.mxu0 %v7466_v62  ;;  %v6825_v32 = vld [vmem:[#allocation5 + $0x48] sm:$0xf]  ;;  %v7626_v38 = vor.u32 %v10188_v30, %v7625_v29  ;;  %v6990_v30 = vor.u32 %v10024_v21, %v6987_v23 }
  0xd4   :  { %v9988_v33 = vld [vmem:[#allocation5 + $0x64] sm:$0xf0] }
  0xd5   :  { %2848 = vmatpush.bf16.msra.mxu2 %v7722_v63  ;;  %2810 = vmatpush.bf16.msrb.mxu1 %v6922_v2  ;;  %v11293_v34 = vld [vmem:[#allocation5 + $0xc08] sm:$0x77]  ;;  %v6826_v40 = vor.u32 %v9988_v33, %v6825_v32 }
  0xd6   :  { %8320 = vmatmul.msk.bf16.vlgmr.msrb.gmra.mxu0 %vm2593_vm2, %v11275_v54  ;;  %v7081_v35 = vld [vmem:[#allocation5 + $0x248] sm:$0xf]  ;;  %v1811_v45 = vunpack.c.l.b16 %v11293_v34  ;;  %v7243_v32 = vld [vmem:[#allocation5 + $0x3a8] sm:$0xf0] }
  0xd7   :  { %2823 = vmatpush.bf16.msrb.mxu3 %v7178_v6  ;;  %2836 = vmatpush.bf16.msra.mxu0 %v7434_v10  ;;  %v10052_v36 = vld [vmem:[#allocation5 + $0x264] sm:$0xf0] }
  0xd8   :  { %v7337_v39 = vld [vmem:[#allocation5 + $0x448] sm:$0xf]  ;;  %v7082_v47 = vor.u32 %v10052_v36, %v7081_v35  ;;  %v2203_v4 = vpack.c.b16 %v1811_v45, %v1811_v45  ;;  %v10016_v35 = vld [vmem:[#allocation5 + $0x14c] sm:$0xf] }
  0xd9   :  { %2849 = vmatpush.bf16.msra.mxu2 %v7690_v11  ;;  %2811 = vmatpush.bf16.msrb.mxu1 %v6890_v14  ;;  %v10116_v42 = vld [vmem:[#allocation5 + $0x464] sm:$0xf0]  ;;  %v6955_v36 = vld [vmem:[#allocation5 + $0x168] sm:$0xf0] }
  0xda   :  { %v7593_v43 = vld [vmem:[#allocation5 + $0x648] sm:$0xf]  ;;  %v7338_v56 = vor.u32 %v10116_v42, %v7337_v39  ;;  %v2608_v17 = vand.u32 %v11260_v49, %v2203_v4  ;;  %v10080_v45 = vld [vmem:[#allocation5 + $0x34c] sm:$0xf] }
  0xdb   :  { %2824 = vmatpush.bf16.msrb.mxu3 %v7146_v18  ;;  %2837 = vmatpush.bf16.msra.mxu0 %v7402_v24  ;;  %v10180_v44 = vld [vmem:[#allocation5 + $0x664] sm:$0xf0]  ;;  %v10096_v18 = vld [vmem:[#allocation5 + $0x3cc] sm:$0xf] }
  0xdc   :  { %v6793_v48 = vld [vmem:[#allocation5 + $0x8] sm:$0xf]  ;;  %v7594_v58 = vor.u32 %v10180_v44, %v7593_v43  ;;  %v6958_v44 = vor.u32 %v10016_v35, %v6955_v36  ;;  %v10160_v36 = vld [vmem:[#allocation5 + $0x5cc] sm:$0xf] }
  0xdd   :  { %2850 = vmatpush.bf16.msra.mxu2 %v7658_v25  ;;  %2812 = vmatpush.bf16.msrb.mxu1 %v6858_v27  ;;  %v9980_v50 = vld [vmem:[#allocation5 + $0x24] sm:$0xf0]  ;;  %v7278_v27 = vor.u32 %v10096_v18, %v7275_v19 }
  0xde   :  { %v7049_v51 = vld [vmem:[#allocation5 + $0x208] sm:$0xf]  ;;  %v6794_v63 = vor.u32 %v9980_v50, %v6793_v48  ;;  %v10008_v50 = vld [vmem:[#allocation5 + $0x10c] sm:$0xf] }
  0xdf   :  { %2825 = vmatpush.bf16.msrb.mxu3 %v7114_v31  ;;  %v10044_v52 = vld [vmem:[#allocation5 + $0x224] sm:$0xf0]  ;;  %2838 = vmatpush.bf16.msra.mxu0 %v7370_v37  ;;  %v10088_v31 = vld [vmem:[#allocation5 + $0x38c] sm:$0xf] }
  0xe0   :  { %v8041_v53 = vld [vmem:[#allocation5 + $0x9c8] sm:$0xf]  ;;  %v7050_v5 = vor.u32 %v10044_v52, %v7049_v51  ;;  %v6923_v51 = vld [vmem:[#allocation5 + $0x128] sm:$0xf0] }
  0xe1   :  { %v10292_v55 = vld [vmem:[#allocation5 + $0x9e4] sm:$0xf0]  ;;  %2851 = vmatpush.bf16.msra.mxu2 %v7626_v38  ;;  %2813 = vmatpush.bf16.msrb.mxu1 %v6826_v40  ;;  %v7246_v40 = vor.u32 %v10088_v31, %v7243_v32 }
  0xe2   :  { %v8297_v59 = vld [vmem:[#allocation5 + $0xbc8] sm:$0xf]  ;;  %v8042_v6 = vor.u32 %v10292_v55, %v8041_v53 }
  0xe3   :  { %v10356_v60 = vld [vmem:[#allocation5 + $0xbe4] sm:$0xf0]  ;;  %2826 = vmatpush.bf16.msrb.mxu3 %v7082_v47  ;;  %2839 = vmatpush.bf16.msra.mxu0 %v7338_v56  ;;  %v7211_v47 = vld [vmem:[#allocation5 + $0x368] sm:$0xf0] }
  0xe4   :  { %v7305_v62 = vld [vmem:[#allocation5 + $0x408] sm:$0xf]  ;;  %v8298_v22 = vor.u32 %v10356_v60, %v8297_v59  ;;  %v7214_v56 = vor.u32 %v10080_v45, %v7211_v47  ;;  %v6926_v60 = vor.u32 %v10008_v50, %v6923_v51  ;;  %v9976_v45 = vld [vmem:[#allocation5 + $0xc] sm:$0xf] }
  0xe5   :  { %v10108_v1 = vld [vmem:[#allocation5 + $0x424] sm:$0xf0]  ;;  %2852 = vmatpush.bf16.msra.mxu2 %v7594_v58  ;;  %2814 = vmatpush.bf16.msrb.mxu1 %v6794_v63  ;;  %v7179_v63 = vld [vmem:[#allocation5 + $0x328] sm:$0xf0] }
  0xe6   :  { %v7561_v2 = vld [vmem:[#allocation5 + $0x608] sm:$0xf]  ;;  %v7306_v11 = vor.u32 %v10108_v1, %v7305_v62  ;;  %v10072_v62 = vld [vmem:[#allocation5 + $0x30c] sm:$0xf] }
  0xe7   :  { %v10172_v3 = vld [vmem:[#allocation5 + $0x624] sm:$0xf0]  ;;  %2827 = vmatpush.bf16.msrb.mxu3 %v7050_v5  ;;  %v7182_v7 = vor.u32 %v10072_v62, %v7179_v63  ;;  %v6795_v47 = vld [vmem:[#allocation5 + $0x28] sm:$0xf0] }
  0xe8   :  { %v8009_v9 = vld [vmem:[#allocation5 + $0x988] sm:$0xf]  ;;  %v7562_v12 = vor.u32 %v10172_v3, %v7561_v2  ;;  %2840 = vmatpush.bf16.msra.mxu0 %v7306_v11  ;;  %2815 = vmatmul.bf16.vlgmr.msrb.gmra.mxu1 %v11264_v61  ;;  %v10000_v2 = vld [vmem:[#allocation5 + $0xcc] sm:$0xf] }
  0xe9   :  { %v10284_v10 = vld [vmem:[#allocation5 + $0x9a4] sm:$0xf0]  ;;  %2859 = vmatpush.bf16.msra.mxu1 %v8042_v6  ;;  %v6891_v3 = vld [vmem:[#allocation5 + $0xe8] sm:$0xf0] }
  0xea   :  { %v8265_v14 = vld [vmem:[#allocation5 + $0xb88] sm:$0xf]  ;;  %v8010_v20 = vor.u32 %v10284_v10, %v8009_v9  ;;  %2853 = vmatpush.bf16.msra.mxu2 %v7562_v12  ;;  %2828 = vmatmul.bf16.vlgmr.msrb.gmra.mxu3 %v11271_v13  ;;  %v6894_v9 = vor.u32 %v10000_v2, %v6891_v3  ;;  %v10064_v10 = vld [vmem:[#allocation5 + $0x2cc] sm:$0xf] }
  0xeb   :  { %v10348_v15 = vld [vmem:[#allocation5 + $0xba4] sm:$0xf0]  ;;  %2872 = vmatpush.bf16.msra.mxu3 %v8298_v22  ;;  %2841 = vmatmul.bf16.vlgmr.msra.gmra.mxu0 %v11262_v57  ;;  %v7147_v11 = vld [vmem:[#allocation5 + $0x2e8] sm:$0xf0] }
  0xec   :  { %v8266_v24 = vor.u32 %v10348_v15, %v8265_v14  ;;  %v7977_v25 = vld [vmem:[#allocation5 + $0x948] sm:$0xf]  ;;  %2892 = vmatpush.bf16.msrb.mxu0 %v2608_v17  ;;  %v9992_v14 = vld [vmem:[#allocation5 + $0x8c] sm:$0xf]  ;;  %v7150_v19 = vor.u32 %v10064_v10, %v7147_v11 }
  0xed   :  { %v10276_v26 = vld [vmem:[#allocation5 + $0x964] sm:$0xf0]  ;;  %2860 = vmatpush.bf16.msra.mxu1 %v8010_v20  ;;  %2854 = vmatmul.bf16.vlgmr.msra.gmra.mxu2 %v11267_v0  ;;  %v6859_v15 = vld [vmem:[#allocation5 + $0xa8] sm:$0xf0] }
  0xee   :  { %v8233_v28 = vld [vmem:[#allocation5 + $0xb48] sm:$0xf]  ;;  %2898 = vmatpush.bf16.msrb.mxu2 %v7022_v16  ;;  %v7978_v33 = vor.u32 %v10276_v26, %v7977_v25  ;;  %v6862_v23 = vor.u32 %v9992_v14, %v6859_v15  ;;  %v7115_v25 = vld [vmem:[#allocation5 + $0x2a8] sm:$0xf0] }
  0xef   :  { %v10340_v29 = vld [vmem:[#allocation5 + $0xb64] sm:$0xf0]  ;;  %2873 = vmatpush.bf16.msra.mxu3 %v8266_v24  ;;  %v10056_v24 = vld [vmem:[#allocation5 + $0x28c] sm:$0xf] }
  0xf0   :  { %v8234_v37 = vor.u32 %v10340_v29, %v8233_v28  ;;  %v7945_v38 = vld [vmem:[#allocation5 + $0x908] sm:$0xf]  ;;  %2911 = vmatpush.bf16.msra.mxu0 %v7278_v27  ;;  %v9984_v27 = vld [vmem:[#allocation5 + $0x4c] sm:$0xf]  ;;  %v7118_v35 = vor.u32 %v10056_v24, %v7115_v25 }
  0xf1   :  { %v10268_v39 = vld [vmem:[#allocation5 + $0x924] sm:$0xf0]  ;;  %2861 = vmatpush.bf16.msra.mxu1 %v7978_v33  ;;  %v6827_v28 = vld [vmem:[#allocation5 + $0x68] sm:$0xf0] }
  0xf2   :  { %v8201_v42 = vld [vmem:[#allocation5 + $0xb08] sm:$0xf]  ;;  %2899 = vmatpush.bf16.msrb.mxu2 %v6990_v30  ;;  %v7946_v48 = vor.u32 %v10268_v39, %v7945_v38  ;;  %v10224_v38 = vld [vmem:[#allocation5 + $0x7cc] sm:$0xf]  ;;  %v6830_v39 = vor.u32 %v9984_v27, %v6827_v28 }
  0xf3   :  { %v10332_v43 = vld [vmem:[#allocation5 + $0xb24] sm:$0xf0]  ;;  %2874 = vmatpush.bf16.msra.mxu3 %v8234_v37  ;;  %v7531_v37 = vld [vmem:[#allocation5 + $0x5e8] sm:$0xf0] }
  0xf4   :  { %v8202_v52 = vor.u32 %v10332_v43, %v8201_v42  ;;  %v7913_v53 = vld [vmem:[#allocation5 + $0x8c8] sm:$0xf]  ;;  %2912 = vmatpush.bf16.msra.mxu0 %v7246_v40  ;;  %v7787_v40 = vld [vmem:[#allocation5 + $0x7e8] sm:$0xf0]  ;;  %v7534_v50 = vor.u32 %v10160_v36, %v7531_v37 }
  0xf5   :  { %v10260_v55 = vld [vmem:[#allocation5 + $0x8e4] sm:$0xf0]  ;;  %2862 = vmatpush.bf16.msra.mxu1 %v7946_v48  ;;  %v10048_v42 = vld [vmem:[#allocation5 + $0x24c] sm:$0xf] }
  0xf6   :  { %v8169_v58 = vld [vmem:[#allocation5 + $0xac8] sm:$0xf]  ;;  %2900 = vmatpush.bf16.msrb.mxu2 %v6958_v44  ;;  %v7914_v1 = vor.u32 %v10260_v55, %v7913_v53  ;;  %v7083_v43 = vld [vmem:[#allocation5 + $0x268] sm:$0xf0]  ;;  %v7790_v53 = vor.u32 %v10224_v38, %v7787_v40 }
  0xf7   :  { %v10324_v59 = vld [vmem:[#allocation5 + $0xae4] sm:$0xf0]  ;;  %2875 = vmatpush.bf16.msra.mxu3 %v8202_v52  ;;  %v10288_v51 = vld [vmem:[#allocation5 + $0x9cc] sm:$0xf]  ;;  %v7086_v55 = vor.u32 %v10048_v42, %v7083_v43 }
  0xf8   :  { %v8170_v4 = vor.u32 %v10324_v59, %v8169_v58  ;;  %v7881_v5 = vld [vmem:[#allocation5 + $0x888] sm:$0xf]  ;;  %2913 = vmatpush.bf16.msra.mxu0 %v7214_v56  ;;  %v8043_v52 = vld [vmem:[#allocation5 + $0x9e8] sm:$0xf0] }
  0xf9   :  { %v10252_v6 = vld [vmem:[#allocation5 + $0x8a4] sm:$0xf0]  ;;  %2863 = vmatpush.bf16.msra.mxu1 %v7914_v1  ;;  %v10152_v56 = vld [vmem:[#allocation5 + $0x58c] sm:$0xf]  ;;  %v8046_v2 = vor.u32 %v10288_v51, %v8043_v52 }
  0xfa   :  { %v8137_v8 = vld [vmem:[#allocation5 + $0xa88] sm:$0xf]  ;;  %2901 = vmatpush.bf16.msrb.mxu2 %v6926_v60  ;;  %v7882_v12 = vor.u32 %v10252_v6, %v7881_v5  ;;  %v7499_v58 = vld [vmem:[#allocation5 + $0x5a8] sm:$0xf0]  ;;  %v6798_v60 = vor.u32 %v9976_v45, %v6795_v47 }
  0xfb   :  { %v10316_v22 = vld [vmem:[#allocation5 + $0xaa4] sm:$0xf0]  ;;  %2876 = vmatpush.bf16.msra.mxu3 %v8170_v4  ;;  %8321 = vmatmul.msk.bf16.vlgmr.msrb.gmra.mxu0 %vm2593_vm2, %v11275_v54  ;;  %v10216_v59 = vld [vmem:[#allocation5 + $0x78c] sm:$0xf]  ;;  %v7502_v5 = vor.u32 %v10152_v56, %v7499_v58 }
  0xfc   :  { %v8138_v16 = vor.u32 %v10316_v22, %v8137_v8  ;;  %v7849_v17 = vld [vmem:[#allocation5 + $0x848] sm:$0xf]  ;;  %2914 = vmatpush.bf16.msra.mxu0 %v7182_v7  ;;  %v7755_v62 = vld [vmem:[#allocation5 + $0x7a8] sm:$0xf0] }
  0xfd   :  { %v10244_v18 = vld [vmem:[#allocation5 + $0x864] sm:$0xf0]  ;;  %2864 = vmatpush.bf16.msra.mxu1 %v7882_v12  ;;  %v10040_v63 = vld [vmem:[#allocation5 + $0x20c] sm:$0xf]  ;;  %v7758_v8 = vor.u32 %v10216_v59, %v7755_v62 }
  0xfe   :  { %v8105_v20 = vld [vmem:[#allocation5 + $0xa48] sm:$0xf]  ;;  %2902 = vmatpush.bf16.msrb.mxu2 %v6894_v9  ;;  %v7850_v26 = vor.u32 %v10244_v18, %v7849_v17  ;;  %v7051_v1 = vld [vmem:[#allocation5 + $0x228] sm:$0xf0] }
  0xff   :  { %v10308_v21 = vld [vmem:[#allocation5 + $0xa64] sm:$0xf0]  ;;  %2877 = vmatpush.bf16.msra.mxu3 %v8138_v16  ;;  %v10352_v3 = vld [vmem:[#allocation5 + $0xbcc] sm:$0xf]  ;;  %v7054_v22 = vor.u32 %v10040_v63, %v7051_v1 }
 0x100   :  { %v7817_v29 = vld [vmem:[#allocation5 + $0x808] sm:$0xf]  ;;  %v8106_v30 = vor.u32 %v10308_v21, %v8105_v20  ;;  %2915 = vmatpush.bf16.msra.mxu0 %v7150_v19  ;;  %v8299_v4 = vld [vmem:[#allocation5 + $0xbe8] sm:$0xf0]  ;;  %v11307_v21 = vld [vmem:[#allocation7] sm:$0xff] }
 0x101   :  { %v10236_v31 = vld [vmem:[#allocation5 + $0x824] sm:$0xf0]  ;;  %2865 = vmatpush.bf16.msra.mxu1 %v7850_v26  ;;  %v10280_v6 = vld [vmem:[#allocation5 + $0x98c] sm:$0xf]  ;;  %v8302_v11 = vor.u32 %v10352_v3, %v8299_v4 }
 0x102   :  { %v8073_v32 = vld [vmem:[#allocation5 + $0xa08] sm:$0xf]  ;;  %2903 = vmatpush.bf16.msrb.mxu2 %v6862_v23  ;;  %v7818_v44 = vor.u32 %v10236_v31, %v7817_v29  ;;  %v8011_v7 = vld [vmem:[#allocation5 + $0x9a8] sm:$0xf0] }
 0x103   :  { %v10300_v33 = vld [vmem:[#allocation5 + $0xa24] sm:$0xf0]  ;;  %2878 = vmatpush.bf16.msra.mxu3 %v8106_v30  ;;  %v10144_v9 = vld [vmem:[#allocation5 + $0x54c] sm:$0xf]  ;;  %v8014_v15 = vor.u32 %v10280_v6, %v8011_v7 }
 0x104   :  { %v8074_v48 = vor.u32 %v10300_v33, %v8073_v32  ;;  %2916 = vmatpush.bf16.msra.mxu0 %v7118_v35  ;;  %v7467_v10 = vld [vmem:[#allocation5 + $0x568] sm:$0xf0]  ;;  %v613_v32 = vperm.slane %v11307_v21, 0 }
 0x105   :  { %2866 = vmatpush.bf16.msra.mxu1 %v7818_v44  ;;  %v10208_v12 = vld [vmem:[#allocation5 + $0x74c] sm:$0xf]  ;;  %v7470_v18 = vor.u32 %v10144_v9, %v7467_v10  ;;  %v2634_v44 = vpop.f32.mrf.mxu0  ;;  %v2673_v10 = vpop.f32.mrf.mxu3 }
 0x106   :  { %2904 = vmatpush.bf16.msrb.mxu2 %v6830_v39  ;;  %v7723_v14 = vld [vmem:[#allocation5 + $0x768] sm:$0xf0]  ;;  %v2635_v47 = vadd.f32 %v2634_v44, %v613_v32 }
 0x107   :  { %2879 = vmatpush.bf16.msra.mxu3 %v8074_v48  ;;  %v10344_v16 = vld [vmem:[#allocation5 + $0xb8c] sm:$0xf]  ;;  %v7726_v23 = vor.u32 %v10208_v12, %v7723_v14  ;;  %v1812_v14 = vunpack.c.h.b16 %v11293_v34 }
 0x108   :  { %2917 = vmatpush.bf16.msra.mxu0 %v7086_v55  ;;  %2867 = vmatmul.bf16.vlgmr.msra.gmra.mxu1 %v11279_v41  ;;  %v8267_v17 = vld [vmem:[#allocation5 + $0xba8] sm:$0xf0] }
 0x109   :  { %2924 = vmatpush.bf16.msrb.mxu1 %v7534_v50  ;;  %v10272_v19 = vld [vmem:[#allocation5 + $0x94c] sm:$0xf]  ;;  %v8270_v26 = vor.u32 %v10344_v16, %v8267_v17  ;;  %v2204_v34 = vpack.c.b16 %v1812_v14, %v1812_v14 }
 0x10a   :  { %2905 = vmatpush.bf16.msrb.mxu2 %v6798_v60  ;;  %2880 = vmatmul.bf16.vlgmr.msra.gmra.mxu3 %v11281_v46  ;;  %v7979_v20 = vld [vmem:[#allocation5 + $0x968] sm:$0xf0]  ;;  %v2647_v60 = vpop.f32.mrf.mxu1 }
 0x10b   :  { %2937 = vmatpush.bf16.msrb.mxu3 %v7790_v53  ;;  %v10136_v24 = vld [vmem:[#allocation5 + $0x50c] sm:$0xf]  ;;  %v7982_v29 = vor.u32 %v10272_v19, %v7979_v20  ;;  %v2648_v1 = vadd.f32 %v2647_v60, %v2635_v47  ;;  %v6993_v60 = vld [vmem:[#allocation5 + $0x190] sm:$0xf] }
 0x10c   :  { %2918 = vmatpush.bf16.msra.mxu0 %v7054_v22  ;;  %v7435_v25 = vld [vmem:[#allocation5 + $0x528] sm:$0xf0] }
 0x10d   :  { %2925 = vmatpush.bf16.msrb.mxu1 %v7502_v5  ;;  %v10200_v27 = vld [vmem:[#allocation5 + $0x70c] sm:$0xf]  ;;  %2906 = vmatmul.bf16.vlgmr.msrb.gmra.mxu2 %v11264_v61  ;;  %v7438_v33 = vor.u32 %v10136_v24, %v7435_v25  ;;  %v2660_v5 = vpop.f32.mrf.mxu2 }
 0x10e   :  { %2950 = vmatpush.bf16.msra.mxu2 %v8046_v2  ;;  %v7691_v28 = vld [vmem:[#allocation5 + $0x728] sm:$0xf0]  ;;  %v2661_v9 = vadd.f32 %v2660_v5, %v2648_v1  ;;  %v10229_v5 = vld [vmem:[#allocation5 + $0x7ec] sm:$0xf0] }
 0x10f   :  { %2938 = vmatpush.bf16.msrb.mxu3 %v7758_v8  ;;  %v10336_v30 = vld [vmem:[#allocation5 + $0xb4c] sm:$0xf]  ;;  %2919 = vmatmul.bf16.vlgmr.msra.gmra.mxu0 %v11271_v13  ;;  %v7694_v37 = vor.u32 %v10200_v27, %v7691_v28 }
 0x110   :  { %2963 = vmatpush.bf16.msrb.mxu0 %v8302_v11  ;;  %v8235_v31 = vld [vmem:[#allocation5 + $0xb68] sm:$0xf0]  ;;  %v11313_v19 = vadd.f32 %v2673_v10, %v2661_v9  ;;  %v10157_v9 = vld [vmem:[#allocation5 + $0x5ac] sm:$0xf0] }
 0x111   :  { %2926 = vmatpush.bf16.msrb.mxu1 %v7470_v18  ;;  %v10264_v35 = vld [vmem:[#allocation5 + $0x90c] sm:$0xf]  ;;  %v8238_v40 = vor.u32 %v10336_v30, %v8235_v31  ;;  %v2636_v18 = vpop.f32.mrf.mxu0 }
 0x112   :  { %2951 = vmatpush.bf16.msra.mxu2 %v8014_v15  ;;  %v7947_v36 = vld [vmem:[#allocation5 + $0x928] sm:$0xf0] }
 0x113   :  { %2939 = vmatpush.bf16.msrb.mxu3 %v7726_v23  ;;  %v10128_v38 = vld [vmem:[#allocation5 + $0x4cc] sm:$0xf]  ;;  %v7950_v45 = vor.u32 %v10264_v35, %v7947_v36  ;;  %v7025_v35 = vld [vmem:[#allocation5 + $0x1d0] sm:$0xf]  ;;  %v2649_v36 = vpop.f32.mrf.mxu1 }
 0x114   :  { %v7403_v39 = vld [vmem:[#allocation5 + $0x4e8] sm:$0xf0]  ;;  %2964 = vmatpush.bf16.msrb.mxu0 %v8270_v26  ;;  %v10077_v36 = vld [vmem:[#allocation5 + $0x32c] sm:$0xf0] }
 0x115   :  { %v10192_v42 = vld [vmem:[#allocation5 + $0x6cc] sm:$0xf]  ;;  %2927 = vmatpush.bf16.msrb.mxu1 %v7438_v33  ;;  %v7406_v51 = vor.u32 %v10128_v38, %v7403_v39  ;;  %v10037_v38 = vld [vmem:[#allocation5 + $0x1ec] sm:$0xf0] }
 0x116   :  { %v7659_v43 = vld [vmem:[#allocation5 + $0x6e8] sm:$0xf0]  ;;  %2952 = vmatpush.bf16.msra.mxu2 %v7982_v29 }
 0x117   :  { %v10328_v48 = vld [vmem:[#allocation5 + $0xb0c] sm:$0xf]  ;;  %2940 = vmatpush.bf16.msrb.mxu3 %v7694_v37  ;;  %v7662_v55 = vor.u32 %v10192_v42, %v7659_v43  ;;  %v2662_v42 = vpop.f32.mrf.mxu2 }
 0x118   :  { %v8203_v50 = vld [vmem:[#allocation5 + $0xb28] sm:$0xf0]  ;;  %2965 = vmatpush.bf16.msrb.mxu0 %v8238_v40  ;;  %v6897_v42 = vld [vmem:[#allocation5 + $0xd0] sm:$0xf] }
 0x119   :  { %v10256_v52 = vld [vmem:[#allocation5 + $0x8cc] sm:$0xf]  ;;  %v8206_v59 = vor.u32 %v10328_v48, %v8203_v50  ;;  %2928 = vmatpush.bf16.msrb.mxu1 %v7406_v51  ;;  %v2611_v48 = vand.u32 %v11260_v49, %v2204_v34  ;;  %v7281_v50 = vld [vmem:[#allocation5 + $0x3d0] sm:$0xf] }
 0x11a   :  { %v7915_v53 = vld [vmem:[#allocation5 + $0x8e8] sm:$0xf0]  ;;  %2953 = vmatpush.bf16.msra.mxu2 %v7950_v45  ;;  %v10101_v51 = vld [vmem:[#allocation5 + $0x3ec] sm:$0xf0] }
 0x11b   :  { %v10120_v56 = vld [vmem:[#allocation5 + $0x48c] sm:$0xf]  ;;  %v7918_v2 = vor.u32 %v10256_v52, %v7915_v53  ;;  %2941 = vmatpush.bf16.msrb.mxu3 %v7662_v55  ;;  %v2675_v52 = vpop.f32.mrf.mxu3  ;;  %v7026_v53 = vor.u32 %v10037_v38, %v7025_v35  ;;  %v7185_v35 = vld [vmem:[#allocation5 + $0x310] sm:$0xf] }
 0x11c   :  { %v7371_v58 = vld [vmem:[#allocation5 + $0x4a8] sm:$0xf0]  ;;  %2966 = vmatpush.bf16.msrb.mxu0 %v8206_v59  ;;  %v7441_v38 = vld [vmem:[#allocation5 + $0x510] sm:$0xf] }
 0x11d   :  { %v10184_v62 = vld [vmem:[#allocation5 + $0x68c] sm:$0xf]  ;;  %v7374_v6 = vor.u32 %v10120_v56, %v7371_v58  ;;  %v7537_v56 = vld [vmem:[#allocation5 + $0x5d0] sm:$0xf] }
 0x11e   :  { %v7627_v63 = vld [vmem:[#allocation5 + $0x6a8] sm:$0xf0]  ;;  %2954 = vmatpush.bf16.msra.mxu2 %v7918_v2  ;;  %v10165_v58 = vld [vmem:[#allocation5 + $0x5ec] sm:$0xf0] }
 0x11f   :  { %v10320_v3 = vld [vmem:[#allocation5 + $0xacc] sm:$0xf]  ;;  %v7630_v22 = vor.u32 %v10184_v62, %v7627_v63  ;;  %2929 = vmatpush.bf16.msrb.mxu1 %v7374_v6  ;;  %v10029_v62 = vld [vmem:[#allocation5 + $0x1ac] sm:$0xf0]  ;;  %v7282_v63 = vor.u32 %v10101_v51, %v7281_v50 }
 0x120   :  { %v8171_v4 = vld [vmem:[#allocation5 + $0xae8] sm:$0xf0]  ;;  %v7249_v6 = vld [vmem:[#allocation5 + $0x390] sm:$0xf] }
 0x121   :  { %v10248_v7 = vld [vmem:[#allocation5 + $0x88c] sm:$0xf]  ;;  %v8174_v15 = vor.u32 %v10320_v3, %v8171_v4  ;;  %2942 = vmatpush.bf16.msrb.mxu3 %v7630_v22  ;;  %v7793_v3 = vld [vmem:[#allocation5 + $0x7d0] sm:$0xf]  ;;  %v7538_v4 = vor.u32 %v10165_v58, %v7537_v56 }
 0x122   :  { %v7883_v8 = vld [vmem:[#allocation5 + $0x8a8] sm:$0xf0]  ;;  %v7505_v22 = vld [vmem:[#allocation5 + $0x590] sm:$0xf]  ;;  %v7794_v14 = vor.u32 %v10229_v5, %v7793_v3  ;;  %v614_v5 = vperm.slane %v11307_v21, 1 }
 0x123   :  { %v10112_v11 = vld [vmem:[#allocation5 + $0x44c] sm:$0xf]  ;;  %v7886_v20 = vor.u32 %v10248_v7, %v7883_v8  ;;  %2967 = vmatpush.bf16.msrb.mxu0 %v8174_v15  ;;  %v10093_v7 = vld [vmem:[#allocation5 + $0x3ac] sm:$0xf0]  ;;  %v6994_v8 = vor.u32 %v10029_v62, %v6993_v60  ;;  %v7506_v18 = vor.u32 %v10157_v9, %v7505_v22 }
 0x124   :  { %v7339_v12 = vld [vmem:[#allocation5 + $0x468] sm:$0xf0]  ;;  %v7250_v15 = vor.u32 %v10093_v7, %v7249_v6  ;;  %v7697_v50 = vld [vmem:[#allocation5 + $0x710] sm:$0xf] }
 0x125   :  { %v10176_v16 = vld [vmem:[#allocation5 + $0x64c] sm:$0xf]  ;;  %v7342_v25 = vor.u32 %v10112_v11, %v7339_v12  ;;  %2955 = vmatpush.bf16.msra.mxu2 %v7886_v20  ;;  %v6961_v11 = vld [vmem:[#allocation5 + $0x150] sm:$0xf] }
 0x126   :  { %v7595_v17 = vld [vmem:[#allocation5 + $0x668] sm:$0xf0]  ;;  %v10021_v12 = vld [vmem:[#allocation5 + $0x16c] sm:$0xf0] }
 0x127   :  { %v10312_v23 = vld [vmem:[#allocation5 + $0xa8c] sm:$0xf]  ;;  %v7598_v28 = vor.u32 %v10176_v16, %v7595_v17  ;;  %2930 = vmatpush.bf16.msrb.mxu1 %v7342_v25  ;;  %v7761_v16 = vld [vmem:[#allocation5 + $0x790] sm:$0xf]  ;;  %v2712_v17 = vpop.f32.mrf.mxu2  ;;  %v6962_v25 = vor.u32 %v10021_v12, %v6961_v11 }
 0x128   :  { %v8139_v24 = vld [vmem:[#allocation5 + $0xaa8] sm:$0xf0]  ;;  %v10221_v20 = vld [vmem:[#allocation5 + $0x7ac] sm:$0xf0] }
 0x129   :  { %v10240_v26 = vld [vmem:[#allocation5 + $0x84c] sm:$0xf]  ;;  %v8142_v31 = vor.u32 %v10312_v23, %v8139_v24  ;;  %2943 = vmatpush.bf16.msrb.mxu3 %v7598_v28  ;;  %v7217_v23 = vld [vmem:[#allocation5 + $0x350] sm:$0xf] }
 0x12a   :  { %v7851_v27 = vld [vmem:[#allocation5 + $0x868] sm:$0xf0]  ;;  %v10085_v24 = vld [vmem:[#allocation5 + $0x36c] sm:$0xf0] }
 0x12b   :  { %v10104_v29 = vld [vmem:[#allocation5 + $0x40c] sm:$0xf]  ;;  %v7854_v37 = vor.u32 %v10240_v26, %v7851_v27  ;;  %2968 = vmatpush.bf16.msrb.mxu0 %v8142_v31  ;;  %v7473_v26 = vld [vmem:[#allocation5 + $0x550] sm:$0xf]  ;;  %v7218_v34 = vor.u32 %v10085_v24, %v7217_v23 }
 0x12c   :  { %v7307_v30 = vld [vmem:[#allocation5 + $0x428] sm:$0xf0]  ;;  %v10149_v27 = vld [vmem:[#allocation5 + $0x56c] sm:$0xf0] }
 0x12d   :  { %v10168_v32 = vld [vmem:[#allocation5 + $0x60c] sm:$0xf]  ;;  %v7310_v43 = vor.u32 %v10104_v29, %v7307_v30  ;;  %2956 = vmatpush.bf16.msra.mxu2 %v7854_v37  ;;  %v6929_v28 = vld [vmem:[#allocation5 + $0x110] sm:$0xf]  ;;  %v7762_v30 = vor.u32 %v10221_v20, %v7761_v16 }
 0x12e   :  { %v7563_v33 = vld [vmem:[#allocation5 + $0x628] sm:$0xf0]  ;;  %v10013_v29 = vld [vmem:[#allocation5 + $0x12c] sm:$0xf0] }
 0x12f   :  { %v10304_v39 = vld [vmem:[#allocation5 + $0xa4c] sm:$0xf]  ;;  %v7566_v47 = vor.u32 %v10168_v32, %v7563_v33  ;;  %2931 = vmatpush.bf16.msrb.mxu1 %v7310_v43  ;;  %v7729_v31 = vld [vmem:[#allocation5 + $0x750] sm:$0xf]  ;;  %v7474_v32 = vor.u32 %v10149_v27, %v7473_v26  ;;  %v6930_v37 = vor.u32 %v10013_v29, %v6929_v28  ;;  %v2714_v51 = vpop.f32.mrf.mxu2 }
 0x130   :  { %v8107_v40 = vld [vmem:[#allocation5 + $0xa68] sm:$0xf0]  ;;  %v10213_v33 = vld [vmem:[#allocation5 + $0x76c] sm:$0xf0] }
 0x131   :  { %v10232_v44 = vld [vmem:[#allocation5 + $0x80c] sm:$0xf]  ;;  %v8110_v55 = vor.u32 %v10304_v39, %v8107_v40  ;;  %2944 = vmatpush.bf16.msrb.mxu3 %v7566_v47  ;;  %v10141_v39 = vld [vmem:[#allocation5 + $0x52c] sm:$0xf0]  ;;  %v2686_v40 = vpop.f32.mrf.mxu0  ;;  %v7730_v47 = vor.u32 %v10213_v33, %v7729_v31 }
 0x132   :  { %v7819_v45 = vld [vmem:[#allocation5 + $0x828] sm:$0xf0]  ;;  %2932 = vmatmul.bf16.vlgmr.msrb.gmra.mxu1 %v11262_v57  ;;  %v10005_v43 = vld [vmem:[#allocation5 + $0xec] sm:$0xf0]  ;;  %v7442_v52 = vor.u32 %v10141_v39, %v7441_v38 }
 0x133   :  { %v7822_v59 = vor.u32 %v10232_v44, %v7819_v45  ;;  %v10296_v1 = vld [vmem:[#allocation5 + $0xa0c] sm:$0xf]  ;;  %2983 = vmatpush.bf16.msra.mxu1 %v2611_v48  ;;  %2969 = vmatpush.bf16.msrb.mxu0 %v8110_v55  ;;  %v2687_v44 = vadd.f32 %v2686_v40, %v11313_v19  ;;  %v2699_v45 = vpop.f32.mrf.mxu1  ;;  %v7186_v48 = vor.u32 %v10077_v36, %v7185_v35  ;;  %v7153_v55 = vld [vmem:[#allocation5 + $0x2d0] sm:$0xf] }
 0x134   :  { %v8075_v2 = vld [vmem:[#allocation5 + $0xa28] sm:$0xf0]  ;;  %2945 = vmatmul.bf16.vlgmr.msrb.gmra.mxu3 %v11267_v0  ;;  %v10069_v56 = vld [vmem:[#allocation5 + $0x2ec] sm:$0xf0] }
 0x135   :  { %2989 = vmatpush.bf16.msra.mxu3 %v7026_v53  ;;  %2957 = vmatpush.bf16.msra.mxu2 %v7822_v59  ;;  %v8078_v10 = vor.u32 %v10296_v1, %v8075_v2  ;;  %v10205_v53 = vld [vmem:[#allocation5 + $0x72c] sm:$0xf0]  ;;  %v2700_v58 = vadd.f32 %v2699_v45, %v2687_v44  ;;  %v6898_v59 = vor.u32 %v10005_v43, %v6897_v42 }
 0x136   :  { %v7409_v60 = vld [vmem:[#allocation5 + $0x4d0] sm:$0xf]  ;;  %v7698_v19 = vor.u32 %v10205_v53, %v7697_v50  ;;  %v7154_v3 = vor.u32 %v10069_v56, %v7153_v55 }
 0x137   :  { %3002 = vmatpush.bf16.msrb.mxu1 %v7282_v63  ;;  %2970 = vmatpush.bf16.msrb.mxu0 %v8078_v10  ;;  %v10133_v62 = vld [vmem:[#allocation5 + $0x4ec] sm:$0xf0]  ;;  %v11321_v2 = vadd.f32 %v2712_v17, %v2700_v58  ;;  %v2725_v17 = vpop.f32.mrf.mxu3 }
 0x138   :  { %2958 = vmatmul.bf16.vlgmr.msra.gmra.mxu2 %v11279_v41  ;;  %v6865_v63 = vld [vmem:[#allocation5 + $0x90] sm:$0xf]  ;;  %v7410_v6 = vor.u32 %v10133_v62, %v7409_v60  ;;  %v2726_v24 = vadd.f32 %v2725_v17, %v614_v5 }
 0x139   :  { %3015 = vmatpush.bf16.msrb.mxu2 %v7538_v4  ;;  %2990 = vmatpush.bf16.msra.mxu3 %v6994_v8  ;;  %v9997_v1 = vld [vmem:[#allocation5 + $0xac] sm:$0xf0]  ;;  %vm3353_vm3 = vcmp.gt.f32.partialorder %v11321_v2, 0.0 }
 0x13a   :  { %2971 = vmatmul.bf16.vlgmr.msrb.gmra.mxu0 %v11281_v46  ;;  %v7665_v4 = vld [vmem:[#allocation5 + $0x6d0] sm:$0xf]  ;;  %v6866_v9 = vor.u32 %v9997_v1, %v6865_v63 }
 0x13b   :  { %3028 = vmatpush.bf16.msra.mxu0 %v7794_v14  ;;  %3003 = vmatpush.bf16.msrb.mxu1 %v7250_v15  ;;  %v10197_v7 = vld [vmem:[#allocation5 + $0x6ec] sm:$0xf0]  ;;  %v2688_v15 = vpop.f32.mrf.mxu0 }
 0x13c   :  { %v7121_v8 = vld [vmem:[#allocation5 + $0x290] sm:$0xf] }
 0x13d   :  { %3016 = vmatpush.bf16.msrb.mxu2 %v7506_v18  ;;  %2991 = vmatpush.bf16.msra.mxu3 %v6962_v25  ;;  %v10061_v22 = vld [vmem:[#allocation5 + $0x2ac] sm:$0xf0]  ;;  %v7666_v18 = vor.u32 %v10197_v7, %v7665_v4  ;;  %v2701_v25 = vpop.f32.mrf.mxu1 }
 0x13e   :  { %v7377_v10 = vld [vmem:[#allocation5 + $0x490] sm:$0xf]  ;;  %v7122_v20 = vor.u32 %v10061_v22, %v7121_v8  ;;  %v7027_v22 = vld [vmem:[#allocation5 + $0x1f0] sm:$0xf0] }
 0x13f   :  { %3029 = vmatpush.bf16.msra.mxu0 %v7762_v30  ;;  %3004 = vmatpush.bf16.msrb.mxu1 %v7218_v34  ;;  %v10125_v11 = vld [vmem:[#allocation5 + $0x4ac] sm:$0xf0]  ;;  %v2738_v30 = vpop.f32.mrf.mxu2 }
 0x140   :  { %v6833_v12 = vld [vmem:[#allocation5 + $0x50] sm:$0xf]  ;;  %v7378_v26 = vor.u32 %v10125_v11, %v7377_v10  ;;  %v11329_v35 = vadd.f32 %v2738_v30, %v2726_v24  ;;  %v7283_v10 = vld [vmem:[#allocation5 + $0x3f0] sm:$0xf0] }
 0x141   :  { %3017 = vmatpush.bf16.msrb.mxu2 %v7474_v32  ;;  %2992 = vmatpush.bf16.msra.mxu3 %v6930_v37  ;;  %v9989_v14 = vld [vmem:[#allocation5 + $0x6c] sm:$0xf0]  ;;  %v10025_v24 = vld [vmem:[#allocation5 + $0x194] sm:$0xf] }
 0x142   :  { %8322 = vmatmul.msk.bf16.vlgmr.msra.gmra.mxu1 %vm2593_vm2, %v11275_v54  ;;  %v11326_v16 = vld [vmem:[#allocation5 + $0xc10] sm:$0x77]  ;;  %v6834_v34 = vor.u32 %v9989_v14, %v6833_v12 }
 0x143   :  { %3030 = vmatpush.bf16.msra.mxu0 %v7730_v47  ;;  %3005 = vmatpush.bf16.msrb.mxu1 %v7186_v48  ;;  %v7633_v23 = vld [vmem:[#allocation5 + $0x690] sm:$0xf]  ;;  %v1813_v33 = vunpack.c.l.b16 %v11326_v16 }
 0x144   :  { %v10189_v27 = vld [vmem:[#allocation5 + $0x6ac] sm:$0xf0] }
 0x145   :  { %3018 = vmatpush.bf16.msrb.mxu2 %v7442_v52  ;;  %2993 = vmatpush.bf16.msra.mxu3 %v6898_v59  ;;  %v7089_v28 = vld [vmem:[#allocation5 + $0x250] sm:$0xf]  ;;  %v7634_v39 = vor.u32 %v10189_v27, %v7633_v23  ;;  %v2205_v56 = vpack.c.b16 %v1813_v33, %v1813_v33  ;;  %v2727_v59 = vpop.f32.mrf.mxu3  ;;  %v10089_v27 = vld [vmem:[#allocation5 + $0x394] sm:$0xf] }
 0x146   :  { %v10053_v29 = vld [vmem:[#allocation5 + $0x26c] sm:$0xf0]  ;;  %v10073_v59 = vld [vmem:[#allocation5 + $0x314] sm:$0xf] }
 0x147   :  { %3031 = vmatpush.bf16.msra.mxu0 %v7698_v19  ;;  %3006 = vmatpush.bf16.msrb.mxu1 %v7154_v3  ;;  %v7345_v31 = vld [vmem:[#allocation5 + $0x450] sm:$0xf]  ;;  %v7090_v40 = vor.u32 %v10053_v29, %v7089_v28  ;;  %v2740_v7 = vpop.f32.mrf.mxu2  ;;  %v2614_v8 = vand.u32 %v11260_v49, %v2205_v56  ;;  %v7251_v28 = vld [vmem:[#allocation5 + $0x3b0] sm:$0xf0] }
 0x148   :  { %v10117_v32 = vld [vmem:[#allocation5 + $0x46c] sm:$0xf0]  ;;  %v10001_v7 = vld [vmem:[#allocation5 + $0xd4] sm:$0xf] }
 0x149   :  { %3019 = vmatpush.bf16.msrb.mxu2 %v7410_v6  ;;  %2994 = vmatpush.bf16.msra.mxu3 %v6866_v9  ;;  %v6801_v36 = vld [vmem:[#allocation5 + $0x10] sm:$0xf]  ;;  %v7346_v45 = vor.u32 %v10117_v32, %v7345_v31  ;;  %v10033_v6 = vld [vmem:[#allocation5 + $0x1d4] sm:$0xf] }
 0x14a   :  { %v9981_v37 = vld [vmem:[#allocation5 + $0x2c] sm:$0xf0]  ;;  %v10097_v9 = vld [vmem:[#allocation5 + $0x3d4] sm:$0xf] }
 0x14b   :  { %v8049_v38 = vld [vmem:[#allocation5 + $0x9d0] sm:$0xf]  ;;  %3032 = vmatpush.bf16.msra.mxu0 %v7666_v18  ;;  %3007 = vmatpush.bf16.msrb.mxu1 %v7122_v20  ;;  %v6802_v51 = vor.u32 %v9981_v37, %v6801_v36  ;;  %v7030_v20 = vor.u32 %v10033_v6, %v7027_v22  ;;  %v7286_v23 = vor.u32 %v10097_v9, %v7283_v10  ;;  %v10017_v37 = vld [vmem:[#allocation5 + $0x154] sm:$0xf]  ;;  %v2764_v6 = vpop.f32.mrf.mxu1 }
 0x14c   :  { %v10293_v42 = vld [vmem:[#allocation5 + $0x9ec] sm:$0xf0]  ;;  %v7254_v36 = vor.u32 %v10089_v27, %v7251_v28  ;;  %v6899_v22 = vld [vmem:[#allocation5 + $0xf0] sm:$0xf0] }
 0x14d   :  { %v7601_v43 = vld [vmem:[#allocation5 + $0x650] sm:$0xf]  ;;  %3020 = vmatpush.bf16.msrb.mxu2 %v7378_v26  ;;  %2995 = vmatpush.bf16.msra.mxu3 %v6834_v34  ;;  %v8050_v58 = vor.u32 %v10293_v42, %v8049_v38  ;;  %v6995_v26 = vld [vmem:[#allocation5 + $0x1b0] sm:$0xf0] }
 0x14e   :  { %v10181_v44 = vld [vmem:[#allocation5 + $0x66c] sm:$0xf0]  ;;  %v6998_v33 = vor.u32 %v10025_v24, %v6995_v26  ;;  %v7219_v42 = vld [vmem:[#allocation5 + $0x370] sm:$0xf0]  ;;  %v2777_v24 = vpop.f32.mrf.mxu3 }
 0x14f   :  { %v7057_v47 = vld [vmem:[#allocation5 + $0x210] sm:$0xf]  ;;  %3033 = vmatpush.bf16.msra.mxu0 %v7634_v39  ;;  %3008 = vmatpush.bf16.msrb.mxu1 %v7090_v40  ;;  %v7602_v60 = vor.u32 %v10181_v44, %v7601_v43  ;;  %v6963_v39 = vld [vmem:[#allocation5 + $0x170] sm:$0xf0]  ;;  %v2790_v28 = vpop.f32.mrf.mxu2 }
 0x150   :  { %v10045_v48 = vld [vmem:[#allocation5 + $0x22c] sm:$0xf0]  ;;  %v10081_v40 = vld [vmem:[#allocation5 + $0x354] sm:$0xf] }
 0x151   :  { %v7313_v50 = vld [vmem:[#allocation5 + $0x410] sm:$0xf]  ;;  %v7058_v62 = vor.u32 %v10045_v48, %v7057_v47  ;;  %3021 = vmatpush.bf16.msrb.mxu2 %v7346_v45  ;;  %2996 = vmatpush.bf16.msra.mxu3 %v6802_v51  ;;  %v6966_v51 = vor.u32 %v10017_v37, %v6963_v39  ;;  %v10065_v9 = vld [vmem:[#allocation5 + $0x2d4] sm:$0xf] }
 0x152   :  { %v10109_v52 = vld [vmem:[#allocation5 + $0x42c] sm:$0xf0]  ;;  %v7155_v10 = vld [vmem:[#allocation5 + $0x2f0] sm:$0xf0] }
 0x153   :  { %v8305_v53 = vld [vmem:[#allocation5 + $0xbd0] sm:$0xf]  ;;  %v7314_v19 = vor.u32 %v10109_v52, %v7313_v50  ;;  %3034 = vmatpush.bf16.msra.mxu0 %v7602_v60  ;;  %3009 = vmatpush.bf16.msrb.mxu1 %v7058_v62  ;;  %v2751_v50 = vpop.f32.mrf.mxu0  ;;  %v7222_v52 = vor.u32 %v10081_v40, %v7219_v42  ;;  %v7187_v60 = vld [vmem:[#allocation5 + $0x330] sm:$0xf0] }
 0x154   :  { %v10357_v55 = vld [vmem:[#allocation5 + $0xbec] sm:$0xf0]  ;;  %2997 = vmatmul.bf16.vlgmr.msra.gmra.mxu3 %v11264_v61  ;;  %v10161_v42 = vld [vmem:[#allocation5 + $0x5d4] sm:$0xf] }
 0x155   :  { %v8017_v63 = vld [vmem:[#allocation5 + $0x990] sm:$0xf]  ;;  %v8306_v3 = vor.u32 %v10357_v55, %v8305_v53  ;;  %3041 = vmatpush.bf16.msrb.mxu3 %v8050_v58  ;;  %3022 = vmatpush.bf16.msrb.mxu2 %v7314_v19  ;;  %v10009_v53 = vld [vmem:[#allocation5 + $0x114] sm:$0xf]  ;;  %v2752_v55 = vadd.f32 %v2751_v50, %v11329_v35 }
 0x156   :  { %v10285_v1 = vld [vmem:[#allocation5 + $0x9ac] sm:$0xf0]  ;;  %3010 = vmatmul.bf16.vlgmr.msrb.gmra.mxu1 %v11271_v13  ;;  %v6931_v58 = vld [vmem:[#allocation5 + $0x130] sm:$0xf0] }
 0x157   :  { %v7569_v4 = vld [vmem:[#allocation5 + $0x610] sm:$0xf]  ;;  %v8018_v11 = vor.u32 %v10285_v1, %v8017_v63  ;;  %3054 = vmatpush.bf16.msra.mxu1 %v8306_v3  ;;  %v2765_v35 = vadd.f32 %v2764_v6, %v2752_v55  ;;  %v10049_v50 = vld [vmem:[#allocation5 + $0x254] sm:$0xf] }
 0x158   :  { %v10173_v5 = vld [vmem:[#allocation5 + $0x62c] sm:$0xf0]  ;;  %3023 = vmatmul.bf16.vlgmr.msrb.gmra.mxu2 %v11262_v57 }
 0x159   :  { %v8273_v12 = vld [vmem:[#allocation5 + $0xb90] sm:$0xf]  ;;  %v7570_v15 = vor.u32 %v10173_v5, %v7569_v4  ;;  %3074 = vmatpush.bf16.msra.mxu2 %v2614_v8  ;;  %3042 = vmatpush.bf16.msrb.mxu3 %v8018_v11  ;;  %v6934_v4 = vor.u32 %v10009_v53, %v6931_v58  ;;  %v7190_v5 = vor.u32 %v10073_v59, %v7187_v60  ;;  %v10225_v58 = vld [vmem:[#allocation5 + $0x7d4] sm:$0xf] }
 0x15a   :  { %v10349_v14 = vld [vmem:[#allocation5 + $0xbac] sm:$0xf0]  ;;  %v2778_v26 = vadd.f32 %v2777_v24, %v2765_v35  ;;  %v7795_v59 = vld [vmem:[#allocation5 + $0x7f0] sm:$0xf0] }
 0x15b   :  { %v7985_v17 = vld [vmem:[#allocation5 + $0x950] sm:$0xf]  ;;  %v8274_v25 = vor.u32 %v10349_v14, %v8273_v12  ;;  %3035 = vmatpush.bf16.msra.mxu0 %v7570_v15  ;;  %v10153_v60 = vld [vmem:[#allocation5 + $0x594] sm:$0xf] }
 0x15c   :  { %v10277_v18 = vld [vmem:[#allocation5 + $0x96c] sm:$0xf0]  ;;  %v7059_v35 = vld [vmem:[#allocation5 + $0x230] sm:$0xf0] }
 0x15d   :  { %v7986_v29 = vor.u32 %v10277_v18, %v7985_v17  ;;  %v8241_v30 = vld [vmem:[#allocation5 + $0xb50] sm:$0xf]  ;;  %3093 = vmatpush.bf16.msrb.mxu2 %v7286_v23  ;;  %3055 = vmatpush.bf16.msra.mxu1 %v8274_v25  ;;  %v2753_v18 = vpop.f32.mrf.mxu0  ;;  %v7158_v23 = vor.u32 %v10065_v9, %v7155_v10  ;;  %v9993_v25 = vld [vmem:[#allocation5 + $0x94] sm:$0xf]  ;;  %v2792_v9 = vpop.f32.mrf.mxu2  ;;  %v7798_v10 = vor.u32 %v10225_v58, %v7795_v59 }
 0x15e   :  { %v10341_v34 = vld [vmem:[#allocation5 + $0xb6c] sm:$0xf0]  ;;  %3036 = vmatmul.bf16.vlgmr.msra.gmra.mxu0 %v11267_v0  ;;  %v7763_v18 = vld [vmem:[#allocation5 + $0x7b0] sm:$0xf0] }
 0x15f   :  { %v7953_v31 = vld [vmem:[#allocation5 + $0x910] sm:$0xf]  ;;  %3080 = vmatpush.bf16.msrb.mxu0 %v7030_v20  ;;  %v8242_v38 = vor.u32 %v10341_v34, %v8241_v30  ;;  %3043 = vmatpush.bf16.msrb.mxu3 %v7986_v29  ;;  %v6902_v20 = vor.u32 %v10001_v7, %v6899_v22  ;;  %v6867_v29 = vld [vmem:[#allocation5 + $0xb0] sm:$0xf0] }
 0x160   :  { %v10269_v32 = vld [vmem:[#allocation5 + $0x92c] sm:$0xf0]  ;;  %v10057_v30 = vld [vmem:[#allocation5 + $0x294] sm:$0xf]  ;;  %v6870_v39 = vor.u32 %v9993_v25, %v6867_v29 }
 0x161   :  { %v7954_v43 = vor.u32 %v10269_v32, %v7953_v31  ;;  %v8209_v44 = vld [vmem:[#allocation5 + $0xb10] sm:$0xf]  ;;  %3094 = vmatpush.bf16.msrb.mxu2 %v7254_v36  ;;  %3056 = vmatpush.bf16.msra.mxu1 %v8242_v38  ;;  %v7123_v34 = vld [vmem:[#allocation5 + $0x2b0] sm:$0xf0]  ;;  %v2791_v36 = vadd.f32 %v2790_v28, %v2778_v26 }
 0x162   :  { %v10333_v45 = vld [vmem:[#allocation5 + $0xb2c] sm:$0xf0]  ;;  %v7126_v40 = vor.u32 %v10057_v30, %v7123_v34  ;;  %v10289_v22 = vld [vmem:[#allocation5 + $0x9d4] sm:$0xf] }
 0x163   :  { %v7921_v47 = vld [vmem:[#allocation5 + $0x8d0] sm:$0xf]  ;;  %3081 = vmatpush.bf16.msrb.mxu0 %v6998_v33  ;;  %v8210_v56 = vor.u32 %v10333_v45, %v8209_v44  ;;  %3044 = vmatpush.bf16.msrb.mxu3 %v7954_v43  ;;  %v7539_v43 = vld [vmem:[#allocation5 + $0x5f0] sm:$0xf0]  ;;  %v2766_v45 = vpop.f32.mrf.mxu1 }
 0x164   :  { %v10261_v48 = vld [vmem:[#allocation5 + $0x8ec] sm:$0xf0]  ;;  %v9985_v44 = vld [vmem:[#allocation5 + $0x54] sm:$0xf] }
 0x165   :  { %v7922_v62 = vor.u32 %v10261_v48, %v7921_v47  ;;  %v8177_v63 = vld [vmem:[#allocation5 + $0xad0] sm:$0xf]  ;;  %3095 = vmatpush.bf16.msrb.mxu2 %v7222_v52  ;;  %3057 = vmatpush.bf16.msra.mxu1 %v8210_v56  ;;  %v6835_v48 = vld [vmem:[#allocation5 + $0x70] sm:$0xf0]  ;;  %v7542_v56 = vor.u32 %v10161_v42, %v7539_v43 }
 0x166   :  { %v10325_v1 = vld [vmem:[#allocation5 + $0xaec] sm:$0xf0]  ;;  %v10145_v24 = vld [vmem:[#allocation5 + $0x554] sm:$0xf] }
 0x167   :  { %v7889_v19 = vld [vmem:[#allocation5 + $0x890] sm:$0xf]  ;;  %3082 = vmatpush.bf16.msrb.mxu0 %v6966_v51  ;;  %v8178_v8 = vor.u32 %v10325_v1, %v8177_v63  ;;  %3045 = vmatpush.bf16.msrb.mxu3 %v7922_v62  ;;  %v7091_v51 = vld [vmem:[#allocation5 + $0x270] sm:$0xf0]  ;;  %v2803_v62 = vpop.f32.mrf.mxu0  ;;  %v6838_v63 = vor.u32 %v9985_v44, %v6835_v48 }
 0x168   :  { %v10253_v3 = vld [vmem:[#allocation5 + $0x8ac] sm:$0xf0]  ;;  %8323 = vmatmul.msk.bf16.vlgmr.msra.gmra.mxu2 %vm2593_vm2, %v11275_v54  ;;  %v7094_v1 = vor.u32 %v10049_v50, %v7091_v51  ;;  %v11339_v6 = vadd.f32 %v2803_v62, %v2791_v36  ;;  %v7475_v25 = vld [vmem:[#allocation5 + $0x570] sm:$0xf0] }
 0x169   :  { %v7890_v11 = vor.u32 %v10253_v3, %v7889_v19  ;;  %v8145_v12 = vld [vmem:[#allocation5 + $0xa90] sm:$0xf]  ;;  %3096 = vmatpush.bf16.msrb.mxu2 %v7190_v5  ;;  %3058 = vmatpush.bf16.msra.mxu1 %v8178_v8  ;;  %v7507_v19 = vld [vmem:[#allocation5 + $0x5b0] sm:$0xf0]  ;;  %v2779_v5 = vpop.f32.mrf.mxu3 }
 0x16a   :  { %v10317_v14 = vld [vmem:[#allocation5 + $0xaac] sm:$0xf0]  ;;  %v9977_v3 = vld [vmem:[#allocation5 + $0x14] sm:$0xf]  ;;  %vm3354_vm4 = vcmp.gt.f32.partialorder %v11339_v6, 0.0 }
 0x16b   :  { %v7857_v15 = vld [vmem:[#allocation5 + $0x850] sm:$0xf]  ;;  %3083 = vmatpush.bf16.msrb.mxu0 %v6934_v4  ;;  %v8146_v27 = vor.u32 %v10317_v14, %v8145_v12  ;;  %3046 = vmatpush.bf16.msrb.mxu3 %v7890_v11  ;;  %v6803_v4 = vld [vmem:[#allocation5 + $0x30] sm:$0xf0] }
 0x16c   :  { %v10245_v17 = vld [vmem:[#allocation5 + $0x86c] sm:$0xf0]  ;;  %v10041_v8 = vld [vmem:[#allocation5 + $0x214] sm:$0xf] }
 0x16d   :  { %v7858_v31 = vor.u32 %v10245_v17, %v7857_v15  ;;  %v8113_v32 = vld [vmem:[#allocation5 + $0xa50] sm:$0xf]  ;;  %3097 = vmatpush.bf16.msrb.mxu2 %v7158_v23  ;;  %3059 = vmatpush.bf16.msra.mxu1 %v8146_v27  ;;  %v8051_v11 = vld [vmem:[#allocation5 + $0x9f0] sm:$0xf0]  ;;  %v7510_v15 = vor.u32 %v10153_v60, %v7507_v19  ;;  %v7062_v23 = vor.u32 %v10041_v8, %v7059_v35  ;;  %v615_v19 = vperm.slane %v11307_v21, 2 }
 0x16e   :  { %v10309_v33 = vld [vmem:[#allocation5 + $0xa6c] sm:$0xf0]  ;;  %v10353_v12 = vld [vmem:[#allocation5 + $0xbd4] sm:$0xf]  ;;  %v8054_v26 = vor.u32 %v10289_v22, %v8051_v11 }
 0x16f   :  { %v7825_v37 = vld [vmem:[#allocation5 + $0x810] sm:$0xf]  ;;  %3084 = vmatpush.bf16.msrb.mxu0 %v6902_v20  ;;  %v8114_v47 = vor.u32 %v10309_v33, %v8113_v32  ;;  %3047 = vmatpush.bf16.msrb.mxu3 %v7858_v31  ;;  %v8307_v14 = vld [vmem:[#allocation5 + $0xbf0] sm:$0xf0]  ;;  %v6806_v20 = vor.u32 %v9977_v3, %v6803_v4  ;;  %v7478_v32 = vor.u32 %v10145_v24, %v7475_v25 }
 0x170   :  { %v10237_v38 = vld [vmem:[#allocation5 + $0x82c] sm:$0xf0]  ;;  %v10217_v17 = vld [vmem:[#allocation5 + $0x794] sm:$0xf]  ;;  %v8310_v27 = vor.u32 %v10353_v12, %v8307_v14 }
 0x171   :  { %v7826_v52 = vor.u32 %v10237_v38, %v7825_v37  ;;  %v8081_v53 = vld [vmem:[#allocation5 + $0xa10] sm:$0xf]  ;;  %3098 = vmatpush.bf16.msrb.mxu2 %v7126_v40  ;;  %3060 = vmatpush.bf16.msra.mxu1 %v8114_v47  ;;  %v10281_v28 = vld [vmem:[#allocation5 + $0x994] sm:$0xf]  ;;  %v7766_v29 = vor.u32 %v10217_v17, %v7763_v18  ;;  %v2805_v37 = vpop.f32.mrf.mxu0 }
 0x172   :  { %v10301_v55 = vld [vmem:[#allocation5 + $0xa2c] sm:$0xf0]  ;;  %v8019_v30 = vld [vmem:[#allocation5 + $0x9b0] sm:$0xf0] }
 0x173   :  { %3085 = vmatpush.bf16.msrb.mxu0 %v6870_v39  ;;  %v8082_v7 = vor.u32 %v10301_v55, %v8081_v53  ;;  %3048 = vmatpush.bf16.msrb.mxu3 %v7826_v52  ;;  %v10345_v34 = vld [vmem:[#allocation5 + $0xb94] sm:$0xf]  ;;  %v8022_v40 = vor.u32 %v10281_v28, %v8019_v30 }
 0x174   :  { %v8275_v31 = vld [vmem:[#allocation5 + $0xbb0] sm:$0xf0] }
 0x175   :  { %3099 = vmatpush.bf16.msrb.mxu2 %v7094_v1  ;;  %3061 = vmatpush.bf16.msra.mxu1 %v8082_v7  ;;  %v10209_v33 = vld [vmem:[#allocation5 + $0x754] sm:$0xf]  ;;  %v8278_v42 = vor.u32 %v10345_v34, %v8275_v31 }
 0x176   :  { %3049 = vmatmul.bf16.vlgmr.msrb.gmra.mxu3 %v11279_v41  ;;  %v7731_v36 = vld [vmem:[#allocation5 + $0x770] sm:$0xf0] }
 0x177   :  { %3106 = vmatpush.bf16.msra.mxu3 %v7542_v56  ;;  %3086 = vmatpush.bf16.msrb.mxu0 %v6838_v63  ;;  %v10137_v38 = vld [vmem:[#allocation5 + $0x514] sm:$0xf]  ;;  %v7734_v44 = vor.u32 %v10209_v33, %v7731_v36 }
 0x178   :  { %v7443_v39 = vld [vmem:[#allocation5 + $0x530] sm:$0xf0]  ;;  %3062 = vmatmul.bf16.vlgmr.msra.gmra.mxu1 %v11281_v46 }
 0x179   :  { %3119 = vmatpush.bf16.msrb.mxu1 %v7798_v10  ;;  %3100 = vmatpush.bf16.msrb.mxu2 %v7062_v23  ;;  %v10273_v43 = vld [vmem:[#allocation5 + $0x954] sm:$0xf]  ;;  %v7446_v50 = vor.u32 %v10137_v38, %v7443_v39  ;;  %v2842_v7 = vpop.f32.mrf.mxu0  ;;  %v2816_v10 = vpop.f32.mrf.mxu1 }
 0x17a   :  { %v7987_v45 = vld [vmem:[#allocation5 + $0x970] sm:$0xf0]  ;;  %v2817_v12 = vadd.f32 %v2816_v10, %v615_v19  ;;  %v10038_v19 = vld [vmem:[#allocation5 + $0x1f4] sm:$0xf0] }
 0x17b   :  { %3107 = vmatpush.bf16.msra.mxu3 %v7510_v15  ;;  %3087 = vmatpush.bf16.msrb.mxu0 %v6806_v20  ;;  %v10337_v47 = vld [vmem:[#allocation5 + $0xb54] sm:$0xf]  ;;  %v7990_v56 = vor.u32 %v10273_v43, %v7987_v45  ;;  %v2855_v45 = vpop.f32.mrf.mxu2 }
 0x17c   :  { %v8243_v48 = vld [vmem:[#allocation5 + $0xb70] sm:$0xf0]  ;;  %3101 = vmatmul.bf16.vlgmr.msrb.gmra.mxu2 %v11271_v13 }
 0x17d   :  { %3145 = vmatpush.bf16.msra.mxu2 %v8310_v27  ;;  %3120 = vmatpush.bf16.msrb.mxu1 %v7766_v29  ;;  %v10201_v51 = vld [vmem:[#allocation5 + $0x714] sm:$0xf]  ;;  %v8246_v58 = vor.u32 %v10337_v47, %v8243_v48  ;;  %v2829_v27 = vpop.f32.mrf.mxu3 }
 0x17e   :  { %v7699_v52 = vld [vmem:[#allocation5 + $0x730] sm:$0xf0]  ;;  %3088 = vmatmul.bf16.vlgmr.msrb.gmra.mxu0 %v11264_v61  ;;  %v2830_v34 = vadd.f32 %v2829_v27, %v2817_v12  ;;  %v7545_v12 = vld [vmem:[#allocation5 + $0x5d8] sm:$0xf] }
 0x17f   :  { %3132 = vmatpush.bf16.msra.mxu0 %v8054_v26  ;;  %3108 = vmatpush.bf16.msra.mxu3 %v7478_v32  ;;  %v10129_v53 = vld [vmem:[#allocation5 + $0x4d4] sm:$0xf]  ;;  %v7702_v62 = vor.u32 %v10201_v51, %v7699_v52  ;;  %v1814_v26 = vunpack.c.h.b16 %v11326_v16 }
 0x180   :  { %v7411_v55 = vld [vmem:[#allocation5 + $0x4f0] sm:$0xf0] }
 0x181   :  { %3146 = vmatpush.bf16.msra.mxu2 %v8278_v42  ;;  %v10265_v59 = vld [vmem:[#allocation5 + $0x914] sm:$0xf]  ;;  %3121 = vmatpush.bf16.msrb.mxu1 %v7734_v44  ;;  %v7414_v3 = vor.u32 %v10129_v53, %v7411_v55  ;;  %v2843_v42 = vadd.f32 %v2842_v7, %v2830_v34  ;;  %v2206_v44 = vpack.c.b16 %v1814_v26, %v1814_v26  ;;  %v2818_v51 = vpop.f32.mrf.mxu1 }
 0x182   :  { %v7955_v60 = vld [vmem:[#allocation5 + $0x930] sm:$0xf0]  ;;  %v7737_v51 = vld [vmem:[#allocation5 + $0x758] sm:$0xf] }
 0x183   :  { %3133 = vmatpush.bf16.msra.mxu0 %v8022_v40  ;;  %v10329_v63 = vld [vmem:[#allocation5 + $0xb14] sm:$0xf]  ;;  %3109 = vmatpush.bf16.msra.mxu3 %v7446_v50  ;;  %v7958_v22 = vor.u32 %v10265_v59, %v7955_v60  ;;  %v2844_v40 = vpop.f32.mrf.mxu0  ;;  %v11347_v52 = vadd.f32 %v2855_v45, %v2843_v42  ;;  %v7225_v42 = vld [vmem:[#allocation5 + $0x358] sm:$0xf] }
 0x184   :  { %v8211_v1 = vld [vmem:[#allocation5 + $0xb30] sm:$0xf0]  ;;  %v10022_v40 = vld [vmem:[#allocation5 + $0x174] sm:$0xf0] }
 0x185   :  { %v10193_v4 = vld [vmem:[#allocation5 + $0x6d4] sm:$0xf]  ;;  %3147 = vmatpush.bf16.msra.mxu2 %v8246_v58  ;;  %v8214_v9 = vor.u32 %v10329_v63, %v8211_v1  ;;  %3122 = vmatpush.bf16.msrb.mxu1 %v7702_v62  ;;  %v7033_v63 = vld [vmem:[#allocation5 + $0x1d8] sm:$0xf]  ;;  %v2617_v1 = vand.u32 %v11260_v49, %v2206_v44 }
 0x186   :  { %v7667_v5 = vld [vmem:[#allocation5 + $0x6f0] sm:$0xf0]  ;;  %v7481_v45 = vld [vmem:[#allocation5 + $0x558] sm:$0xf] }
 0x187   :  { %v10121_v8 = vld [vmem:[#allocation5 + $0x494] sm:$0xf]  ;;  %3134 = vmatpush.bf16.msra.mxu0 %v7990_v56  ;;  %v7670_v14 = vor.u32 %v10193_v4, %v7667_v5  ;;  %3110 = vmatpush.bf16.msra.mxu3 %v7414_v3  ;;  %v7289_v3 = vld [vmem:[#allocation5 + $0x3d8] sm:$0xf] }
 0x188   :  { %v7379_v35 = vld [vmem:[#allocation5 + $0x4b0] sm:$0xf0]  ;;  %v10102_v4 = vld [vmem:[#allocation5 + $0x3f4] sm:$0xf0] }
 0x189   :  { %v10257_v11 = vld [vmem:[#allocation5 + $0x8d4] sm:$0xf]  ;;  %v7382_v21 = vor.u32 %v10121_v8, %v7379_v35  ;;  %3148 = vmatpush.bf16.msra.mxu2 %v8214_v9  ;;  %3123 = vmatpush.bf16.msrb.mxu1 %v7670_v14  ;;  %v2831_v9 = vpop.f32.mrf.mxu3  ;;  %v10166_v14 = vld [vmem:[#allocation5 + $0x5f4] sm:$0xf0] }
 0x18a   :  { %v7923_v15 = vld [vmem:[#allocation5 + $0x8f0] sm:$0xf0]  ;;  %v10006_v9 = vld [vmem:[#allocation5 + $0xf4] sm:$0xf0] }
 0x18b   :  { %v10321_v17 = vld [vmem:[#allocation5 + $0xad4] sm:$0xf]  ;;  %3135 = vmatpush.bf16.msra.mxu0 %v7958_v22  ;;  %v7926_v28 = vor.u32 %v10257_v11, %v7923_v15  ;;  %3111 = vmatpush.bf16.msra.mxu3 %v7382_v21  ;;  %v7034_v15 = vor.u32 %v10038_v19, %v7033_v63  ;;  %v10230_v21 = vld [vmem:[#allocation5 + $0x7f4] sm:$0xf0]  ;;  %v11350_v26 = vpop.f32.mrf.mxu0 }
 0x18c   :  { %v8179_v18 = vld [vmem:[#allocation5 + $0xaf0] sm:$0xf0] }
 0x18d   :  { %v10185_v20 = vld [vmem:[#allocation5 + $0x694] sm:$0xf]  ;;  %v8182_v29 = vor.u32 %v10321_v17, %v8179_v18  ;;  %v7290_v17 = vor.u32 %v10102_v4, %v7289_v3  ;;  %v7801_v18 = vld [vmem:[#allocation5 + $0x7d8] sm:$0xf] }
 0x18e   :  { %v7635_v23 = vld [vmem:[#allocation5 + $0x6b0] sm:$0xf0]  ;;  %v7802_v34 = vor.u32 %v10230_v21, %v7801_v18  ;;  %v7673_v18 = vld [vmem:[#allocation5 + $0x6d8] sm:$0xf] }
 0x18f   :  { %v10113_v24 = vld [vmem:[#allocation5 + $0x454] sm:$0xf]  ;;  %v7638_v31 = vor.u32 %v10185_v20, %v7635_v23  ;;  %3136 = vmatpush.bf16.msra.mxu0 %v7926_v28  ;;  %3149 = vmatpush.bf16.msra.mxu2 %v8182_v29  ;;  %v7001_v20 = vld [vmem:[#allocation5 + $0x198] sm:$0xf]  ;;  %v2857_v29 = vpop.f32.mrf.mxu2 }
 0x190   :  { %v7347_v25 = vld [vmem:[#allocation5 + $0x470] sm:$0xf0]  ;;  %v10030_v23 = vld [vmem:[#allocation5 + $0x1b4] sm:$0xf0] }
 0x191   :  { %v10249_v30 = vld [vmem:[#allocation5 + $0x894] sm:$0xf]  ;;  %v7350_v37 = vor.u32 %v10113_v24, %v7347_v25  ;;  %3124 = vmatpush.bf16.msrb.mxu1 %v7638_v31  ;;  %v7257_v24 = vld [vmem:[#allocation5 + $0x398] sm:$0xf] }
 0x192   :  { %v7891_v32 = vld [vmem:[#allocation5 + $0x8b0] sm:$0xf0]  ;;  %v10094_v25 = vld [vmem:[#allocation5 + $0x3b4] sm:$0xf0] }
 0x193   :  { %v10313_v33 = vld [vmem:[#allocation5 + $0xa94] sm:$0xf]  ;;  %v7894_v47 = vor.u32 %v10249_v30, %v7891_v32  ;;  %3112 = vmatpush.bf16.msra.mxu3 %v7350_v37  ;;  %v7546_v30 = vor.u32 %v10166_v14, %v7545_v12  ;;  %v7513_v31 = vld [vmem:[#allocation5 + $0x598] sm:$0xf] }
 0x194   :  { %v8147_v36 = vld [vmem:[#allocation5 + $0xab0] sm:$0xf0]  ;;  %v10158_v32 = vld [vmem:[#allocation5 + $0x5b4] sm:$0xf0] }
 0x195   :  { %v10177_v38 = vld [vmem:[#allocation5 + $0x654] sm:$0xf]  ;;  %v8150_v48 = vor.u32 %v10313_v33, %v8147_v36  ;;  %3137 = vmatpush.bf16.msra.mxu0 %v7894_v47  ;;  %v7002_v33 = vor.u32 %v10030_v23, %v7001_v20  ;;  %v7258_v36 = vor.u32 %v10094_v25, %v7257_v24  ;;  %v7769_v37 = vld [vmem:[#allocation5 + $0x798] sm:$0xf] }
 0x196   :  { %v7603_v39 = vld [vmem:[#allocation5 + $0x670] sm:$0xf0]  ;;  %v10150_v47 = vld [vmem:[#allocation5 + $0x574] sm:$0xf0] }
 0x197   :  { %v10105_v43 = vld [vmem:[#allocation5 + $0x414] sm:$0xf]  ;;  %v7606_v53 = vor.u32 %v10177_v38, %v7603_v39  ;;  %3150 = vmatpush.bf16.msra.mxu2 %v8150_v48  ;;  %v10222_v38 = vld [vmem:[#allocation5 + $0x7b4] sm:$0xf0]  ;;  %v7482_v63 = vor.u32 %v10150_v47, %v7481_v45  ;;  %v2907_v47 = vpop.f32.mrf.mxu2 }
 0x198   :  { %v7315_v16 = vld [vmem:[#allocation5 + $0x430] sm:$0xf0]  ;;  %v6969_v39 = vld [vmem:[#allocation5 + $0x158] sm:$0xf]  ;;  %v7770_v44 = vor.u32 %v10222_v38, %v7769_v37 }
 0x199   :  { %v10241_v50 = vld [vmem:[#allocation5 + $0x854] sm:$0xf]  ;;  %v7318_v59 = vor.u32 %v10105_v43, %v7315_v16  ;;  %3125 = vmatpush.bf16.msrb.mxu1 %v7606_v53  ;;  %v10086_v43 = vld [vmem:[#allocation5 + $0x374] sm:$0xf0]  ;;  %v7514_v16 = vor.u32 %v10158_v32, %v7513_v31  ;;  %v6970_v48 = vor.u32 %v10022_v40, %v6969_v39 }
 0x19a   :  { %v7859_v55 = vld [vmem:[#allocation5 + $0x870] sm:$0xf0]  ;;  %v10214_v53 = vld [vmem:[#allocation5 + $0x774] sm:$0xf0] }
 0x19b   :  { %v10305_v56 = vld [vmem:[#allocation5 + $0xa54] sm:$0xf]  ;;  %v7862_v5 = vor.u32 %v10241_v50, %v7859_v55  ;;  %3113 = vmatpush.bf16.msra.mxu3 %v7318_v59  ;;  %v7226_v50 = vor.u32 %v10086_v43, %v7225_v42  ;;  %v6937_v55 = vld [vmem:[#allocation5 + $0x118] sm:$0xf] }
 0x19c   :  { %v8115_v58 = vld [vmem:[#allocation5 + $0xa70] sm:$0xf0]  ;;  %v10078_v59 = vld [vmem:[#allocation5 + $0x334] sm:$0xf0] }
 0x19d   :  { %v10169_v60 = vld [vmem:[#allocation5 + $0x614] sm:$0xf]  ;;  %v8118_v7 = vor.u32 %v10305_v56, %v8115_v58  ;;  %3138 = vmatpush.bf16.msra.mxu0 %v7862_v5  ;;  %v10014_v56 = vld [vmem:[#allocation5 + $0x134] sm:$0xf0] }
 0x19e   :  { %v7571_v62 = vld [vmem:[#allocation5 + $0x630] sm:$0xf0]  ;;  %3114 = vmatmul.bf16.vlgmr.msra.gmra.mxu3 %v11262_v57  ;;  %v7193_v58 = vld [vmem:[#allocation5 + $0x318] sm:$0xf]  ;;  %v6938_v3 = vor.u32 %v10014_v56, %v6937_v55 }
 0x19f   :  { %v10233_v8 = vld [vmem:[#allocation5 + $0x814] sm:$0xf]  ;;  %v7574_v10 = vor.u32 %v10169_v60, %v7571_v62  ;;  %3165 = vmatpush.bf16.msrb.mxu3 %v2617_v1  ;;  %3151 = vmatpush.bf16.msra.mxu2 %v8118_v7  ;;  %v2896_v60 = vpop.f32.mrf.mxu0  ;;  %v2868_v62 = vpop.f32.mrf.mxu1  ;;  %v7738_v1 = vor.u32 %v10214_v53, %v7737_v51  ;;  %v7194_v4 = vor.u32 %v10078_v59, %v7193_v58  ;;  %v7449_v5 = vld [vmem:[#allocation5 + $0x518] sm:$0xf] }
 0x1a0   :  { %v7827_v35 = vld [vmem:[#allocation5 + $0x830] sm:$0xf0]  ;;  %v2869_v19 = vadd.f32 %v2868_v62, %v11347_v52  ;;  %v10142_v7 = vld [vmem:[#allocation5 + $0x534] sm:$0xf0] }
 0x1a1   :  { %v10297_v22 = vld [vmem:[#allocation5 + $0xa14] sm:$0xf]  ;;  %v7830_v27 = vor.u32 %v10233_v8, %v7827_v35  ;;  %3126 = vmatpush.bf16.msrb.mxu1 %v7574_v10  ;;  %v7705_v8 = vld [vmem:[#allocation5 + $0x718] sm:$0xf]  ;;  %v7450_v12 = vor.u32 %v10142_v7, %v7449_v5 }
 0x1a2   :  { %v8083_v11 = vld [vmem:[#allocation5 + $0xa30] sm:$0xf0]  ;;  %v10206_v35 = vld [vmem:[#allocation5 + $0x734] sm:$0xf0] }
 0x1a3   :  { %v8086_v28 = vor.u32 %v10297_v22, %v8083_v11  ;;  %3184 = vmatpush.bf16.msra.mxu3 %v7290_v17  ;;  %3139 = vmatpush.bf16.msra.mxu0 %v7830_v27  ;;  %v6905_v22 = vld [vmem:[#allocation5 + $0xd8] sm:$0xf]  ;;  %v7706_v14 = vor.u32 %v10206_v35, %v7705_v8  ;;  %v2881_v27 = vpop.f32.mrf.mxu3 }
 0x1a4   :  { %3127 = vmatmul.bf16.vlgmr.msrb.gmra.mxu1 %v11267_v0  ;;  %v7161_v10 = vld [vmem:[#allocation5 + $0x2d8] sm:$0xf]  ;;  %v2882_v31 = vadd.f32 %v2881_v27, %v2869_v19  ;;  %v2909_v27 = vpop.f32.mrf.mxu2 }
 0x1a5   :  { %3171 = vmatpush.bf16.msra.mxu1 %v7034_v15  ;;  %3152 = vmatpush.bf16.msra.mxu2 %v8086_v28  ;;  %v10070_v11 = vld [vmem:[#allocation5 + $0x2f4] sm:$0xf0]  ;;  %v6906_v15 = vor.u32 %v10006_v9, %v6905_v22 }
 0x1a6   :  { %3140 = vmatmul.bf16.vlgmr.msra.gmra.mxu0 %v11279_v41  ;;  %v7417_v52 = vld [vmem:[#allocation5 + $0x4d8] sm:$0xf]  ;;  %v7162_v21 = vor.u32 %v10070_v11, %v7161_v10  ;;  %v11363_v43 = vadd.f32 %v11350_v26, %v2882_v31 }
 0x1a7   :  { %3197 = vmatpush.bf16.msrb.mxu0 %v7546_v30  ;;  %3185 = vmatpush.bf16.msra.mxu3 %v7258_v36  ;;  %v10134_v17 = vld [vmem:[#allocation5 + $0x4f4] sm:$0xf0]  ;;  %v2920_v25 = vpop.f32.mrf.mxu0  ;;  %v11357_v30 = vld [vmem:[#allocation7] sm:$0xff] }
 0x1a8   :  { %3153 = vmatmul.bf16.vlgmr.msra.gmra.mxu2 %v11281_v46  ;;  %v10198_v20 = vld [vmem:[#allocation5 + $0x6f4] sm:$0xf0]  ;;  %v7418_v32 = vor.u32 %v10134_v17, %v7417_v52  ;;  %vm3355_vm5 = vcmp.gt.f32.partialorder %v11363_v43, 0.0 }
 0x1a9   :  { %3210 = vmatpush.bf16.msrb.mxu2 %v7802_v34  ;;  %3172 = vmatpush.bf16.msra.mxu1 %v7002_v33  ;;  %v6873_v23 = vld [vmem:[#allocation5 + $0x98] sm:$0xf]  ;;  %v616_v34 = vperm.slane %v11357_v30, 3  ;;  %v2870_v33 = vpop.f32.mrf.mxu1  ;;  %v7674_v37 = vor.u32 %v10198_v20, %v7673_v18 }
 0x1aa   :  { %v9998_v24 = vld [vmem:[#allocation5 + $0xb4] sm:$0xf0] }
 0x1ab   :  { %3198 = vmatpush.bf16.msrb.mxu0 %v7514_v16  ;;  %3186 = vmatpush.bf16.msra.mxu3 %v7226_v50  ;;  %v7129_v28 = vld [vmem:[#allocation5 + $0x298] sm:$0xf]  ;;  %v6874_v38 = vor.u32 %v9998_v24, %v6873_v23  ;;  %v2908_v53 = vadd.f32 %v2907_v47, %v616_v34  ;;  %v2883_v9 = vpop.f32.mrf.mxu3  ;;  %v7003_v47 = vld [vmem:[#allocation5 + $0x1b8] sm:$0xf0] }
 0x1ac   :  { %v10062_v29 = vld [vmem:[#allocation5 + $0x2b4] sm:$0xf0]  ;;  %v7227_v9 = vld [vmem:[#allocation5 + $0x378] sm:$0xf0] }
 0x1ad   :  { %3211 = vmatpush.bf16.msrb.mxu2 %v7770_v44  ;;  %3173 = vmatpush.bf16.msra.mxu1 %v6970_v48  ;;  %v7385_v36 = vld [vmem:[#allocation5 + $0x498] sm:$0xf]  ;;  %v7130_v16 = vor.u32 %v10062_v29, %v7129_v28  ;;  %v7035_v29 = vld [vmem:[#allocation5 + $0x1f8] sm:$0xf0] }
 0x1ae   :  { %8324 = vmatmul.msk.bf16.vlgmr.msrb.gmra.mxu3 %vm2593_vm2, %v11275_v54  ;;  %v10126_v39 = vld [vmem:[#allocation5 + $0x4b4] sm:$0xf0] }
 0x1af   :  { %3199 = vmatpush.bf16.msrb.mxu0 %v7482_v63  ;;  %3187 = vmatpush.bf16.msra.mxu3 %v7194_v4  ;;  %v7641_v40 = vld [vmem:[#allocation5 + $0x698] sm:$0xf]  ;;  %v7386_v55 = vor.u32 %v10126_v39, %v7385_v36  ;;  %v11367_v63 = vadd.f32 %v2920_v25, %v2908_v53  ;;  %v2922_v7 = vpop.f32.mrf.mxu0  ;;  %v10034_v25 = vld [vmem:[#allocation5 + $0x1dc] sm:$0xf] }
 0x1b0   :  { %v10190_v42 = vld [vmem:[#allocation5 + $0x6b4] sm:$0xf0]  ;;  %v10098_v39 = vld [vmem:[#allocation5 + $0x3dc] sm:$0xf] }
 0x1b1   :  { %3212 = vmatpush.bf16.msrb.mxu2 %v7738_v1  ;;  %3174 = vmatpush.bf16.msra.mxu1 %v6938_v3  ;;  %v6841_v44 = vld [vmem:[#allocation5 + $0x58] sm:$0xf]  ;;  %v7642_v58 = vor.u32 %v10190_v42, %v7641_v40  ;;  %v7291_v40 = vld [vmem:[#allocation5 + $0x3f8] sm:$0xf0]  ;;  %v7038_v42 = vor.u32 %v10034_v25, %v7035_v29 }
 0x1b2   :  { %v9990_v45 = vld [vmem:[#allocation5 + $0x74] sm:$0xf0]  ;;  %v7294_v53 = vor.u32 %v10098_v39, %v7291_v40  ;;  %v7195_v25 = vld [vmem:[#allocation5 + $0x338] sm:$0xf0] }
 0x1b3   :  { %3200 = vmatpush.bf16.msrb.mxu0 %v7450_v12  ;;  %3188 = vmatpush.bf16.msra.mxu3 %v7162_v21  ;;  %v11365_v48 = vld [vmem:[#allocation5 + $0xc18] sm:$0x77]  ;;  %v6842_v59 = vor.u32 %v9990_v45, %v6841_v44 }
 0x1b4   :  { %v7097_v50 = vld [vmem:[#allocation5 + $0x258] sm:$0xf]  ;;  %v1815_v1 = vunpack.c.l.b16 %v11365_v48  ;;  %v10026_v44 = vld [vmem:[#allocation5 + $0x19c] sm:$0xf] }
 0x1b5   :  { %3213 = vmatpush.bf16.msrb.mxu2 %v7706_v14  ;;  %3175 = vmatpush.bf16.msra.mxu1 %v6906_v15  ;;  %v10054_v51 = vld [vmem:[#allocation5 + $0x274] sm:$0xf0] }
 0x1b6   :  { %v7353_v56 = vld [vmem:[#allocation5 + $0x458] sm:$0xf]  ;;  %v7098_v19 = vor.u32 %v10054_v51, %v7097_v50  ;;  %v2207_v18 = vpack.c.b16 %v1815_v1, %v1815_v1 }
 0x1b7   :  { %3201 = vmatpush.bf16.msrb.mxu0 %v7418_v32  ;;  %v10118_v60 = vld [vmem:[#allocation5 + $0x474] sm:$0xf0]  ;;  %3189 = vmatpush.bf16.msra.mxu3 %v7130_v16 }
 0x1b8   :  { %v7609_v26 = vld [vmem:[#allocation5 + $0x658] sm:$0xf]  ;;  %v7354_v10 = vor.u32 %v10118_v60, %v7353_v56  ;;  %v7006_v60 = vor.u32 %v10026_v44, %v7003_v47  ;;  %v7163_v44 = vld [vmem:[#allocation5 + $0x2f8] sm:$0xf0] }
 0x1b9   :  { %3214 = vmatpush.bf16.msrb.mxu2 %v7674_v37  ;;  %3176 = vmatpush.bf16.msra.mxu1 %v6874_v38  ;;  %v10182_v62 = vld [vmem:[#allocation5 + $0x674] sm:$0xf0]  ;;  %v2620_v38 = vand.u32 %v11260_v49, %v2207_v18 }
 0x1ba   :  { %v6809_v3 = vld [vmem:[#allocation5 + $0x18] sm:$0xf]  ;;  %v7610_v14 = vor.u32 %v10182_v62, %v7609_v26  ;;  %v10018_v62 = vld [vmem:[#allocation5 + $0x15c] sm:$0xf] }
 0x1bb   :  { %v9982_v4 = vld [vmem:[#allocation5 + $0x34] sm:$0xf0]  ;;  %3202 = vmatpush.bf16.msrb.mxu0 %v7386_v55  ;;  %3190 = vmatpush.bf16.msra.mxu3 %v7098_v19  ;;  %v6971_v19 = vld [vmem:[#allocation5 + $0x178] sm:$0xf0] }
 0x1bc   :  { %v7065_v5 = vld [vmem:[#allocation5 + $0x218] sm:$0xf]  ;;  %v6810_v15 = vor.u32 %v9982_v4, %v6809_v3 }
 0x1bd   :  { %v10046_v8 = vld [vmem:[#allocation5 + $0x234] sm:$0xf0]  ;;  %3215 = vmatpush.bf16.msrb.mxu2 %v7642_v58  ;;  %3177 = vmatpush.bf16.msra.mxu1 %v6842_v59  ;;  %v10090_v58 = vld [vmem:[#allocation5 + $0x39c] sm:$0xf] }
 0x1be   :  { %v8057_v35 = vld [vmem:[#allocation5 + $0x9d8] sm:$0xf]  ;;  %v7066_v21 = vor.u32 %v10046_v8, %v7065_v5  ;;  %v7259_v59 = vld [vmem:[#allocation5 + $0x3b8] sm:$0xf0] }
 0x1bf   :  { %v10294_v22 = vld [vmem:[#allocation5 + $0x9f4] sm:$0xf0]  ;;  %3203 = vmatpush.bf16.msrb.mxu0 %v7354_v10  ;;  %v7262_v5 = vor.u32 %v10090_v58, %v7259_v59 }
 0x1c0   :  { %v8313_v11 = vld [vmem:[#allocation5 + $0xbd8] sm:$0xf]  ;;  %v8058_v20 = vor.u32 %v10294_v22, %v8057_v35  ;;  %3191 = vmatpush.bf16.msra.mxu3 %v7066_v21  ;;  %v2933_v35 = vpop.f32.mrf.mxu1  ;;  %v10082_v22 = vld [vmem:[#allocation5 + $0x35c] sm:$0xf] }
 0x1c1   :  { %v10358_v12 = vld [vmem:[#allocation5 + $0xbf4] sm:$0xf0]  ;;  %3216 = vmatpush.bf16.msrb.mxu2 %v7610_v14  ;;  %3178 = vmatpush.bf16.msra.mxu1 %v6810_v15  ;;  %v2934_v10 = vadd.f32 %v2933_v35, %v11367_v63  ;;  %v10010_v14 = vld [vmem:[#allocation5 + $0x11c] sm:$0xf]  ;;  %v7230_v21 = vor.u32 %v10082_v22, %v7227_v9 }
 0x1c2   :  { %v7321_v52 = vld [vmem:[#allocation5 + $0x418] sm:$0xf]  ;;  %v8314_v28 = vor.u32 %v10358_v12, %v8313_v11  ;;  %v6974_v11 = vor.u32 %v10018_v62, %v6971_v19  ;;  %v10002_v63 = vld [vmem:[#allocation5 + $0xdc] sm:$0xf] }
 0x1c3   :  { %v10110_v17 = vld [vmem:[#allocation5 + $0x434] sm:$0xf0]  ;;  %3192 = vmatmul.bf16.vlgmr.msra.gmra.mxu3 %v11271_v13  ;;  %v10058_v19 = vld [vmem:[#allocation5 + $0x29c] sm:$0xf] }
 0x1c4   :  { %v7577_v23 = vld [vmem:[#allocation5 + $0x618] sm:$0xf]  ;;  %v7322_v32 = vor.u32 %v10110_v17, %v7321_v52  ;;  %3236 = vmatpush.bf16.msrb.mxu3 %v8314_v28  ;;  %3179 = vmatmul.bf16.vlgmr.msra.gmra.mxu1 %v11264_v61  ;;  %v6939_v52 = vld [vmem:[#allocation5 + $0x138] sm:$0xf0] }
 0x1c5   :  { %v10174_v24 = vld [vmem:[#allocation5 + $0x634] sm:$0xf0]  ;;  %3223 = vmatpush.bf16.msrb.mxu1 %v8058_v20  ;;  %v6942_v27 = vor.u32 %v10010_v14, %v6939_v52  ;;  %v10162_v14 = vld [vmem:[#allocation5 + $0x5dc] sm:$0xf] }
 0x1c6   :  { %v8025_v34 = vld [vmem:[#allocation5 + $0x998] sm:$0xf]  ;;  %v7578_v37 = vor.u32 %v10174_v24, %v7577_v23  ;;  %3204 = vmatpush.bf16.msrb.mxu0 %v7322_v32  ;;  %v10074_v24 = vld [vmem:[#allocation5 + $0x31c] sm:$0xf] }
 0x1c7   :  { %v10286_v31 = vld [vmem:[#allocation5 + $0x9b4] sm:$0xf0]  ;;  %v10226_v52 = vld [vmem:[#allocation5 + $0x7dc] sm:$0xf] }
 0x1c8   :  { %v8281_v33 = vld [vmem:[#allocation5 + $0xb98] sm:$0xf]  ;;  %v8026_v16 = vor.u32 %v10286_v31, %v8025_v34  ;;  %3217 = vmatpush.bf16.msrb.mxu2 %v7578_v37  ;;  %v6907_v34 = vld [vmem:[#allocation5 + $0xf8] sm:$0xf0]  ;;  %v2972_v37 = vpop.f32.mrf.mxu0 }
 0x1c9   :  { %v10350_v36 = vld [vmem:[#allocation5 + $0xbb4] sm:$0xf0]  ;;  %3205 = vmatmul.bf16.vlgmr.msrb.gmra.mxu0 %v11262_v57  ;;  %v6910_v47 = vor.u32 %v10002_v63, %v6907_v34  ;;  %v9978_v63 = vld [vmem:[#allocation5 + $0x1c] sm:$0xf] }
 0x1ca   :  { %v8282_v45 = vor.u32 %v10350_v36, %v8281_v33  ;;  %v7993_v50 = vld [vmem:[#allocation5 + $0x958] sm:$0xf]  ;;  %3256 = vmatpush.bf16.msra.mxu0 %v2620_v38  ;;  %3224 = vmatpush.bf16.msrb.mxu1 %v8026_v16  ;;  %v2946_v33 = vpop.f32.mrf.mxu3  ;;  %v7198_v36 = vor.u32 %v10074_v24, %v7195_v25  ;;  %v10066_v16 = vld [vmem:[#allocation5 + $0x2dc] sm:$0xf] }
 0x1cb   :  { %v10278_v51 = vld [vmem:[#allocation5 + $0x974] sm:$0xf0]  ;;  %3218 = vmatmul.bf16.vlgmr.msrb.gmra.mxu2 %v11267_v0  ;;  %v2947_v40 = vadd.f32 %v2946_v33, %v2934_v10  ;;  %v7099_v24 = vld [vmem:[#allocation5 + $0x278] sm:$0xf0] }
 0x1cc   :  { %v8249_v55 = vld [vmem:[#allocation5 + $0xb58] sm:$0xf]  ;;  %3262 = vmatpush.bf16.msra.mxu2 %v7038_v42  ;;  %v7994_v26 = vor.u32 %v10278_v51, %v7993_v50  ;;  %3237 = vmatpush.bf16.msrb.mxu3 %v8282_v45  ;;  %v2935_v42 = vpop.f32.mrf.mxu1  ;;  %v2959_v45 = vpop.f32.mrf.mxu2  ;;  %v9994_v51 = vld [vmem:[#allocation5 + $0x9c] sm:$0xf] }
 0x1cd   :  { %v10342_v56 = vld [vmem:[#allocation5 + $0xb74] sm:$0xf0]  ;;  %v10290_v33 = vld [vmem:[#allocation5 + $0x9dc] sm:$0xf] }
 0x1ce   :  { %v8250_v1 = vor.u32 %v10342_v56, %v8249_v55  ;;  %v7961_v3 = vld [vmem:[#allocation5 + $0x918] sm:$0xf]  ;;  %3275 = vmatpush.bf16.msrb.mxu0 %v7294_v53  ;;  %3225 = vmatpush.bf16.msrb.mxu1 %v7994_v26  ;;  %v2960_v53 = vadd.f32 %v2959_v45, %v2947_v40  ;;  %v6875_v56 = vld [vmem:[#allocation5 + $0xb8] sm:$0xf0] }
 0x1cf   :  { %v10270_v4 = vld [vmem:[#allocation5 + $0x934] sm:$0xf0]  ;;  %v7515_v40 = vld [vmem:[#allocation5 + $0x5b8] sm:$0xf0] }
 0x1d0   :  { %v8217_v7 = vld [vmem:[#allocation5 + $0xb18] sm:$0xf]  ;;  %3263 = vmatpush.bf16.msra.mxu2 %v7006_v60  ;;  %v7962_v12 = vor.u32 %v10270_v4, %v7961_v3  ;;  %3238 = vmatpush.bf16.msrb.mxu3 %v8250_v1  ;;  %v7166_v60 = vor.u32 %v10066_v16, %v7163_v44  ;;  %v2973_v1 = vadd.f32 %v2972_v37, %v2960_v53  ;;  %v7131_v3 = vld [vmem:[#allocation5 + $0x2b8] sm:$0xf0] }
 0x1d1   :  { %v10334_v8 = vld [vmem:[#allocation5 + $0xb34] sm:$0xf0]  ;;  %v6878_v4 = vor.u32 %v9994_v51, %v6875_v56  ;;  %v10218_v42 = vld [vmem:[#allocation5 + $0x79c] sm:$0xf] }
 0x1d2   :  { %v8218_v15 = vor.u32 %v10334_v8, %v8217_v7  ;;  %v7929_v17 = vld [vmem:[#allocation5 + $0x8d8] sm:$0xf]  ;;  %3276 = vmatpush.bf16.msrb.mxu0 %v7262_v5  ;;  %3226 = vmatpush.bf16.msrb.mxu1 %v7962_v12  ;;  %v9986_v7 = vld [vmem:[#allocation5 + $0x5c] sm:$0xf]  ;;  %v7134_v12 = vor.u32 %v10058_v19, %v7131_v3 }
 0x1d3   :  { %v10262_v18 = vld [vmem:[#allocation5 + $0x8f4] sm:$0xf0]  ;;  %v6843_v8 = vld [vmem:[#allocation5 + $0x78] sm:$0xf0] }
 0x1d4   :  { %v8185_v20 = vld [vmem:[#allocation5 + $0xad8] sm:$0xf]  ;;  %3264 = vmatpush.bf16.msra.mxu2 %v6974_v11  ;;  %v7930_v28 = vor.u32 %v10262_v18, %v7929_v17  ;;  %3239 = vmatpush.bf16.msrb.mxu3 %v8218_v15  ;;  %v7547_v15 = vld [vmem:[#allocation5 + $0x5f8] sm:$0xf0]  ;;  %v2948_v17 = vpop.f32.mrf.mxu3  ;;  %v2974_v18 = vpop.f32.mrf.mxu0 }
 0x1d5   :  { %v10326_v23 = vld [vmem:[#allocation5 + $0xaf4] sm:$0xf0]  ;;  %v7771_v16 = vld [vmem:[#allocation5 + $0x7b8] sm:$0xf0] }
 0x1d6   :  { %v8186_v29 = vor.u32 %v10326_v23, %v8185_v20  ;;  %v7897_v31 = vld [vmem:[#allocation5 + $0x898] sm:$0xf]  ;;  %3277 = vmatpush.bf16.msrb.mxu0 %v7230_v21  ;;  %3227 = vmatpush.bf16.msrb.mxu1 %v7930_v28  ;;  %v2985_v21 = vpop.f32.mrf.mxu1  ;;  %v7803_v20 = vld [vmem:[#allocation5 + $0x7f8] sm:$0xf0] }
 0x1d7   :  { %v10254_v32 = vld [vmem:[#allocation5 + $0x8b4] sm:$0xf0]  ;;  %v10050_v23 = vld [vmem:[#allocation5 + $0x25c] sm:$0xf]  ;;  %v11378_v25 = vadd.f32 %v2985_v21, %v2973_v1  ;;  %v7806_v37 = vor.u32 %v10226_v52, %v7803_v20 }
 0x1d8   :  { %v8153_v38 = vld [vmem:[#allocation5 + $0xa98] sm:$0xf]  ;;  %3265 = vmatpush.bf16.msra.mxu2 %v6942_v27  ;;  %v7898_v50 = vor.u32 %v10254_v32, %v7897_v31  ;;  %3240 = vmatpush.bf16.msrb.mxu3 %v8186_v29  ;;  %v6846_v27 = vor.u32 %v9986_v7, %v6843_v8  ;;  %v2961_v29 = vpop.f32.mrf.mxu2  ;;  %v7550_v31 = vor.u32 %v10162_v14, %v7547_v15  ;;  %v6811_v32 = vld [vmem:[#allocation5 + $0x38] sm:$0xf0] }
 0x1d9   :  { %v10318_v39 = vld [vmem:[#allocation5 + $0xab4] sm:$0xf0]  ;;  %8325 = vmatmul.msk.bf16.vlgmr.msra.gmra.mxu0 %vm2593_vm2, %v11275_v54  ;;  %v10042_v44 = vld [vmem:[#allocation5 + $0x21c] sm:$0xf]  ;;  %vm3356_vm6 = vcmp.gt.f32.partialorder %v11378_v25, 0.0 }
 0x1da   :  { %v8154_v55 = vor.u32 %v10318_v39, %v8153_v38  ;;  %v7865_v58 = vld [vmem:[#allocation5 + $0x858] sm:$0xf]  ;;  %3278 = vmatpush.bf16.msrb.mxu0 %v7198_v36  ;;  %3228 = vmatpush.bf16.msrb.mxu1 %v7898_v50  ;;  %v8059_v36 = vld [vmem:[#allocation5 + $0x9f8] sm:$0xf0]  ;;  %v7102_v38 = vor.u32 %v10050_v23, %v7099_v24 }
 0x1db   :  { %v10246_v59 = vld [vmem:[#allocation5 + $0x874] sm:$0xf0]  ;;  %v10154_v39 = vld [vmem:[#allocation5 + $0x59c] sm:$0xf]  ;;  %v8062_v53 = vor.u32 %v10290_v33, %v8059_v36 }
 0x1dc   :  { %v8121_v26 = vld [vmem:[#allocation5 + $0xa58] sm:$0xf]  ;;  %3266 = vmatpush.bf16.msra.mxu2 %v6910_v47  ;;  %v7866_v5 = vor.u32 %v10246_v59, %v7865_v58  ;;  %3241 = vmatpush.bf16.msrb.mxu3 %v8154_v55  ;;  %v7067_v45 = vld [vmem:[#allocation5 + $0x238] sm:$0xf0]  ;;  %v6814_v47 = vor.u32 %v9978_v63, %v6811_v32  ;;  %v7518_v55 = vor.u32 %v10154_v39, %v7515_v40 }
 0x1dd   :  { %v10310_v62 = vld [vmem:[#allocation5 + $0xa74] sm:$0xf0]  ;;  %v10354_v50 = vld [vmem:[#allocation5 + $0xbdc] sm:$0xf]  ;;  %v7774_v58 = vor.u32 %v10218_v42, %v7771_v16  ;;  %v7070_v59 = vor.u32 %v10042_v44, %v7067_v45 }
 0x1de   :  { %v7833_v35 = vld [vmem:[#allocation5 + $0x818] sm:$0xf]  ;;  %v8122_v22 = vor.u32 %v10310_v62, %v8121_v26  ;;  %3279 = vmatpush.bf16.msrb.mxu0 %v7166_v60  ;;  %3229 = vmatpush.bf16.msrb.mxu1 %v7866_v5  ;;  %v8315_v51 = vld [vmem:[#allocation5 + $0xbf8] sm:$0xf0] }
 0x1df   :  { %v10238_v9 = vld [vmem:[#allocation5 + $0x834] sm:$0xf0]  ;;  %v10282_v56 = vld [vmem:[#allocation5 + $0x99c] sm:$0xf]  ;;  %v8318_v1 = vor.u32 %v10354_v50, %v8315_v51  ;;  %v11388_v50 = vpop.f32.mrf.mxu3 }
 0x1e0   :  { %v8089_v10 = vld [vmem:[#allocation5 + $0xa18] sm:$0xf]  ;;  %3267 = vmatpush.bf16.msra.mxu2 %v6878_v4  ;;  %v7834_v28 = vor.u32 %v10238_v9, %v7833_v35  ;;  %3242 = vmatpush.bf16.msrb.mxu3 %v8122_v22  ;;  %v8027_v60 = vld [vmem:[#allocation5 + $0x9b8] sm:$0xf0]  ;;  %v2987_v4 = vpop.f32.mrf.mxu1 }
 0x1e1   :  { %v10302_v11 = vld [vmem:[#allocation5 + $0xa34] sm:$0xf0]  ;;  %v10146_v26 = vld [vmem:[#allocation5 + $0x55c] sm:$0xf]  ;;  %v8030_v8 = vor.u32 %v10282_v56, %v8027_v60 }
 0x1e2   :  { %v8090_v34 = vor.u32 %v10302_v11, %v8089_v10  ;;  %3280 = vmatpush.bf16.msrb.mxu0 %v7134_v12  ;;  %3230 = vmatpush.bf16.msrb.mxu1 %v7834_v28  ;;  %v7483_v62 = vld [vmem:[#allocation5 + $0x578] sm:$0xf0] }
 0x1e3   :  { %v10210_v19 = vld [vmem:[#allocation5 + $0x75c] sm:$0xf]  ;;  %v7486_v35 = vor.u32 %v10146_v26, %v7483_v62 }
 0x1e4   :  { %3268 = vmatpush.bf16.msra.mxu2 %v6846_v27  ;;  %3243 = vmatpush.bf16.msrb.mxu3 %v8090_v34  ;;  %v7739_v3 = vld [vmem:[#allocation5 + $0x778] sm:$0xf0] }
 0x1e5   :  { %3231 = vmatmul.bf16.vlgmr.msrb.gmra.mxu1 %v11279_v41  ;;  %v10346_v5 = vld [vmem:[#allocation5 + $0xb9c] sm:$0xf]  ;;  %v7742_v9 = vor.u32 %v10210_v19, %v7739_v3  ;;  %v1816_v19 = vunpack.c.h.b16 %v11365_v48 }
 0x1e6   :  { %3288 = vmatpush.bf16.msra.mxu1 %v7550_v31  ;;  %3281 = vmatpush.bf16.msrb.mxu0 %v7102_v38  ;;  %v8283_v7 = vld [vmem:[#allocation5 + $0xbb8] sm:$0xf0] }
 0x1e7   :  { %3244 = vmatmul.bf16.vlgmr.msrb.gmra.mxu3 %v11281_v46  ;;  %v10274_v22 = vld [vmem:[#allocation5 + $0x95c] sm:$0xf]  ;;  %v8286_v14 = vor.u32 %v10346_v5, %v8283_v7 }
 0x1e8   :  { %3301 = vmatpush.bf16.msra.mxu3 %v7806_v37  ;;  %3269 = vmatpush.bf16.msra.mxu2 %v6814_v47  ;;  %v7995_v10 = vld [vmem:[#allocation5 + $0x978] sm:$0xf0]  ;;  %v11384_v32 = vpop.f32.mrf.mxu1  ;;  %v11386_v47 = vpop.f32.mrf.mxu0 }
 0x1e9   :  { %v10138_v11 = vld [vmem:[#allocation5 + $0x51c] sm:$0xf]  ;;  %v7998_v21 = vor.u32 %v10274_v22, %v7995_v10 }
 0x1ea   :  { %3289 = vmatpush.bf16.msra.mxu1 %v7518_v55  ;;  %3282 = vmatpush.bf16.msrb.mxu0 %v7070_v59  ;;  %v7451_v12 = vld [vmem:[#allocation5 + $0x538] sm:$0xf0]  ;;  %v11390_v59 = vpop.f32.mrf.mxu2 }
 0x1eb   :  { %v10202_v15 = vld [vmem:[#allocation5 + $0x71c] sm:$0xf]  ;;  %3270 = vmatmul.bf16.vlgmr.msra.gmra.mxu2 %v11264_v61  ;;  %v7454_v20 = vor.u32 %v10138_v11, %v7451_v12 }
 0x1ec   :  { %3314 = vmatpush.bf16.msrb.mxu2 %v8062_v53  ;;  %3302 = vmatpush.bf16.msra.mxu3 %v7774_v58  ;;  %v7707_v52 = vld [vmem:[#allocation5 + $0x738] sm:$0xf0] }
 0x1ed   :  { %v10338_v17 = vld [vmem:[#allocation5 + $0xb5c] sm:$0xf]  ;;  %v7710_v24 = vor.u32 %v10202_v15, %v7707_v52  ;;  %3283 = vmatmul.bf16.vlgmr.msrb.gmra.mxu0 %v11271_v13  ;;  %v2208_v52 = vpack.c.b16 %v1816_v19, %v1816_v19  ;;  %v8681_v19 = vld [vmem:[#allocation8 + $0x2c0] sm:$0xf] }
 0x1ee   :  { %3327 = vmatpush.bf16.msra.mxu0 %v8318_v1  ;;  %v8251_v18 = vld [vmem:[#allocation5 + $0xb78] sm:$0xf0]  ;;  %3290 = vmatpush.bf16.msra.mxu1 %v7486_v35 }
 0x1ef   :  { %v10266_v23 = vld [vmem:[#allocation5 + $0x91c] sm:$0xf]  ;;  %v8254_v29 = vor.u32 %v10338_v17, %v8251_v18 }
 0x1f0   :  { %3315 = vmatpush.bf16.msrb.mxu2 %v8030_v8  ;;  %3303 = vmatpush.bf16.msra.mxu3 %v7742_v9  ;;  %v7963_v27 = vld [vmem:[#allocation5 + $0x938] sm:$0xf0]  ;;  %v3013_v7 = vpop.f32.mrf.mxu1 }
 0x1f1   :  { %v10130_v28 = vld [vmem:[#allocation5 + $0x4dc] sm:$0xf]  ;;  %v7966_v36 = vor.u32 %v10266_v23, %v7963_v27  ;;  %v10389_v23 = vld [vmem:[#allocation8 + $0xec] sm:$0xf0] }
 0x1f2   :  { %v7419_v63 = vld [vmem:[#allocation5 + $0x4f8] sm:$0xf0]  ;;  %3328 = vmatpush.bf16.msra.mxu0 %v8286_v14  ;;  %3291 = vmatpush.bf16.msra.mxu1 %v7454_v20  ;;  %v3039_v20 = vpop.f32.mrf.mxu0  ;;  %v10381_v7 = vld [vmem:[#allocation8 + $0xac] sm:$0xf0] }
 0x1f3   :  { %v10194_v34 = vld [vmem:[#allocation5 + $0x6dc] sm:$0xf]  ;;  %v7422_v37 = vor.u32 %v10130_v28, %v7419_v63  ;;  %v3000_v28 = vpop.f32.mrf.mxu3 }
 0x1f4   :  { %v7675_v31 = vld [vmem:[#allocation5 + $0x6f8] sm:$0xf0]  ;;  %3316 = vmatpush.bf16.msrb.mxu2 %v7998_v21  ;;  %3304 = vmatpush.bf16.msra.mxu3 %v7710_v24  ;;  %v8441_v21 = vld [vmem:[#allocation8 + $0xe0] sm:$0xf] }
 0x1f5   :  { %v10330_v61 = vld [vmem:[#allocation5 + $0xb1c] sm:$0xf]  ;;  %v7678_v39 = vor.u32 %v10194_v34, %v7675_v31  ;;  %v3026_v31 = vpop.f32.mrf.mxu2  ;;  %v8649_v28 = vld [vmem:[#allocation8 + $0x280] sm:$0xf] }
 0x1f6   :  { %v8219_v33 = vld [vmem:[#allocation5 + $0xb38] sm:$0xf0]  ;;  %3329 = vmatpush.bf16.msra.mxu0 %v8254_v29  ;;  %3292 = vmatpush.bf16.msra.mxu1 %v7422_v37  ;;  %v8569_v37 = vld [vmem:[#allocation8 + $0x1e0] sm:$0xf] }
 0x1f7   :  { %v10258_v38 = vld [vmem:[#allocation5 + $0x8dc] sm:$0xf]  ;;  %v8222_v13 = vor.u32 %v10330_v61, %v8219_v33  ;;  %v8777_v31 = vld [vmem:[#allocation8 + $0x380] sm:$0xf] }
 0x1f8   :  { %v7931_v40 = vld [vmem:[#allocation5 + $0x8f8] sm:$0xf0]  ;;  %3317 = vmatpush.bf16.msrb.mxu2 %v7966_v36  ;;  %3305 = vmatpush.bf16.msra.mxu3 %v7678_v39  ;;  %v2623_v36 = vand.u32 %v11260_v49, %v2208_v52  ;;  %v8442_v39 = vor.u32 %v10389_v23, %v8441_v21  ;;  %v8393_v52 = vld [vmem:[#allocation8 + $0x80] sm:$0xf] }
 0x1f9   :  { %v10122_v42 = vld [vmem:[#allocation5 + $0x49c] sm:$0xf]  ;;  %v7934_v55 = vor.u32 %v10258_v38, %v7931_v40  ;;  %v10421_v38 = vld [vmem:[#allocation8 + $0x1ec] sm:$0xf0]  ;;  %v8521_v23 = vld [vmem:[#allocation8 + $0x180] sm:$0xf] }
 0x1fa   :  { %v7387_v16 = vld [vmem:[#allocation5 + $0x4b8] sm:$0xf0]  ;;  %3330 = vmatpush.bf16.msra.mxu0 %v8222_v13  ;;  %v8425_v13 = vld [vmem:[#allocation8 + $0xc0] sm:$0xf] }
 0x1fb   :  { %v10186_v44 = vld [vmem:[#allocation5 + $0x69c] sm:$0xf]  ;;  %v7390_v56 = vor.u32 %v10122_v42, %v7387_v16  ;;  %v8697_v42 = vld [vmem:[#allocation8 + $0x2e0] sm:$0xf]  ;;  %v10453_v16 = vld [vmem:[#allocation8 + $0x2ec] sm:$0xf0] }
 0x1fc   :  { %v7643_v45 = vld [vmem:[#allocation5 + $0x6b8] sm:$0xf0]  ;;  %3318 = vmatpush.bf16.msrb.mxu2 %v7934_v55  ;;  %v8825_v55 = vld [vmem:[#allocation8 + $0x3e0] sm:$0xf]  ;;  %v8698_v49 = vor.u32 %v10453_v16, %v8697_v42  ;;  %v10437_v42 = vld [vmem:[#allocation8 + $0x26c] sm:$0xf0]  ;;  %v11400_v16 = vpop.f32.mrf.mxu3 }
 0x1fd   :  { %v10322_v51 = vld [vmem:[#allocation5 + $0xadc] sm:$0xf]  ;;  %v7646_v60 = vor.u32 %v10186_v44, %v7643_v45  ;;  %3293 = vmatpush.bf16.msra.mxu1 %v7390_v56  ;;  %v10385_v44 = vld [vmem:[#allocation8 + $0xcc] sm:$0xf0] }
 0x1fe   :  { %v8187_v53 = vld [vmem:[#allocation5 + $0xaf8] sm:$0xf0]  ;;  %v10485_v56 = vld [vmem:[#allocation8 + $0x3ec] sm:$0xf0] }
 0x1ff   :  { %v10250_v58 = vld [vmem:[#allocation5 + $0x89c] sm:$0xf]  ;;  %v8190_v3 = vor.u32 %v10322_v51, %v8187_v53  ;;  %3306 = vmatpush.bf16.msra.mxu3 %v7646_v60  ;;  %v8553_v60 = vld [vmem:[#allocation8 + $0x1c0] sm:$0xf] }
 0x200   :  { %v7899_v26 = vld [vmem:[#allocation5 + $0x8b8] sm:$0xf0] }
 0x201   :  { %v10114_v62 = vld [vmem:[#allocation5 + $0x45c] sm:$0xf]  ;;  %v7902_v22 = vor.u32 %v10250_v58, %v7899_v26  ;;  %3331 = vmatpush.bf16.msra.mxu0 %v8190_v3  ;;  %v8570_v58 = vor.u32 %v10421_v38, %v8569_v37  ;;  %v8426_v26 = vor.u32 %v10385_v44, %v8425_v13  ;;  %v10449_v3 = vld [vmem:[#allocation8 + $0x2cc] sm:$0xf0]  ;;  %v8505_v37 = vld [vmem:[#allocation8 + $0x160] sm:$0xf]  ;;  %v11402_v13 = vpop.f32.mrf.mxu1 }
 0x202   :  { %v7355_v1 = vld [vmem:[#allocation5 + $0x478] sm:$0xf0] }
 0x203   :  { %v10178_v4 = vld [vmem:[#allocation5 + $0x65c] sm:$0xf]  ;;  %v7358_v9 = vor.u32 %v10114_v62, %v7355_v1  ;;  %3319 = vmatpush.bf16.msrb.mxu2 %v7902_v22  ;;  %v10417_v1 = vld [vmem:[#allocation8 + $0x1cc] sm:$0xf0] }
 0x204   :  { %v7611_v5 = vld [vmem:[#allocation5 + $0x678] sm:$0xf0]  ;;  %v8554_v22 = vor.u32 %v10417_v1, %v8553_v60  ;;  %v8489_v60 = vld [vmem:[#allocation8 + $0x140] sm:$0xf] }
 0x205   :  { %v10314_v8 = vld [vmem:[#allocation5 + $0xa9c] sm:$0xf]  ;;  %v7614_v11 = vor.u32 %v10178_v4, %v7611_v5  ;;  %3294 = vmatpush.bf16.msra.mxu1 %v7358_v9  ;;  %v8826_v4 = vor.u32 %v10485_v56, %v8825_v55  ;;  %v8409_v5 = vld [vmem:[#allocation8 + $0xa0] sm:$0xf]  ;;  %v8682_v9 = vor.u32 %v10449_v3, %v8681_v19  ;;  %v10469_v55 = vld [vmem:[#allocation8 + $0x36c] sm:$0xf0]  ;;  %v11404_v56 = vpop.f32.mrf.mxu0 }
 0x206   :  { %v8155_v35 = vld [vmem:[#allocation5 + $0xab8] sm:$0xf0]  ;;  %v8617_v1 = vld [vmem:[#allocation8 + $0x240] sm:$0xf]  ;;  %v10433_v19 = vld [vmem:[#allocation8 + $0x24c] sm:$0xf0] }
 0x207   :  { %v10242_v10 = vld [vmem:[#allocation5 + $0x85c] sm:$0xf]  ;;  %v8158_v48 = vor.u32 %v10314_v8, %v8155_v35  ;;  %3307 = vmatpush.bf16.msra.mxu3 %v7614_v11  ;;  %v8809_v8 = vld [vmem:[#allocation8 + $0x3c0] sm:$0xf]  ;;  %v10481_v35 = vld [vmem:[#allocation8 + $0x3cc] sm:$0xf0]  ;;  %v11396_v11 = vpop.f32.mrf.mxu2 }
 0x208   :  { %v7867_v12 = vld [vmem:[#allocation5 + $0x878] sm:$0xf0]  ;;  %v3361_v3 = vmul.f32 0.01, %v11321_v2 }
 0x209   :  { %v10106_v14 = vld [vmem:[#allocation5 + $0x41c] sm:$0xf]  ;;  %v7870_v63 = vor.u32 %v10242_v10, %v7867_v12  ;;  %3332 = vmatpush.bf16.msra.mxu0 %v8158_v48  ;;  %v8537_v10 = vld [vmem:[#allocation8 + $0x1a0] sm:$0xf]  ;;  %v8410_v12 = vor.u32 %v10381_v7, %v8409_v5  ;;  %v10377_v48 = vld [vmem:[#allocation8 + $0x8c] sm:$0xf0] }
 0x20a   :  { %v7323_v15 = vld [vmem:[#allocation5 + $0x438] sm:$0xf0]  ;;  %v8345_v5 = vld [vmem:[#allocation8 + $0x20] sm:$0xf]  ;;  %v10365_v7 = vld [vmem:[#allocation8 + $0x2c] sm:$0xf0] }
 0x20b   :  { %v10170_v17 = vld [vmem:[#allocation5 + $0x61c] sm:$0xf]  ;;  %v7326_v29 = vor.u32 %v10106_v14, %v7323_v15  ;;  %3320 = vmatpush.bf16.msrb.mxu2 %v7870_v63  ;;  %v10413_v14 = vld [vmem:[#allocation8 + $0x1ac] sm:$0xf0] }
 0x20c   :  { %v7579_v18 = vld [vmem:[#allocation5 + $0x638] sm:$0xf0]  ;;  %v10445_v15 = vld [vmem:[#allocation8 + $0x2ac] sm:$0xf0]  ;;  %v8538_v21 = vor.u32 %v10413_v14, %v8537_v10  ;;  %v8346_v14 = vor.u32 %v10365_v7, %v8345_v5 }
 0x20d   :  { %v10306_v24 = vld [vmem:[#allocation5 + $0xa5c] sm:$0xf]  ;;  %v7582_v61 = vor.u32 %v10170_v17, %v7579_v18  ;;  %3295 = vmatpush.bf16.msra.mxu1 %v7326_v29  ;;  %v8793_v17 = vld [vmem:[#allocation8 + $0x3a0] sm:$0xf]  ;;  %v10477_v18 = vld [vmem:[#allocation8 + $0x3ac] sm:$0xf0] }
 0x20e   :  { %v8123_v27 = vld [vmem:[#allocation5 + $0xa78] sm:$0xf0]  ;;  %v10441_v63 = vld [vmem:[#allocation8 + $0x28c] sm:$0xf0]  ;;  %v8377_v29 = vld [vmem:[#allocation8 + $0x60] sm:$0xf] }
 0x20f   :  { %v10234_v34 = vld [vmem:[#allocation5 + $0x81c] sm:$0xf]  ;;  %v8126_v40 = vor.u32 %v10306_v24, %v8123_v27  ;;  %3308 = vmatpush.bf16.msra.mxu3 %v7582_v61  ;;  %v8394_v24 = vor.u32 %v10377_v48, %v8393_v52  ;;  %v10409_v27 = vld [vmem:[#allocation8 + $0x18c] sm:$0xf0]  ;;  %v3078_v38 = vpop.f32.mrf.mxu2 }
 0x210   :  { %v7835_v33 = vld [vmem:[#allocation5 + $0x838] sm:$0xf0]  ;;  %3296 = vmatmul.bf16.vlgmr.msra.gmra.mxu1 %v11262_v57  ;;  %v8665_v57 = vld [vmem:[#allocation8 + $0x2a0] sm:$0xf]  ;;  %v10473_v61 = vld [vmem:[#allocation8 + $0x38c] sm:$0xf0]  ;;  %v3369_v38 = vsel %vm3353_vm3, %v11321_v2, %v3361_v3 }
 0x211   :  { %v10298_v45 = vld [vmem:[#allocation5 + $0xa1c] sm:$0xf]  ;;  %v7838_v53 = vor.u32 %v10234_v34, %v7835_v33  ;;  %3347 = vmatpush.bf16.msrb.mxu1 %v2623_v36  ;;  %3333 = vmatpush.bf16.msra.mxu0 %v8126_v40  ;;  %v8666_v20 = vor.u32 %v10445_v15, %v8665_v57  ;;  %v10373_v34 = vld [vmem:[#allocation8 + $0x6c] sm:$0xf0]  ;;  %v8522_v33 = vor.u32 %v10409_v27, %v8521_v23  ;;  %v8633_v40 = vld [vmem:[#allocation8 + $0x260] sm:$0xf]  ;;  %v3065_v23 = vpop.f32.mrf.mxu1 }
 0x212   :  { %v8091_v51 = vld [vmem:[#allocation5 + $0xa38] sm:$0xf0]  ;;  %3309 = vmatmul.bf16.vlgmr.msra.gmra.mxu3 %v11267_v0  ;;  %v8810_v0 = vor.u32 %v10481_v35, %v8809_v8  ;;  %v8650_v36 = vor.u32 %v10441_v63, %v8649_v28  ;;  %v8778_v44 = vor.u32 %v10473_v61, %v8777_v31  ;;  %v11412_v8 = vmul.f32 0.01, %v11339_v6  ;;  %v8745_v35 = vld [vmem:[#allocation8 + $0x340] sm:$0xf]  ;;  %v3091_v28 = vpop.f32.mrf.mxu0 }
 0x213   :  { %4931 = vmatpush.bf16.msrb.mxu3 %v8442_v39  ;;  %v8094_v62 = vor.u32 %v10298_v45, %v8091_v51  ;;  %3321 = vmatpush.bf16.msrb.mxu2 %v7838_v53  ;;  %v8378_v39 = vor.u32 %v10373_v34, %v8377_v29  ;;  %v8361_v45 = vld [vmem:[#allocation8 + $0x40] sm:$0xf]  ;;  %v10369_v51 = vld [vmem:[#allocation8 + $0x4c] sm:$0xf0]  ;;  %v3363_v63 = vmul.f32 0.01, %v11363_v43 }
 0x214   :  { %v8761_v53 = vld [vmem:[#allocation8 + $0x360] sm:$0xf]  ;;  %v10397_v57 = vld [vmem:[#allocation8 + $0x12c] sm:$0xf0]  ;;  %vm6532_vm3 = vcmask 523264  }
 0x215   :  { %4944 = vmatpush.bf16.msra.mxu1 %v8570_v58  ;;  %3334 = vmatpush.bf16.msra.mxu0 %v8094_v62  ;;  %v10401_v62 = vld [vmem:[#allocation8 + $0x14c] sm:$0xf0]  ;;  %v8601_v15 = vld [vmem:[#allocation8 + $0x220] sm:$0xf]  ;;  %v3371_v7 = vsel %vm3355_vm5, %v11363_v43, %v3363_v63 }
 0x216   :  { %3322 = vmatmul.bf16.vlgmr.msrb.gmra.mxu2 %v11279_v41  ;;  %v8794_v41 = vor.u32 %v10477_v18, %v8793_v17  ;;  %v8490_v10 = vor.u32 %v10401_v62, %v8489_v60  ;;  %v8329_v17 = vld [vmem:[#allocation8] sm:$0xf]  ;;  %v10361_v18 = vld [vmem:[#allocation8 + $0xc] sm:$0xf0]  ;;  %v11442_v43 = vpack.c.bf16 %v3371_v7, %v3371_v7 }
 0x217   :  { %4957 = vmatpush.bf16.msra.mxu2 %v8698_v49  ;;  %4932 = vmatpush.bf16.msrb.mxu3 %v8426_v26  ;;  %v8634_v49 = vor.u32 %v10437_v42, %v8633_v40  ;;  %v8362_v26 = vor.u32 %v10369_v51, %v8361_v45  ;;  %v11416_v52 = vpop.f32.mrf.mxu2  ;;  %v10461_v27 = vld [vmem:[#allocation8 + $0x32c] sm:$0xf0]  ;;  %v8457_v31 = vld [vmem:[#allocation8 + $0x100] sm:$0xf]  ;;  %v8330_v61 = vor.u32 %v10361_v18, %v8329_v17 }
 0x218   :  { %3335 = vmatmul.bf16.vlgmr.msra.gmra.mxu0 %v11281_v46  ;;  %v10405_v46 = vld [vmem:[#allocation8 + $0x16c] sm:$0xf0]  ;;  %v9081_v40 = vld [vmem:[#allocation8 + $0x5e0] sm:$0xf] }
 0x219   :  { %4970 = vmatpush.bf16.msrb.mxu0 %v8826_v4  ;;  %4945 = vmatpush.bf16.msra.mxu1 %v8554_v22  ;;  %v8506_v58 = vor.u32 %v10405_v46, %v8505_v37  ;;  %v8762_v4 = vor.u32 %v10469_v55, %v8761_v53  ;;  %v10465_v22 = vld [vmem:[#allocation8 + $0x34c] sm:$0xf0]  ;;  %v8713_v45 = vld [vmem:[#allocation8 + $0x300] sm:$0xf]  ;;  %v3364_v53 = vmul.f32 0.01, %v11378_v25 }
 0x21a   :  { %v8746_v48 = vor.u32 %v10465_v22, %v8745_v35  ;;  %v10425_v37 = vld [vmem:[#allocation8 + $0x20c] sm:$0xf0]  ;;  %v8921_v35 = vld [vmem:[#allocation8 + $0x4a0] sm:$0xf] }
 0x21b   :  { %4958 = vmatpush.bf16.msra.mxu2 %v8682_v9  ;;  %4933 = vmatpush.bf16.msrb.mxu3 %v8410_v12  ;;  %v617_v9 = vperm.slane %v11357_v30, 4  ;;  %v8618_v12 = vor.u32 %v10433_v19, %v8617_v1  ;;  %v10517_v30 = vld [vmem:[#allocation8 + $0x4ec] sm:$0xf0]  ;;  %v3370_v19 = vsel %vm3354_vm4, %v11339_v6, %v11412_v8  ;;  %v9193_v6 = vld [vmem:[#allocation8 + $0x6c0] sm:$0xf] }
 0x21c   :  { %v10549_v42 = vld [vmem:[#allocation8 + $0x5ec] sm:$0xf0]  ;;  %v8905_v17 = vld [vmem:[#allocation8 + $0x480] sm:$0xf] }
 0x21d   :  { %4971 = vmatpush.bf16.msrb.mxu0 %v8810_v0  ;;  %4946 = vmatpush.bf16.msra.mxu1 %v8538_v21  ;;  %v10429_v0 = vld [vmem:[#allocation8 + $0x22c] sm:$0xf0]  ;;  %v8953_v21 = vld [vmem:[#allocation8 + $0x4e0] sm:$0xf]  ;;  %v9082_v62 = vor.u32 %v10549_v42, %v9081_v40 }
 0x21e   :  { %v8602_v34 = vor.u32 %v10429_v0, %v8601_v15  ;;  %v10457_v51 = vld [vmem:[#allocation8 + $0x30c] sm:$0xf0]  ;;  %v9177_v23 = vld [vmem:[#allocation8 + $0x6a0] sm:$0xf] }
 0x21f   :  { %4959 = vmatpush.bf16.msra.mxu2 %v8666_v20  ;;  %4934 = vmatpush.bf16.msrb.mxu3 %v8394_v24  ;;  %v3052_v20 = vpop.f32.mrf.mxu3  ;;  %v8729_v24 = vld [vmem:[#allocation8 + $0x320] sm:$0xf]  ;;  %v10581_v60 = vld [vmem:[#allocation8 + $0x6ec] sm:$0xf0]  ;;  %v3104_v1 = vpop.f32.mrf.mxu2  ;;  %v8714_v3 = vor.u32 %v10457_v51, %v8713_v45 }
 0x220   :  { %8326 = vmatmul.msk.bf16.vlgmr.msrb.gmra.mxu1 %vm2593_vm2, %v11275_v54  ;;  %v8473_v54 = vld [vmem:[#allocation8 + $0x120] sm:$0xf]  ;;  %v8730_v46 = vor.u32 %v10461_v27, %v8729_v24  ;;  %v10545_v5 = vld [vmem:[#allocation8 + $0x5cc] sm:$0xf0] }
 0x221   :  { %4972 = vmatpush.bf16.msrb.mxu0 %v8794_v41  ;;  %4947 = vmatpush.bf16.msra.mxu1 %v8522_v33  ;;  %v2999_v41 = vadd.f32 %v11388_v50, %v617_v9  ;;  %v8474_v29 = vor.u32 %v10397_v57, %v8473_v54  ;;  %v10393_v33 = vld [vmem:[#allocation8 + $0x10c] sm:$0xf0]  ;;  %v8937_v50 = vld [vmem:[#allocation8 + $0x4c0] sm:$0xf]  ;;  %v11440_v54 = vpack.c.bf16 %v3370_v19, %v3370_v19  ;;  %v11444_v57 = vld [vmem:[#allocation7] sm:$0xff] }
 0x222   :  { %v10509_v22 = vld [vmem:[#allocation8 + $0x4ac] sm:$0xf0]  ;;  %v8873_v40 = vld [vmem:[#allocation8 + $0x440] sm:$0xf] }
 0x223   :  { %4960 = vmatpush.bf16.msra.mxu2 %v8650_v36  ;;  %4935 = vmatpush.bf16.msrb.mxu3 %v8378_v39  ;;  %v8585_v36 = vld [vmem:[#allocation8 + $0x200] sm:$0xf]  ;;  %v8954_v39 = vor.u32 %v10517_v30, %v8953_v21  ;;  %v3012_v55 = vadd.f32 %v11384_v32, %v2999_v41  ;;  %v10577_v8 = vld [vmem:[#allocation8 + $0x6cc] sm:$0xf0]  ;;  %v8922_v15 = vor.u32 %v10509_v22, %v8921_v35  ;;  %v3141_v45 = vpop.f32.mrf.mxu0 }
 0x224   :  { %v8586_v2 = vor.u32 %v10425_v37, %v8585_v36  ;;  %v10541_v0 = vld [vmem:[#allocation8 + $0x5ac] sm:$0xf0]  ;;  %v9194_v21 = vor.u32 %v10577_v8, %v9193_v6  ;;  %v9033_v41 = vld [vmem:[#allocation8 + $0x580] sm:$0xf]  ;;  %v10387_v6 = vld [vmem:[#allocation8 + $0xe4] sm:$0xf] }
 0x225   :  { %4973 = vmatpush.bf16.msrb.mxu0 %v8778_v44  ;;  %4948 = vmatpush.bf16.msra.mxu1 %v8506_v58  ;;  %v10513_v44 = vld [vmem:[#allocation8 + $0x4cc] sm:$0xf0]  ;;  %v8458_v58 = vor.u32 %v10393_v33, %v8457_v31  ;;  %v9145_v51 = vld [vmem:[#allocation8 + $0x660] sm:$0xf] }
 0x226   :  { %v8938_v32 = vor.u32 %v10513_v44, %v8937_v50  ;;  %v10505_v18 = vld [vmem:[#allocation8 + $0x48c] sm:$0xf0]  ;;  %v3128_v50 = vpop.f32.mrf.mxu1  ;;  %v9129_v19 = vld [vmem:[#allocation8 + $0x640] sm:$0xf] }
 0x227   :  { %4961 = vmatpush.bf16.msra.mxu2 %v8634_v49  ;;  %4936 = vmatpush.bf16.msrb.mxu3 %v8362_v26  ;;  %v9209_v49 = vld [vmem:[#allocation8 + $0x6e0] sm:$0xf]  ;;  %v11425_v26 = vpack.c.bf16 %v3369_v38, %v3369_v38  ;;  %v10573_v30 = vld [vmem:[#allocation8 + $0x6ac] sm:$0xf0]  ;;  %v8906_v63 = vor.u32 %v10505_v18, %v8905_v17 }
 0x228   :  { %v9210_v9 = vor.u32 %v10581_v60, %v9209_v49  ;;  %v10501_v31 = vld [vmem:[#allocation8 + $0x46c] sm:$0xf0]  ;;  %v9001_v49 = vld [vmem:[#allocation8 + $0x540] sm:$0xf] }
 0x229   :  { %4974 = vmatpush.bf16.msrb.mxu0 %v8762_v4  ;;  %4949 = vmatpush.bf16.msra.mxu1 %v8490_v10  ;;  %v9065_v4 = vld [vmem:[#allocation8 + $0x5c0] sm:$0xf]  ;;  %v3372_v10 = vsel %vm3356_vm6, %v11378_v25, %v3364_v53  ;;  %v618_v25 = vperm.slane %v11444_v57, 5  ;;  %v10569_v33 = vld [vmem:[#allocation8 + $0x68c] sm:$0xf0] }
 0x22a   :  { %v10497_v42 = vld [vmem:[#allocation8 + $0x44c] sm:$0xf0]  ;;  %v8985_v22 = vld [vmem:[#allocation8 + $0x520] sm:$0xf] }
 0x22b   :  { %4962 = vmatpush.bf16.msra.mxu2 %v8618_v12  ;;  %4937 = vmatpush.bf16.msrb.mxu3 %v8346_v14  ;;  %v3025_v12 = vadd.f32 %v11390_v59, %v3012_v55  ;;  %v9066_v14 = vor.u32 %v10545_v5, %v9065_v4  ;;  %v9049_v59 = vld [vmem:[#allocation8 + $0x5a0] sm:$0xf]  ;;  %v3090_v28 = vadd.f32 %v11404_v56, %v618_v25  ;;  %v10533_v56 = vld [vmem:[#allocation8 + $0x56c] sm:$0xf0]  ;;  %v3154_v4 = vpop.f32.mrf.mxu2  ;;  %v8443_v25 = vld [vmem:[#allocation8 + $0xf0] sm:$0xf0] }
 0x22c   :  { %v9050_v24 = vor.u32 %v10541_v0, %v9049_v59  ;;  %v10565_v53 = vld [vmem:[#allocation8 + $0x66c] sm:$0xf0]  ;;  %v9113_v59 = vld [vmem:[#allocation8 + $0x620] sm:$0xf] }
 0x22d   :  { %4975 = vmatpush.bf16.msrb.mxu0 %v8746_v48  ;;  %4950 = vmatpush.bf16.msra.mxu1 %v8474_v29  ;;  %v11447_v48 = vpack.c.bf16 %v3372_v10, %v3372_v10  ;;  %v3038_v20 = vadd.f32 %v11386_v47, %v3025_v12  ;;  %v10537_v29 = vld [vmem:[#allocation8 + $0x58c] sm:$0xf0]  ;;  %v9178_v47 = vor.u32 %v10573_v30, %v9177_v23  ;;  %v8841_v10 = vld [vmem:[#allocation8 + $0x400] sm:$0xf] }
 0x22e   :  { %v9034_v36 = vor.u32 %v10537_v29, %v9033_v41  ;;  %v3103_v38 = vadd.f32 %v11416_v52, %v3090_v28  ;;  %v8874_v52 = vor.u32 %v10497_v42, %v8873_v40  ;;  %v10529_v60 = vld [vmem:[#allocation8 + $0x54c] sm:$0xf0]  ;;  %v9146_v1 = vor.u32 %v10565_v53, %v9145_v51  ;;  %v3130_v8 = vpop.f32.mrf.mxu1  ;;  %v10383_v28 = vld [vmem:[#allocation8 + $0xc4] sm:$0xf]  ;;  %v8427_v29 = vld [vmem:[#allocation8 + $0xd0] sm:$0xf0] }
 0x22f   :  { %4963 = vmatpush.bf16.msra.mxu2 %v8602_v34  ;;  %4938 = vmatpush.bf16.msrb.mxu3 %v8330_v61  ;;  %v3051_v27 = vadd.f32 %v11400_v16, %v3038_v20  ;;  %v8889_v34 = vld [vmem:[#allocation8 + $0x460] sm:$0xf]  ;;  %v10489_v12 = vld [vmem:[#allocation8 + $0x40c] sm:$0xf0]  ;;  %v8446_v30 = vor.u32 %v10387_v6, %v8443_v25  ;;  %v8555_v40 = vld [vmem:[#allocation8 + $0x1d0] sm:$0xf0] }
 0x230   :  { %v9161_v61 = vld [vmem:[#allocation8 + $0x680] sm:$0xf]  ;;  %v8890_v16 = vor.u32 %v10501_v31, %v8889_v34  ;;  %v10557_v0 = vld [vmem:[#allocation8 + $0x62c] sm:$0xf0]  ;;  %v10379_v42 = vld [vmem:[#allocation8 + $0xa4] sm:$0xf] }
 0x231   :  { %4976 = vmatpush.bf16.msrb.mxu0 %v8730_v46  ;;  %4951 = vmatpush.bf16.msra.mxu1 %v8458_v58  ;;  %v3064_v37 = vadd.f32 %v11402_v13, %v3051_v27  ;;  %v3115_v46 = vpop.f32.mrf.mxu3  ;;  %v9162_v44 = vor.u32 %v10569_v33, %v9161_v61  ;;  %v8969_v20 = vld [vmem:[#allocation8 + $0x500] sm:$0xf]  ;;  %v10521_v23 = vld [vmem:[#allocation8 + $0x50c] sm:$0xf0]  ;;  %v8571_v27 = vld [vmem:[#allocation8 + $0x1f0] sm:$0xf0] }
 0x232   :  { %4939 = vmatmul.bf16.vlgmr.msrb.gmra.mxu3 %v11425_v26  ;;  %v3116_v13 = vadd.f32 %v3115_v46, %v3103_v38  ;;  %v9097_v34 = vld [vmem:[#allocation8 + $0x600] sm:$0xf]  ;;  %v10553_v31 = vld [vmem:[#allocation8 + $0x60c] sm:$0xf0]  ;;  %v10451_v33 = vld [vmem:[#allocation8 + $0x2e4] sm:$0xf] }
 0x233   :  { %4983 = vmatpush.bf16.msra.mxu3 %v8954_v39  ;;  %4964 = vmatpush.bf16.msra.mxu2 %v8586_v2  ;;  %v9017_v39 = vld [vmem:[#allocation8 + $0x560] sm:$0xf]  ;;  %v3077_v58 = vadd.f32 %v11396_v11, %v3064_v37  ;;  %v10525_v11 = vld [vmem:[#allocation8 + $0x52c] sm:$0xf0]  ;;  %v3156_v61 = vpop.f32.mrf.mxu2  ;;  %v10415_v46 = vld [vmem:[#allocation8 + $0x1c4] sm:$0xf] }
 0x234   :  { %4952 = vmatmul.bf16.vlgmr.msra.gmra.mxu1 %v11440_v54  ;;  %v9018_v55 = vor.u32 %v10533_v56, %v9017_v39  ;;  %v8857_v2 = vld [vmem:[#allocation8 + $0x420] sm:$0xf]  ;;  %v3129_v7 = vadd.f32 %v3128_v50, %v3116_v13  ;;  %v8986_v17 = vor.u32 %v10525_v11, %v8985_v22  ;;  %v8430_v56 = vor.u32 %v10383_v28, %v8427_v29  ;;  %v8683_v13 = vld [vmem:[#allocation8 + $0x2d0] sm:$0xf0]  ;;  %v10443_v22 = vld [vmem:[#allocation8 + $0x2a4] sm:$0xf] }
 0x235   :  { %4996 = vmatpush.bf16.msrb.mxu1 %v9082_v62  ;;  %4977 = vmatpush.bf16.msrb.mxu0 %v8714_v3  ;;  %v10493_v62 = vld [vmem:[#allocation8 + $0x42c] sm:$0xf0]  ;;  %v9002_v3 = vor.u32 %v10529_v60, %v9001_v49  ;;  %v3365_v5 = vmul.f32 0.01, %v3077_v58  ;;  %vm3357_vm7 = vcmp.gt.f32.partialorder %v3077_v58, 0.0  ;;  %v9098_v50 = vor.u32 %v10553_v31, %v9097_v34 }
 0x236   :  { %4965 = vmatmul.bf16.vlgmr.msra.gmra.mxu2 %v11442_v43  ;;  %v8858_v35 = vor.u32 %v10493_v62, %v8857_v2  ;;  %v3142_v18 = vadd.f32 %v3141_v45, %v3129_v7  ;;  %v8411_v45 = vld [vmem:[#allocation8 + $0xb0] sm:$0xf0]  ;;  %v9337_v53 = vld [vmem:[#allocation8 + $0x7e0] sm:$0xf]  ;;  %v8558_v60 = vor.u32 %v10415_v46, %v8555_v40  ;;  %v10411_v62 = vld [vmem:[#allocation8 + $0x1a4] sm:$0xf] }
 0x237   :  { %4984 = vmatpush.bf16.msra.mxu3 %v8938_v32  ;;  %5009 = vmatpush.bf16.msrb.mxu2 %v9210_v9  ;;  %v10561_v32 = vld [vmem:[#allocation8 + $0x64c] sm:$0xf0]  ;;  %v3373_v41 = vsel %vm3357_vm7, %v3077_v58, %v3365_v5  ;;  %v10447_v58 = vld [vmem:[#allocation8 + $0x2c4] sm:$0xf]  ;;  %v8414_v2 = vor.u32 %v10379_v42, %v8411_v45  ;;  %v9321_v5 = vld [vmem:[#allocation8 + $0x7c0] sm:$0xf] }
 0x238   :  { %4978 = vmatmul.bf16.vlgmr.msrb.gmra.mxu0 %v11447_v48  ;;  %v3155_v37 = vadd.f32 %v3154_v4, %v3142_v18  ;;  %v8686_v4 = vor.u32 %v10447_v58, %v8683_v13  ;;  %v10609_v7 = vld [vmem:[#allocation8 + $0x7cc] sm:$0xf0]  ;;  %v8667_v11 = vld [vmem:[#allocation8 + $0x2b0] sm:$0xf0]  ;;  %v10407_v8 = vld [vmem:[#allocation8 + $0x184] sm:$0xf] }
 0x239   :  { %4997 = vmatpush.bf16.msrb.mxu1 %v9066_v14  ;;  %v3117_v9 = vpop.f32.mrf.mxu3  ;;  %v9130_v14 = vor.u32 %v10561_v32, %v9129_v19  ;;  %v10375_v19 = vld [vmem:[#allocation8 + $0x84] sm:$0xf]  ;;  %v8507_v28 = vld [vmem:[#allocation8 + $0x170] sm:$0xf0]  ;;  %v9289_v31 = vld [vmem:[#allocation8 + $0x780] sm:$0xf] }
 0x23a   :  { %v9322_v9 = vor.u32 %v10609_v7, %v9321_v5  ;;  %v10371_v25 = vld [vmem:[#allocation8 + $0x64] sm:$0xf]  ;;  %v8363_v29 = vld [vmem:[#allocation8 + $0x50] sm:$0xf0]  ;;  %v10593_v5 = vld [vmem:[#allocation8 + $0x74c] sm:$0xf0] }
 0x23b   :  { %4985 = vmatpush.bf16.msra.mxu3 %v8922_v15  ;;  %5010 = vmatpush.bf16.msrb.mxu2 %v9194_v21  ;;  %v3143_v15 = vpop.f32.mrf.mxu0  ;;  %v8842_v21 = vor.u32 %v10489_v12, %v8841_v10  ;;  %v10435_v61 = vld [vmem:[#allocation8 + $0x264] sm:$0xf]  ;;  %v8347_v40 = vld [vmem:[#allocation8 + $0x30] sm:$0xf0] }
 0x23c   :  { %v8379_v15 = vld [vmem:[#allocation8 + $0x70] sm:$0xf0]  ;;  %v10363_v46 = vld [vmem:[#allocation8 + $0x24] sm:$0xf] }
 0x23d   :  { %4998 = vmatpush.bf16.msrb.mxu1 %v9050_v24  ;;  %v10419_v24 = vld [vmem:[#allocation8 + $0x1e4] sm:$0xf]  ;;  %v8955_v7 = vld [vmem:[#allocation8 + $0x4f0] sm:$0xf0] }
 0x23e   :  { %v8574_v38 = vor.u32 %v10419_v24, %v8571_v27  ;;  %v8382_v24 = vor.u32 %v10371_v25, %v8379_v15  ;;  %v10403_v27 = vld [vmem:[#allocation8 + $0x164] sm:$0xf]  ;;  %v9083_v25 = vld [vmem:[#allocation8 + $0x5f0] sm:$0xf0] }
 0x23f   :  { %4986 = vmatpush.bf16.msra.mxu3 %v8906_v63  ;;  %5011 = vmatpush.bf16.msrb.mxu2 %v9178_v47  ;;  %v9114_v63 = vor.u32 %v10557_v0, %v9113_v59  ;;  %v8970_v47 = vor.u32 %v10521_v23, %v8969_v20  ;;  %v8670_v59 = vor.u32 %v10443_v22, %v8667_v11  ;;  %v9305_v0 = vld [vmem:[#allocation8 + $0x7a0] sm:$0xf]  ;;  %v8651_v20 = vld [vmem:[#allocation8 + $0x290] sm:$0xf0]  ;;  %v10395_v13 = vld [vmem:[#allocation8 + $0x124] sm:$0xf] }
 0x240   :  { %v10427_v22 = vld [vmem:[#allocation8 + $0x224] sm:$0xf]  ;;  %v8603_v11 = vld [vmem:[#allocation8 + $0x230] sm:$0xf0] }
 0x241   :  { %4999 = vmatpush.bf16.msrb.mxu1 %v9034_v36  ;;  %v8699_v36 = vld [vmem:[#allocation8 + $0x2f0] sm:$0xf0]  ;;  %v3167_v39 = vpop.f32.mrf.mxu3  ;;  %v11464_v18 = vpop.f32.mrf.mxu1 }
 0x242   :  { %v8702_v51 = vor.u32 %v10451_v33, %v8699_v36  ;;  %v8635_v33 = vld [vmem:[#allocation8 + $0x270] sm:$0xf0] }
 0x243   :  { %4987 = vmatpush.bf16.msra.mxu3 %v8890_v16  ;;  %5012 = vmatpush.bf16.msrb.mxu2 %v9162_v44  ;;  %v11458_v16 = vpack.c.bf16 %v3373_v41, %v3373_v41  ;;  %v3168_v44 = vadd.f32 %v3167_v39, %v3155_v37  ;;  %v8510_v37 = vor.u32 %v10403_v27, %v8507_v28  ;;  %v10399_v39 = vld [vmem:[#allocation8 + $0x144] sm:$0xf]  ;;  %v619_v27 = vperm.slane %v11444_v57, 6 }
 0x244   :  { %v8638_v42 = vor.u32 %v10435_v61, %v8635_v33  ;;  %v10507_v61 = vld [vmem:[#allocation8 + $0x4a4] sm:$0xf] }
 0x245   :  { %5000 = vmatpush.bf16.msrb.mxu1 %v9018_v55  ;;  %v10613_v55 = vld [vmem:[#allocation8 + $0x7ec] sm:$0xf0]  ;;  %vm3358_vm8 = vcmp.gt.f32.partialorder %v3168_v44, 0.0  ;;  %v3366_v49 = vmul.f32 0.01, %v3168_v44 }
 0x246   :  { %v11466_v41 = vpop.f32.mrf.mxu0 }
 0x247   :  { %4988 = vmatpush.bf16.msra.mxu3 %v8874_v52  ;;  %5013 = vmatpush.bf16.msrb.mxu2 %v9146_v1  ;;  %v9338_v52 = vor.u32 %v10613_v55, %v9337_v53  ;;  %v8539_v1 = vld [vmem:[#allocation8 + $0x1b0] sm:$0xf0]  ;;  %v3374_v32 = vsel %vm3358_vm8, %v3168_v44, %v3366_v49  ;;  %v10597_v44 = vld [vmem:[#allocation8 + $0x76c] sm:$0xf0]  ;;  %v8350_v49 = vor.u32 %v10363_v46, %v8347_v40  ;;  %v10483_v40 = vld [vmem:[#allocation8 + $0x3e4] sm:$0xf] }
 0x248   :  { %v8542_v10 = vor.u32 %v10411_v62, %v8539_v1  ;;  %v8619_v53 = vld [vmem:[#allocation8 + $0x250] sm:$0xf0] }
 0x249   :  { %5001 = vmatpush.bf16.msrb.mxu1 %v9002_v3  ;;  %v8395_v3 = vld [vmem:[#allocation8 + $0x90] sm:$0xf0]  ;;  %5022 = vmatpush.bf16.msra.mxu0 %v9338_v52  ;;  %v3169_v6 = vpop.f32.mrf.mxu3  ;;  %v3182_v45 = vpop.f32.mrf.mxu1 }
 0x24a   :  { %v8398_v12 = vor.u32 %v10375_v19, %v8395_v3  ;;  %v8331_v62 = vld [vmem:[#allocation8 + $0x10] sm:$0xf0] }
 0x24b   :  { %4989 = vmatpush.bf16.msra.mxu3 %v8858_v35  ;;  %5014 = vmatpush.bf16.msrb.mxu2 %v9130_v14  ;;  %v11461_v35 = vpack.c.bf16 %v3374_v32, %v3374_v32  ;;  %v8523_v14 = vld [vmem:[#allocation8 + $0x190] sm:$0xf0]  ;;  %v10515_v32 = vld [vmem:[#allocation8 + $0x4e4] sm:$0xf] }
 0x24c   :  { %v8958_v15 = vor.u32 %v10515_v32, %v8955_v7  ;;  %v10535_v32 = vld [vmem:[#allocation8 + $0x584] sm:$0xf]  ;;  %v8891_v7 = vld [vmem:[#allocation8 + $0x470] sm:$0xf0] }
 0x24d   :  { %5002 = vmatpush.bf16.msrb.mxu1 %v8986_v17  ;;  %5023 = vmatpush.bf16.msra.mxu0 %v9322_v9  ;;  %v10605_v17 = vld [vmem:[#allocation8 + $0x7ac] sm:$0xf0] }
 0x24e   :  { %v9306_v23 = vor.u32 %v10605_v17, %v9305_v0  ;;  %v3208_v1 = vpop.f32.mrf.mxu0  ;;  %v11470_v19 = vpop.f32.mrf.mxu2  ;;  %v8606_v0 = vor.u32 %v10427_v22, %v8603_v11  ;;  %v9241_v17 = vld [vmem:[#allocation8 + $0x720] sm:$0xf]  ;;  %v10475_v22 = vld [vmem:[#allocation8 + $0x3a4] sm:$0xf]  ;;  %v8795_v11 = vld [vmem:[#allocation8 + $0x3b0] sm:$0xf0] }
 0x24f   :  { %4990 = vmatpush.bf16.msra.mxu3 %v8842_v21  ;;  %5015 = vmatpush.bf16.msrb.mxu2 %v9114_v63  ;;  %v10439_v21 = vld [vmem:[#allocation8 + $0x284] sm:$0xf] }
 0x250   :  { %v10367_v63 = vld [vmem:[#allocation8 + $0x44] sm:$0xf]  ;;  %v8654_v34 = vor.u32 %v10439_v21, %v8651_v20  ;;  %v10589_v21 = vld [vmem:[#allocation8 + $0x72c] sm:$0xf0]  ;;  %v8939_v20 = vld [vmem:[#allocation8 + $0x4d0] sm:$0xf0] }
 0x251   :  { %5003 = vmatpush.bf16.msrb.mxu1 %v8970_v47  ;;  %5024 = vmatpush.bf16.msra.mxu0 %v9306_v23  ;;  %v10601_v47 = vld [vmem:[#allocation8 + $0x78c] sm:$0xf0]  ;;  %v11468_v52 = vpop.f32.mrf.mxu3  ;;  %v10423_v23 = vld [vmem:[#allocation8 + $0x204] sm:$0xf] }
 0x252   :  { %4991 = vmatmul.bf16.vlgmr.msra.gmra.mxu3 %v11458_v16  ;;  %v9290_v36 = vor.u32 %v10601_v47, %v9289_v31 }
 0x253   :  { %5035 = vmatpush.bf16.msrb.mxu3 %v8446_v30  ;;  %5016 = vmatpush.bf16.msrb.mxu2 %v9098_v50  ;;  %v8526_v30 = vor.u32 %v10407_v8, %v8523_v14  ;;  %v9273_v50 = vld [vmem:[#allocation8 + $0x760] sm:$0xf]  ;;  %v8459_v8 = vld [vmem:[#allocation8 + $0x110] sm:$0xf0]  ;;  %v10547_v14 = vld [vmem:[#allocation8 + $0x5e4] sm:$0xf] }
 0x254   :  { %5004 = vmatmul.bf16.vlgmr.msrb.gmra.mxu1 %v11461_v35  ;;  %v9274_v55 = vor.u32 %v10597_v44, %v9273_v50  ;;  %v3181_v50 = vadd.f32 %v11464_v18, %v619_v27  ;;  %v10491_v27 = vld [vmem:[#allocation8 + $0x424] sm:$0xf] }
 0x255   :  { %5048 = vmatpush.bf16.msra.mxu1 %v8574_v38  ;;  %v8366_v38 = vor.u32 %v10367_v63, %v8363_v29  ;;  %5025 = vmatpush.bf16.msra.mxu0 %v9290_v36  ;;  %v9086_v63 = vor.u32 %v10547_v14, %v9083_v25  ;;  %v10543_v29 = vld [vmem:[#allocation8 + $0x5c4] sm:$0xf]  ;;  %v9019_v14 = vld [vmem:[#allocation8 + $0x570] sm:$0xf0] }
 0x256   :  { %v11473_v33 = vpop.f32.mrf.mxu0  ;;  %v3221_v36 = vpop.f32.mrf.mxu2  ;;  %v3194_v18 = vadd.f32 %v11468_v52, %v3181_v50  ;;  %v10495_v25 = vld [vmem:[#allocation8 + $0x444] sm:$0xf] }
 0x257   :  { %5036 = vmatpush.bf16.msrb.mxu3 %v8430_v56  ;;  %5061 = vmatpush.bf16.msra.mxu2 %v8702_v51  ;;  %v8491_v56 = vld [vmem:[#allocation8 + $0x150] sm:$0xf0]  ;;  %v10431_v51 = vld [vmem:[#allocation8 + $0x244] sm:$0xf] }
 0x258   :  { %v8494_v58 = vor.u32 %v10399_v39, %v8491_v56  ;;  %v8622_v3 = vor.u32 %v10431_v51, %v8619_v53  ;;  %v10585_v39 = vld [vmem:[#allocation8 + $0x70c] sm:$0xf0]  ;;  %v8923_v56 = vld [vmem:[#allocation8 + $0x4b0] sm:$0xf0]  ;;  %v10539_v53 = vld [vmem:[#allocation8 + $0x5a4] sm:$0xf] }
 0x259   :  { %5049 = vmatpush.bf16.msra.mxu1 %v8558_v60  ;;  %v8475_v60 = vld [vmem:[#allocation8 + $0x130] sm:$0xf0]  ;;  %5026 = vmatpush.bf16.msra.mxu0 %v9274_v55  ;;  %v3195_v31 = vpop.f32.mrf.mxu3  ;;  %v8926_v51 = vor.u32 %v10507_v61, %v8923_v56  ;;  %v10487_v50 = vld [vmem:[#allocation8 + $0x404] sm:$0xf] }
 0x25a   :  { %v9051_v55 = vld [vmem:[#allocation8 + $0x5b0] sm:$0xf0] }
 0x25b   :  { %5037 = vmatpush.bf16.msrb.mxu3 %v8414_v2  ;;  %5062 = vmatpush.bf16.msra.mxu2 %v8686_v4  ;;  %v10359_v2 = vld [vmem:[#allocation8 + $0x4] sm:$0xf]  ;;  %v9257_v4 = vld [vmem:[#allocation8 + $0x740] sm:$0xf]  ;;  %v8763_v31 = vld [vmem:[#allocation8 + $0x370] sm:$0xf0] }
 0x25c   :  { %v9258_v9 = vor.u32 %v10593_v5, %v9257_v4  ;;  %v8334_v6 = vor.u32 %v10359_v2, %v8331_v62  ;;  %v9054_v62 = vor.u32 %v10539_v53, %v9051_v55  ;;  %v10499_v4 = vld [vmem:[#allocation8 + $0x464] sm:$0xf]  ;;  %v8747_v53 = vld [vmem:[#allocation8 + $0x350] sm:$0xf0] }
 0x25d   :  { %5050 = vmatpush.bf16.msra.mxu1 %v8542_v10  ;;  %v8478_v10 = vor.u32 %v10395_v13, %v8475_v60  ;;  %v8907_v13 = vld [vmem:[#allocation8 + $0x490] sm:$0xf0] }
 0x25e   :  { %5027 = vmatpush.bf16.msra.mxu0 %v9258_v9  ;;  %v8811_v60 = vld [vmem:[#allocation8 + $0x3d0] sm:$0xf0]  ;;  %v3260_v5 = vpop.f32.mrf.mxu0  ;;  %v3207_v9 = vadd.f32 %v11466_v41, %v3194_v18 }
 0x25f   :  { %5038 = vmatpush.bf16.msrb.mxu3 %v8398_v12  ;;  %5063 = vmatpush.bf16.msra.mxu2 %v8670_v59  ;;  %v10391_v12 = vld [vmem:[#allocation8 + $0x104] sm:$0xf]  ;;  %v8577_v5 = vld [vmem:[#allocation8 + $0x1e8] sm:$0xf] }
 0x260   :  { %v10511_v59 = vld [vmem:[#allocation8 + $0x4c4] sm:$0xf]  ;;  %v8462_v28 = vor.u32 %v10391_v12, %v8459_v8  ;;  %v8798_v12 = vor.u32 %v10475_v22, %v8795_v11 }
 0x261   :  { %5051 = vmatpush.bf16.msra.mxu1 %v8526_v30  ;;  %v8587_v30 = vld [vmem:[#allocation8 + $0x210] sm:$0xf0]  ;;  %v8942_v47 = vor.u32 %v10511_v59, %v8939_v20  ;;  %v10531_v8 = vld [vmem:[#allocation8 + $0x564] sm:$0xf] }
 0x262   :  { %v10471_v59 = vld [vmem:[#allocation8 + $0x384] sm:$0xf]  ;;  %v9022_v20 = vor.u32 %v10531_v8, %v9019_v14 }
 0x263   :  { %5039 = vmatpush.bf16.msrb.mxu3 %v8382_v24  ;;  %5064 = vmatpush.bf16.msra.mxu2 %v8654_v34  ;;  %v9242_v24 = vor.u32 %v10589_v21, %v9241_v17  ;;  %v9067_v34 = vld [vmem:[#allocation8 + $0x5d0] sm:$0xf0]  ;;  %v3220_v17 = vadd.f32 %v11470_v19, %v3207_v9  ;;  %v10459_v9 = vld [vmem:[#allocation8 + $0x324] sm:$0xf] }
 0x264   :  { %v9070_v45 = vor.u32 %v10543_v29, %v9067_v34  ;;  %v10467_v34 = vld [vmem:[#allocation8 + $0x364] sm:$0xf] }
 0x265   :  { %5052 = vmatpush.bf16.msra.mxu1 %v8510_v37  ;;  %v8590_v37 = vor.u32 %v10423_v23, %v8587_v30  ;;  %5028 = vmatpush.bf16.msra.mxu0 %v9242_v24  ;;  %v10527_v30 = vld [vmem:[#allocation8 + $0x544] sm:$0xf]  ;;  %v9003_v24 = vld [vmem:[#allocation8 + $0x550] sm:$0xf0]  ;;  %v8766_v19 = vor.u32 %v10467_v34, %v8763_v31 }
 0x266   :  { %v9006_v36 = vor.u32 %v10527_v30, %v9003_v24  ;;  %v8417_v30 = vld [vmem:[#allocation8 + $0xa8] sm:$0xf]  ;;  %v10382_v24 = vld [vmem:[#allocation8 + $0xb4] sm:$0xf0]  ;;  %v10567_v31 = vld [vmem:[#allocation8 + $0x684] sm:$0xf] }
 0x267   :  { %5040 = vmatpush.bf16.msrb.mxu3 %v8366_v38  ;;  %5065 = vmatpush.bf16.msra.mxu2 %v8638_v42  ;;  %v9225_v38 = vld [vmem:[#allocation8 + $0x700] sm:$0xf]  ;;  %v8827_v42 = vld [vmem:[#allocation8 + $0x3f0] sm:$0xf0] }
 0x268   :  { %v9226_v46 = vor.u32 %v10585_v39, %v9225_v38  ;;  %v8830_v44 = vor.u32 %v10483_v40, %v8827_v42  ;;  %v8987_v38 = vld [vmem:[#allocation8 + $0x530] sm:$0xf0]  ;;  %v10579_v39 = vld [vmem:[#allocation8 + $0x6e4] sm:$0xf] }
 0x269   :  { %5053 = vmatpush.bf16.msra.mxu1 %v8494_v58  ;;  %v10503_v58 = vld [vmem:[#allocation8 + $0x484] sm:$0xf]  ;;  %v9211_v40 = vld [vmem:[#allocation8 + $0x6f0] sm:$0xf0] }
 0x26a   :  { %5029 = vmatpush.bf16.msra.mxu0 %v9226_v46  ;;  %v8910_v1 = vor.u32 %v10503_v58, %v8907_v13  ;;  %v11481_v29 = vpop.f32.mrf.mxu0  ;;  %v10390_v58 = vld [vmem:[#allocation8 + $0xf4] sm:$0xf0] }
 0x26b   :  { %5041 = vmatpush.bf16.msrb.mxu3 %v8350_v49  ;;  %5066 = vmatpush.bf16.msra.mxu2 %v8622_v3  ;;  %v10479_v49 = vld [vmem:[#allocation8 + $0x3c4] sm:$0xf]  ;;  %v9035_v3 = vld [vmem:[#allocation8 + $0x590] sm:$0xf0] }
 0x26c   :  { %v8814_v2 = vor.u32 %v10479_v49, %v8811_v60  ;;  %v9038_v52 = vor.u32 %v10535_v32, %v9035_v3  ;;  %v10519_v60 = vld [vmem:[#allocation8 + $0x504] sm:$0xf]  ;;  %v9195_v32 = vld [vmem:[#allocation8 + $0x6d0] sm:$0xf0] }
 0x26d   :  { %5054 = vmatpush.bf16.msra.mxu1 %v8478_v10  ;;  %v3232_v10 = vpop.f32.mrf.mxu1 }
 0x26e   :  { %5074 = vmatpush.bf16.msrb.mxu0 %v8830_v44  ;;  %v3233_v41 = vadd.f32 %v3232_v10, %v3220_v17  ;;  %v11484_v42 = vpop.f32.mrf.mxu2  ;;  %v8843_v44 = vld [vmem:[#allocation8 + $0x410] sm:$0xf0]  ;;  %v8433_v10 = vld [vmem:[#allocation8 + $0xc8] sm:$0xf] }
 0x26f   :  { %5042 = vmatpush.bf16.msrb.mxu3 %v8334_v6  ;;  %5067 = vmatpush.bf16.msra.mxu2 %v8606_v0  ;;  %v8894_v6 = vor.u32 %v10499_v4, %v8891_v7  ;;  %v8779_v0 = vld [vmem:[#allocation8 + $0x390] sm:$0xf0]  ;;  %v10422_v7 = vld [vmem:[#allocation8 + $0x1f4] sm:$0xf0]  ;;  %v8561_v17 = vld [vmem:[#allocation8 + $0x1c8] sm:$0xf] }
 0x270   :  { %v8782_v21 = vor.u32 %v10471_v59, %v8779_v0  ;;  %v9179_v59 = vld [vmem:[#allocation8 + $0x6b0] sm:$0xf0] }
 0x271   :  { %5055 = vmatpush.bf16.msra.mxu1 %v8462_v28  ;;  %v3245_v28 = vpop.f32.mrf.mxu3 }
 0x272   :  { %5043 = vmatmul.bf16.vlgmr.msrb.gmra.mxu3 %v11425_v26  ;;  %5075 = vmatpush.bf16.msrb.mxu0 %v8814_v2  ;;  %v8846_v2 = vor.u32 %v10487_v50, %v8843_v44  ;;  %v3286_v11 = vpop.f32.mrf.mxu0  ;;  %v9147_v50 = vld [vmem:[#allocation8 + $0x670] sm:$0xf0]  ;;  %v8529_v44 = vld [vmem:[#allocation8 + $0x188] sm:$0xf] }
 0x273   :  { %5087 = vmatpush.bf16.msra.mxu3 %v8958_v15  ;;  %5068 = vmatpush.bf16.msra.mxu2 %v8590_v37  ;;  %v8875_v15 = vld [vmem:[#allocation8 + $0x450] sm:$0xf0]  ;;  %v10523_v37 = vld [vmem:[#allocation8 + $0x524] sm:$0xf] }
 0x274   :  { %5056 = vmatmul.bf16.vlgmr.msra.gmra.mxu1 %v11440_v54  ;;  %v8878_v23 = vor.u32 %v10495_v25, %v8875_v15  ;;  %v8990_v49 = vor.u32 %v10523_v37, %v8987_v38  ;;  %v8578_v25 = vor.u32 %v10422_v7, %v8577_v5  ;;  %v10571_v15 = vld [vmem:[#allocation8 + $0x6a4] sm:$0xf]  ;;  %v8401_v37 = vld [vmem:[#allocation8 + $0x88] sm:$0xf]  ;;  %v10378_v38 = vld [vmem:[#allocation8 + $0x94] sm:$0xf0] }
 0x275   :  { %5100 = vmatpush.bf16.msrb.mxu1 %v9086_v63  ;;  %v8859_v63 = vld [vmem:[#allocation8 + $0x430] sm:$0xf0]  ;;  %v3234_v61 = vpop.f32.mrf.mxu1  ;;  %v10555_v5 = vld [vmem:[#allocation8 + $0x624] sm:$0xf] }
 0x276   :  { %5076 = vmatpush.bf16.msrb.mxu0 %v8798_v12  ;;  %v8862_v46 = vor.u32 %v10491_v27, %v8859_v63  ;;  %v10386_v12 = vld [vmem:[#allocation8 + $0xd4] sm:$0xf0]  ;;  %v3273_v0 = vpop.f32.mrf.mxu2  ;;  %v9182_v63 = vor.u32 %v10571_v15, %v9179_v59  ;;  %v9163_v61 = vld [vmem:[#allocation8 + $0x690] sm:$0xf0]  ;;  %v10551_v59 = vld [vmem:[#allocation8 + $0x604] sm:$0xf] }
 0x277   :  { %5088 = vmatpush.bf16.msra.mxu3 %v8942_v47  ;;  %v3246_v47 = vadd.f32 %v3245_v28, %v3233_v41  ;;  %v10455_v41 = vld [vmem:[#allocation8 + $0x304] sm:$0xf]  ;;  %v620_v28 = vperm.slane %v11444_v57, 7  ;;  %v9115_v11 = vld [vmem:[#allocation8 + $0x630] sm:$0xf0] }
 0x278   :  { %v10563_v57 = vld [vmem:[#allocation8 + $0x664] sm:$0xf]  ;;  %v9099_v0 = vld [vmem:[#allocation8 + $0x610] sm:$0xf0] }
 0x279   :  { %5101 = vmatpush.bf16.msrb.mxu1 %v9070_v45  ;;  %v3259_v56 = vadd.f32 %v11473_v33, %v3246_v47  ;;  %v8449_v45 = vld [vmem:[#allocation8 + $0xe8] sm:$0xf]  ;;  %v9214_v33 = vor.u32 %v10579_v39, %v9211_v40  ;;  %v3247_v22 = vpop.f32.mrf.mxu3  ;;  %v8418_v47 = vor.u32 %v10382_v24, %v8417_v30  ;;  %v9166_v39 = vor.u32 %v10567_v31, %v9163_v61  ;;  %v10454_v24 = vld [vmem:[#allocation8 + $0x2f4] sm:$0xf0] }
 0x27a   :  { %5077 = vmatpush.bf16.msrb.mxu0 %v8782_v21  ;;  %v8450_v4 = vor.u32 %v10390_v58, %v8449_v45  ;;  %v8434_v21 = vor.u32 %v10386_v12, %v8433_v10  ;;  %v8402_v40 = vor.u32 %v10378_v38, %v8401_v37  ;;  %v10410_v45 = vld [vmem:[#allocation8 + $0x194] sm:$0xf0]  ;;  %v9150_v58 = vor.u32 %v10563_v57, %v9147_v50  ;;  %v8689_v38 = vld [vmem:[#allocation8 + $0x2c8] sm:$0xf] }
 0x27b   :  { %5089 = vmatpush.bf16.msra.mxu3 %v8926_v51  ;;  %v10463_v51 = vld [vmem:[#allocation8 + $0x344] sm:$0xf]  ;;  %vm3359_vm9 = vcmp.gt.f32.partialorder %v3259_v56, 0.0  ;;  %v3367_v55 = vmul.f32 0.01, %v3259_v56  ;;  %v9102_v31 = vor.u32 %v10551_v59, %v9099_v0 }
 0x27c   :  { %v8750_v13 = vor.u32 %v10463_v51, %v8747_v53  ;;  %v8385_v51 = vld [vmem:[#allocation8 + $0x68] sm:$0xf]  ;;  %v10374_v53 = vld [vmem:[#allocation8 + $0x74] sm:$0xf0] }
 0x27d   :  { %5102 = vmatpush.bf16.msrb.mxu1 %v9054_v62  ;;  %v3375_v18 = vsel %vm3359_vm9, %v3259_v56, %v3367_v55  ;;  %v8971_v62 = vld [vmem:[#allocation8 + $0x510] sm:$0xf0]  ;;  %v10394_v37 = vld [vmem:[#allocation8 + $0x114] sm:$0xf0]  ;;  %v9089_v50 = vld [vmem:[#allocation8 + $0x5e8] sm:$0xf] }
 0x27e   :  { %5078 = vmatpush.bf16.msrb.mxu0 %v8766_v19  ;;  %v11486_v3 = vpack.c.bf16 %v3375_v18, %v3375_v18  ;;  %v8545_v19 = vld [vmem:[#allocation8 + $0x1a8] sm:$0xf]  ;;  %v8386_v18 = vor.u32 %v10374_v53, %v8385_v51  ;;  %v10514_v53 = vld [vmem:[#allocation8 + $0x4d4] sm:$0xf0] }
 0x27f   :  { %5090 = vmatpush.bf16.msra.mxu3 %v8910_v1  ;;  %v10575_v1 = vld [vmem:[#allocation8 + $0x6c4] sm:$0xf]  ;;  %v8945_v51 = vld [vmem:[#allocation8 + $0x4c8] sm:$0xf] }
 0x280   :  { %5017 = vmatmul.bf16.vlgmr.msrb.gmra.mxu2 %v11486_v3  ;;  %v9198_v14 = vor.u32 %v10575_v1, %v9195_v32  ;;  %v10370_v1 = vld [vmem:[#allocation8 + $0x54] sm:$0xf0]  ;;  %v8913_v0 = vld [vmem:[#allocation8 + $0x488] sm:$0xf] }
 0x281   :  { %5103 = vmatpush.bf16.msrb.mxu1 %v9038_v52  ;;  %v8731_v52 = vld [vmem:[#allocation8 + $0x330] sm:$0xf0]  ;;  %5113 = vmatpush.bf16.msrb.mxu2 %v9214_v33 }
 0x282   :  { %5079 = vmatpush.bf16.msrb.mxu0 %v8750_v13  ;;  %v8734_v8 = vor.u32 %v10459_v9, %v8731_v52  ;;  %v8530_v13 = vor.u32 %v10410_v45, %v8529_v44  ;;  %v9131_v33 = vld [vmem:[#allocation8 + $0x650] sm:$0xf0]  ;;  %v8497_v9 = vld [vmem:[#allocation8 + $0x148] sm:$0xf]  ;;  %v10550_v44 = vld [vmem:[#allocation8 + $0x5f4] sm:$0xf0] }
 0x283   :  { %5091 = vmatpush.bf16.msra.mxu3 %v8894_v6  ;;  %v8974_v6 = vor.u32 %v10519_v60, %v8971_v62  ;;  %v8369_v62 = vld [vmem:[#allocation8 + $0x48] sm:$0xf] }
 0x284   :  { %v8370_v22 = vor.u32 %v10370_v1, %v8369_v62  ;;  %v8353_v52 = vld [vmem:[#allocation8 + $0x28] sm:$0xf] }
 0x285   :  { %5104 = vmatpush.bf16.msrb.mxu1 %v9022_v20  ;;  %v10418_v20 = vld [vmem:[#allocation8 + $0x1d4] sm:$0xf0]  ;;  %5114 = vmatpush.bf16.msrb.mxu2 %v9198_v14  ;;  %v9073_v62 = vld [vmem:[#allocation8 + $0x5c8] sm:$0xf] }
 0x286   :  { %5080 = vmatpush.bf16.msrb.mxu0 %v8734_v8  ;;  %v8562_v34 = vor.u32 %v10418_v20, %v8561_v17  ;;  %v8481_v20 = vld [vmem:[#allocation8 + $0x128] sm:$0xf] }
 0x287   :  { %5092 = vmatpush.bf16.msra.mxu3 %v8878_v23  ;;  %v8715_v23 = vld [vmem:[#allocation8 + $0x310] sm:$0xf0] }
 0x288   :  { %v8718_v27 = vor.u32 %v10455_v41, %v8715_v23  ;;  %v10398_v41 = vld [vmem:[#allocation8 + $0x134] sm:$0xf0]  ;;  %v8705_v23 = vld [vmem:[#allocation8 + $0x2e8] sm:$0xf] }
 0x289   :  { %5105 = vmatpush.bf16.msrb.mxu1 %v9006_v36  ;;  %v10414_v36 = vld [vmem:[#allocation8 + $0x1b4] sm:$0xf0]  ;;  %5115 = vmatpush.bf16.msrb.mxu2 %v9182_v63  ;;  %v8961_v63 = vld [vmem:[#allocation8 + $0x4e8] sm:$0xf]  ;;  %v8706_v61 = vor.u32 %v10454_v24, %v8705_v23  ;;  %v10603_v23 = vld [vmem:[#allocation8 + $0x7a4] sm:$0xf] }
 0x28a   :  { %5081 = vmatpush.bf16.msrb.mxu0 %v8718_v27  ;;  %v8546_v56 = vor.u32 %v10414_v36, %v8545_v19  ;;  %v8337_v27 = vld [vmem:[#allocation8 + $0x8] sm:$0xf] }
 0x28b   :  { %5093 = vmatpush.bf16.msra.mxu3 %v8862_v46  ;;  %v3272_v46 = vadd.f32 %v11484_v42, %v620_v28  ;;  %v10406_v42 = vld [vmem:[#allocation8 + $0x174] sm:$0xf0]  ;;  %v8465_v36 = vld [vmem:[#allocation8 + $0x108] sm:$0xf] }
 0x28c   :  { %v10362_v28 = vld [vmem:[#allocation8 + $0x14] sm:$0xf0]  ;;  %v8641_v24 = vld [vmem:[#allocation8 + $0x268] sm:$0xf] }
 0x28d   :  { %5106 = vmatpush.bf16.msrb.mxu1 %v8990_v49  ;;  %v3297_v55 = vpop.f32.mrf.mxu1  ;;  %5116 = vmatpush.bf16.msrb.mxu2 %v9166_v39  ;;  %v10559_v49 = vld [vmem:[#allocation8 + $0x644] sm:$0xf]  ;;  %v3285_v60 = vadd.f32 %v11481_v29, %v3272_v46  ;;  %v10402_v29 = vld [vmem:[#allocation8 + $0x154] sm:$0xf0]  ;;  %v8338_v19 = vor.u32 %v10362_v28, %v8337_v27 }
 0x28e   :  { %v9134_v32 = vor.u32 %v10559_v49, %v9131_v33  ;;  %v8498_v15 = vor.u32 %v10402_v29, %v8497_v9  ;;  %v9339_v49 = vld [vmem:[#allocation8 + $0x7f0] sm:$0xf0]  ;;  %v9090_v33 = vor.u32 %v10550_v44, %v9089_v50  ;;  %v10438_v28 = vld [vmem:[#allocation8 + $0x274] sm:$0xf0]  ;;  %v8881_v44 = vld [vmem:[#allocation8 + $0x448] sm:$0xf] }
 0x28f   :  { %5094 = vmatpush.bf16.msra.mxu3 %v8846_v2  ;;  %v8513_v2 = vld [vmem:[#allocation8 + $0x168] sm:$0xf]  ;;  %v3298_v7 = vadd.f32 %v3297_v55, %v3285_v60  ;;  %v10534_v50 = vld [vmem:[#allocation8 + $0x574] sm:$0xf0] }
 0x290   :  { %5069 = vmatmul.bf16.vlgmr.msra.gmra.mxu2 %v11442_v43 }
 0x291   :  { %5107 = vmatpush.bf16.msrb.mxu1 %v8974_v6  ;;  %5117 = vmatpush.bf16.msrb.mxu2 %v9150_v58  ;;  %v10366_v6 = vld [vmem:[#allocation8 + $0x34] sm:$0xf0]  ;;  %v8466_v58 = vor.u32 %v10394_v37, %v8465_v36  ;;  %v8642_v36 = vor.u32 %v10438_v28, %v8641_v24  ;;  %v10388_v24 = vld [vmem:[#allocation8 + $0xec] sm:$0xf] }
 0x292   :  { %5095 = vmatmul.bf16.vlgmr.msra.gmra.mxu3 %v11458_v16 }
 0x293   :  { %5139 = vmatpush.bf16.msrb.mxu3 %v8450_v4  ;;  %v8514_v4 = vor.u32 %v10406_v42, %v8513_v2  ;;  %v8673_v2 = vld [vmem:[#allocation8 + $0x2a8] sm:$0xf]  ;;  %v10446_v42 = vld [vmem:[#allocation8 + $0x2b4] sm:$0xf0] }
 0x294   :  { %5108 = vmatmul.bf16.vlgmr.msrb.gmra.mxu1 %v11461_v35  ;;  %v8674_v29 = vor.u32 %v10446_v42, %v8673_v2  ;;  %v10430_v42 = vld [vmem:[#allocation8 + $0x234] sm:$0xf0] }
 0x295   :  { %5152 = vmatpush.bf16.msra.mxu1 %v8578_v25  ;;  %v3310_v10 = vpop.f32.mrf.mxu3  ;;  %v3336_v12 = vpop.f32.mrf.mxu0  ;;  %5118 = vmatpush.bf16.msrb.mxu2 %v9134_v32  ;;  %v9118_v25 = vor.u32 %v10555_v5, %v9115_v11  ;;  %v8946_v32 = vor.u32 %v10514_v53, %v8945_v51  ;;  %v8929_v5 = vld [vmem:[#allocation8 + $0x4a8] sm:$0xf] }
 0x296   :  { %v3311_v8 = vadd.f32 %v3310_v10, %v3298_v7  ;;  %v3299_v14 = vpop.f32.mrf.mxu1  ;;  %v10510_v7 = vld [vmem:[#allocation8 + $0x4b4] sm:$0xf0] }
 0x297   :  { %5140 = vmatpush.bf16.msrb.mxu3 %v8434_v21  ;;  %v8354_v21 = vor.u32 %v10366_v6, %v8353_v52  ;;  %v9323_v52 = vld [vmem:[#allocation8 + $0x7d0] sm:$0xf0]  ;;  %v8657_v6 = vld [vmem:[#allocation8 + $0x288] sm:$0xf]  ;;  %v10442_v14 = vld [vmem:[#allocation8 + $0x294] sm:$0xf0] }
 0x299   :  { %5153 = vmatpush.bf16.msra.mxu1 %v8562_v34  ;;  %v3323_v17 = vpop.f32.mrf.mxu2  ;;  %v10518_v34 = vld [vmem:[#allocation8 + $0x4f4] sm:$0xf0]  ;;  %5119 = vmatpush.bf16.msrb.mxu2 %v9118_v25  ;;  %v9057_v25 = vld [vmem:[#allocation8 + $0x5a8] sm:$0xf] }
 0x29a   :  { %v3324_v30 = vadd.f32 %v3323_v17, %v3311_v8  ;;  %v8962_v46 = vor.u32 %v10518_v34, %v8961_v63  ;;  %v8930_v8 = vor.u32 %v10510_v7, %v8929_v5  ;;  %v10506_v17 = vld [vmem:[#allocation8 + $0x494] sm:$0xf0]  ;;  %v9041_v63 = vld [vmem:[#allocation8 + $0x588] sm:$0xf] }
 0x29b   :  { %5141 = vmatpush.bf16.msrb.mxu3 %v8418_v47  ;;  %v8482_v47 = vor.u32 %v10398_v41, %v8481_v20  ;;  %v8658_v20 = vor.u32 %v10442_v14, %v8657_v6  ;;  %v8914_v27 = vor.u32 %v10506_v17, %v8913_v0  ;;  %v10538_v34 = vld [vmem:[#allocation8 + $0x594] sm:$0xf0] }
 0x29c   :  { %v3337_v57 = vadd.f32 %v3336_v12, %v3324_v30  ;;  %v10607_v12 = vld [vmem:[#allocation8 + $0x7c4] sm:$0xf]  ;;  %v9307_v30 = vld [vmem:[#allocation8 + $0x7b0] sm:$0xf0]  ;;  %v9042_v37 = vor.u32 %v10538_v34, %v9041_v63  ;;  %v10494_v5 = vld [vmem:[#allocation8 + $0x434] sm:$0xf0] }
 0x29d   :  { %5154 = vmatpush.bf16.msra.mxu1 %v8546_v56  ;;  %v3312_v39 = vpop.f32.mrf.mxu3  ;;  %v3338_v56 = vpop.f32.mrf.mxu0  ;;  %5120 = vmatpush.bf16.msrb.mxu2 %v9102_v31  ;;  %v8897_v31 = vld [vmem:[#allocation8 + $0x468] sm:$0xf]  ;;  %v10426_v6 = vld [vmem:[#allocation8 + $0x214] sm:$0xf0]  ;;  %v10587_v34 = vld [vmem:[#allocation8 + $0x724] sm:$0xf] }
 0x29e   :  { %v3349_v45 = vpop.f32.mrf.mxu1  ;;  %v9291_v39 = vld [vmem:[#allocation8 + $0x790] sm:$0xf0]  ;;  %v8625_v56 = vld [vmem:[#allocation8 + $0x248] sm:$0xf]  ;;  %v10582_v17 = vld [vmem:[#allocation8 + $0x6f4] sm:$0xf0] }
 0x29f   :  { %5142 = vmatpush.bf16.msrb.mxu3 %v8402_v40  ;;  %v10450_v40 = vld [vmem:[#allocation8 + $0x2d4] sm:$0xf0]  ;;  %v3350_v55 = vadd.f32 %v3349_v45, %v3337_v57 }
 0x2a0   :  { %5121 = vmatmul.bf16.vlgmr.msrb.gmra.mxu2 %v11486_v3  ;;  %v10498_v45 = vld [vmem:[#allocation8 + $0x454] sm:$0xf0] }
 0x2a1   :  { %5155 = vmatpush.bf16.msra.mxu1 %v8530_v13  ;;  %v10611_v13 = vld [vmem:[#allocation8 + $0x7e4] sm:$0xf]  ;;  %5165 = vmatpush.bf16.msra.mxu2 %v8706_v61  ;;  %v3325_v60 = vpop.f32.mrf.mxu2  ;;  %vm3360_vm10 = vcmp.gt.f32.partialorder %v3350_v55, 0.0  ;;  %v3368_v1 = vmul.f32 0.01, %v3350_v55  ;;  %v9310_v61 = vor.u32 %v10603_v23, %v9307_v30  ;;  %v8882_v2 = vor.u32 %v10498_v45, %v8881_v44 }
 0x2a2   :  { %v9342_v11 = vor.u32 %v10611_v13, %v9339_v49  ;;  %v10595_v49 = vld [vmem:[#allocation8 + $0x764] sm:$0xf]  ;;  %v9275_v60 = vld [vmem:[#allocation8 + $0x770] sm:$0xf0]  ;;  %v8579_v44 = vld [vmem:[#allocation8 + $0x1f8] sm:$0xf0] }
 0x2a3   :  { %5143 = vmatpush.bf16.msrb.mxu3 %v8386_v18  ;;  %v8690_v18 = vor.u32 %v10450_v40, %v8689_v38  ;;  %v10599_v38 = vld [vmem:[#allocation8 + $0x784] sm:$0xf]  ;;  %v9025_v40 = vld [vmem:[#allocation8 + $0x568] sm:$0xf] }
 0x2a4   :  { %v9026_v13 = vor.u32 %v10534_v50, %v9025_v40  ;;  %v10578_v40 = vld [vmem:[#allocation8 + $0x6d4] sm:$0xf0]  ;;  %v10420_v50 = vld [vmem:[#allocation8 + $0x1ec] sm:$0xf] }
 0x2a5   :  { %5156 = vmatpush.bf16.msra.mxu1 %v8514_v4  ;;  %v10546_v4 = vld [vmem:[#allocation8 + $0x5d4] sm:$0xf0]  ;;  %5166 = vmatpush.bf16.msra.mxu2 %v8690_v18  ;;  %v8609_v18 = vld [vmem:[#allocation8 + $0x228] sm:$0xf] }
 0x2a6   :  { %v9074_v10 = vor.u32 %v10546_v4, %v9073_v62  ;;  %v3351_v59 = vpop.f32.mrf.mxu1  ;;  %v9009_v62 = vld [vmem:[#allocation8 + $0x548] sm:$0xf] }
 0x2a7   :  { %5144 = vmatpush.bf16.msrb.mxu3 %v8370_v22  ;;  %v3376_v22 = vsel %vm3360_vm10, %v3350_v55, %v3368_v1  ;;  %v9294_v55 = vor.u32 %v10599_v38, %v9291_v39  ;;  %v10530_v1 = vld [vmem:[#allocation8 + $0x554] sm:$0xf0]  ;;  %v8865_v4 = vld [vmem:[#allocation8 + $0x428] sm:$0xf] }
 0x2a8   :  { %v11497_v9 = vpack.c.bf16 %v3376_v22, %v3376_v22  ;;  %v9278_v22 = vor.u32 %v10595_v49, %v9275_v60  ;;  %v8866_v14 = vor.u32 %v10494_v5, %v8865_v4  ;;  %v9217_v59 = vld [vmem:[#allocation8 + $0x6e8] sm:$0xf]  ;;  %v10522_v38 = vld [vmem:[#allocation8 + $0x514] sm:$0xf0]  ;;  %v8582_v60 = vor.u32 %v10420_v50, %v8579_v44  ;;  %v8563_v4 = vld [vmem:[#allocation8 + $0x1d8] sm:$0xf0] }
 0x2a9   :  { %5157 = vmatpush.bf16.msra.mxu1 %v8498_v15  ;;  %v10542_v15 = vld [vmem:[#allocation8 + $0x5b4] sm:$0xf0]  ;;  %5167 = vmatpush.bf16.msra.mxu2 %v8674_v29  ;;  %v8610_v29 = vor.u32 %v10430_v42, %v8609_v18  ;;  %v9201_v39 = vld [vmem:[#allocation8 + $0x6c8] sm:$0xf]  ;;  %v8515_v50 = vld [vmem:[#allocation8 + $0x178] sm:$0xf0] }
 0x2aa   :  { %5030 = vmatmul.bf16.vlgmr.msra.gmra.mxu0 %v11497_v9  ;;  %v9058_v41 = vor.u32 %v10542_v15, %v9057_v25  ;;  %v8993_v25 = vld [vmem:[#allocation8 + $0x528] sm:$0xf]  ;;  %v10526_v15 = vld [vmem:[#allocation8 + $0x534] sm:$0xf0]  ;;  %v9202_v49 = vor.u32 %v10578_v40, %v9201_v39  ;;  %v10404_v40 = vld [vmem:[#allocation8 + $0x16c] sm:$0xf] }
 0x2ab   :  { %5145 = vmatpush.bf16.msrb.mxu3 %v8354_v21  ;;  %5126 = vmatpush.bf16.msra.mxu0 %v9342_v11  ;;  %v9326_v21 = vor.u32 %v10607_v12, %v9323_v52  ;;  %v10591_v11 = vld [vmem:[#allocation8 + $0x744] sm:$0xf]  ;;  %v9259_v12 = vld [vmem:[#allocation8 + $0x750] sm:$0xf0]  ;;  %v8593_v52 = vld [vmem:[#allocation8 + $0x208] sm:$0xf]  ;;  %v8994_v63 = vor.u32 %v10526_v15, %v8993_v25 }
 0x2ac   :  { %v9262_v30 = vor.u32 %v10591_v11, %v9259_v12  ;;  %v8594_v28 = vor.u32 %v10426_v6, %v8593_v52  ;;  %v8833_v18 = vld [vmem:[#allocation8 + $0x3e8] sm:$0xf]  ;;  %v10482_v52 = vld [vmem:[#allocation8 + $0x3d4] sm:$0xf0]  ;;  %v10412_v25 = vld [vmem:[#allocation8 + $0x1ac] sm:$0xf] }
 0x2ad   :  { %5158 = vmatpush.bf16.msra.mxu1 %v8482_v47  ;;  %v10502_v47 = vld [vmem:[#allocation8 + $0x474] sm:$0xf0]  ;;  %5168 = vmatpush.bf16.msra.mxu2 %v8658_v20  ;;  %v8817_v12 = vld [vmem:[#allocation8 + $0x3c8] sm:$0xf]  ;;  %v8547_v15 = vld [vmem:[#allocation8 + $0x1b8] sm:$0xf0] }
 0x2ae   :  { %v8898_v57 = vor.u32 %v10502_v47, %v8897_v31  ;;  %v10490_v20 = vld [vmem:[#allocation8 + $0x414] sm:$0xf0]  ;;  %v9243_v31 = vld [vmem:[#allocation8 + $0x730] sm:$0xf0]  ;;  %v9169_v6 = vld [vmem:[#allocation8 + $0x688] sm:$0xf] }
 0x2af   :  { %5146 = vmatpush.bf16.msrb.mxu3 %v8338_v19  ;;  %5127 = vmatpush.bf16.msra.mxu0 %v9326_v21  ;;  %v11501_v19 = vld [vmem:[#allocation10] sm:$0xf]  ;;  %v8849_v21 = vld [vmem:[#allocation8 + $0x408] sm:$0xf]  ;;  %v9246_v45 = vor.u32 %v10587_v34, %v9243_v31  ;;  %v10372_v34 = vld [vmem:[#allocation8 + $0x6c] sm:$0xf] }
 0x2b0   :  { %v3643_v53 = vperm.slane %v11501_v19, 0  ;;  %v8387_v31 = vld [vmem:[#allocation8 + $0x78] sm:$0xf0]  ;;  %v9137_v39 = vld [vmem:[#allocation8 + $0x648] sm:$0xf] }
 0x2b1   :  { %5159 = vmatpush.bf16.msra.mxu1 %v8466_v58  ;;  %v4953_v51 = vpop.f32.mrf.mxu1  ;;  %5169 = vmatpush.bf16.msra.mxu2 %v8642_v36  ;;  %v8850_v36 = vor.u32 %v10490_v20, %v8849_v21  ;;  %v8550_v20 = vor.u32 %v10412_v25, %v8547_v15  ;;  %v10368_v44 = vld [vmem:[#allocation8 + $0x4c] sm:$0xf]  ;;  %v8707_v15 = vld [vmem:[#allocation8 + $0x2f8] sm:$0xf0] }
 0x2b2   :  { %5147 = vmatmul.bf16.vlgmr.msrb.gmra.mxu3 %v11425_v26  ;;  %v10452_v25 = vld [vmem:[#allocation8 + $0x2ec] sm:$0xf] }
 0x2b3   :  { %5191 = vmatpush.bf16.msra.mxu3 %v8962_v46  ;;  %v10434_v46 = vld [vmem:[#allocation8 + $0x254] sm:$0xf0]  ;;  %5128 = vmatpush.bf16.msra.mxu0 %v9310_v61  ;;  %v9218_v61 = vor.u32 %v10582_v17, %v9217_v59  ;;  %v10376_v59 = vld [vmem:[#allocation8 + $0x8c] sm:$0xf]  ;;  %v8818_v17 = vor.u32 %v10482_v52, %v8817_v12 }
 0x2b4   :  { %5160 = vmatmul.bf16.vlgmr.msra.gmra.mxu1 %v11440_v54  ;;  %v8626_v58 = vor.u32 %v10434_v46, %v8625_v56  ;;  %v10554_v12 = vld [vmem:[#allocation8 + $0x614] sm:$0xf0] }
 0x2b5   :  { %5204 = vmatpush.bf16.msrb.mxu1 %v9090_v33  ;;  %v4979_v33 = vpop.f32.mrf.mxu0 }
 0x2b6   :  { %5170 = vmatpush.bf16.msra.mxu2 %v8626_v58  ;;  %v10583_v58 = vld [vmem:[#allocation8 + $0x704] sm:$0xf] }
 0x2b7   :  { %5192 = vmatpush.bf16.msra.mxu3 %v8946_v32  ;;  %v4940_v32 = vpop.f32.mrf.mxu3  ;;  %5129 = vmatpush.bf16.msra.mxu0 %v9294_v55 }
 0x2b8   :  { %v4941_v7 = vadd.f32 %v4940_v32, %v3643_v53  ;;  %v8435_v53 = vld [vmem:[#allocation8 + $0xd8] sm:$0xf0]  ;;  %v10416_v32 = vld [vmem:[#allocation8 + $0x1cc] sm:$0xf] }
 0x2b9   :  { %5205 = vmatpush.bf16.msrb.mxu1 %v9074_v10  ;;  %v9010_v10 = vor.u32 %v10530_v1, %v9009_v62  ;;  %v4966_v0 = vpop.f32.mrf.mxu2  ;;  %v4955_v23 = vpop.f32.mrf.mxu1  ;;  %v10574_v1 = vld [vmem:[#allocation8 + $0x6b4] sm:$0xf0] }
 0x2ba   :  { %5082 = vmatmul.bf16.vlgmr.msrb.gmra.mxu0 %v11447_v48  ;;  %5171 = vmatpush.bf16.msra.mxu2 %v8610_v29  ;;  %v10478_v23 = vld [vmem:[#allocation8 + $0x3b4] sm:$0xf0] }
 0x2bb   :  { %5193 = vmatpush.bf16.msra.mxu3 %v8930_v8  ;;  %v4954_v8 = vadd.f32 %v4953_v51, %v4941_v7  ;;  %5130 = vmatpush.bf16.msra.mxu0 %v9278_v22  ;;  %v10384_v51 = vld [vmem:[#allocation8 + $0xcc] sm:$0xf]  ;;  %v8419_v22 = vld [vmem:[#allocation8 + $0xb8] sm:$0xf0] }
 0x2bc   :  { %v8438_v62 = vor.u32 %v10384_v51, %v8435_v53  ;;  %v10380_v7 = vld [vmem:[#allocation8 + $0xac] sm:$0xf] }
 0x2bd   :  { %5206 = vmatpush.bf16.msrb.mxu1 %v9058_v41  ;;  %v4967_v41 = vadd.f32 %v4966_v0, %v4954_v8  ;;  %v4981_v47 = vpop.f32.mrf.mxu0  ;;  %v8422_v8 = vor.u32 %v10380_v7, %v8419_v22  ;;  %v8403_v0 = vld [vmem:[#allocation8 + $0x98] sm:$0xf0]  ;;  %v8753_v7 = vld [vmem:[#allocation8 + $0x348] sm:$0xf] }
 0x2be   :  { %5172 = vmatpush.bf16.msra.mxu2 %v8594_v28  ;;  %v10408_v28 = vld [vmem:[#allocation8 + $0x18c] sm:$0xf] }
 0x2bf   :  { %5194 = vmatpush.bf16.msra.mxu3 %v8914_v27  ;;  %v8451_v27 = vld [vmem:[#allocation8 + $0xf8] sm:$0xf0]  ;;  %v11505_v56 = vadd.f32 %v4979_v33, %v4967_v41  ;;  %5131 = vmatpush.bf16.msra.mxu0 %v9262_v30  ;;  %v10486_v33 = vld [vmem:[#allocation8 + $0x3f4] sm:$0xf0]  ;;  %v8801_v41 = vld [vmem:[#allocation8 + $0x3a8] sm:$0xf] }
 0x2c0   :  { %v8454_v46 = vor.u32 %v10388_v24, %v8451_v27  ;;  %v8834_v11 = vor.u32 %v10486_v33, %v8833_v18  ;;  %v9153_v30 = vld [vmem:[#allocation8 + $0x668] sm:$0xf]  ;;  %v8406_v24 = vor.u32 %v10376_v59, %v8403_v0  ;;  %v10566_v27 = vld [vmem:[#allocation8 + $0x674] sm:$0xf0]  ;;  %v8802_v47 = vor.u32 %v10478_v23, %v8801_v41  ;;  %v10400_v33 = vld [vmem:[#allocation8 + $0x14c] sm:$0xf] }
 0x2c1   :  { %5207 = vmatpush.bf16.msrb.mxu1 %v9042_v37  ;;  %v8977_v37 = vld [vmem:[#allocation8 + $0x508] sm:$0xf]  ;;  %v4968_v42 = vpop.f32.mrf.mxu2  ;;  %5173 = vmatmul.bf16.vlgmr.msra.gmra.mxu2 %v11442_v43  ;;  %v10558_v18 = vld [vmem:[#allocation8 + $0x634] sm:$0xf0]  ;;  %v10360_v59 = vld [vmem:[#allocation8 + $0xc] sm:$0xf] }
 0x2c2   :  { %v8978_v55 = vor.u32 %v10522_v38, %v8977_v37  ;;  %5217 = vmatpush.bf16.msrb.mxu2 %v9218_v61  ;;  %v9154_v61 = vor.u32 %v10566_v27, %v9153_v30  ;;  %v8785_v37 = vld [vmem:[#allocation8 + $0x388] sm:$0xf]  ;;  %v10474_v38 = vld [vmem:[#allocation8 + $0x394] sm:$0xf0] }
 0x2c3   :  { %5195 = vmatpush.bf16.msra.mxu3 %v8898_v57  ;;  %v4942_v57 = vpop.f32.mrf.mxu3  ;;  %5132 = vmatpush.bf16.msra.mxu0 %v9246_v45  ;;  %v8371_v45 = vld [vmem:[#allocation8 + $0x58] sm:$0xf0]  ;;  %v8786_v51 = vor.u32 %v10474_v38, %v8785_v37  ;;  %v8737_v23 = vld [vmem:[#allocation8 + $0x328] sm:$0xf]  ;;  %v10462_v30 = vld [vmem:[#allocation8 + $0x334] sm:$0xf0] }
 0x2c4   :  { %v8390_v57 = vor.u32 %v10372_v34, %v8387_v31  ;;  %v10448_v34 = vld [vmem:[#allocation8 + $0x2cc] sm:$0xf]  ;;  %v9091_v38 = vld [vmem:[#allocation8 + $0x5f8] sm:$0xf0] }
 0x2c5   :  { %5208 = vmatpush.bf16.msrb.mxu1 %v9026_v13  ;;  %v9227_v13 = vld [vmem:[#allocation8 + $0x710] sm:$0xf0]  ;;  %v10548_v37 = vld [vmem:[#allocation8 + $0x5ec] sm:$0xf] }
 0x2c6   :  { %v9230_v5 = vor.u32 %v10583_v58, %v9227_v13  ;;  %5218 = vmatpush.bf16.msrb.mxu2 %v9202_v49  ;;  %v8769_v58 = vld [vmem:[#allocation8 + $0x368] sm:$0xf]  ;;  %v10470_v13 = vld [vmem:[#allocation8 + $0x374] sm:$0xf0] }
 0x2c7   :  { %5196 = vmatpush.bf16.msra.mxu3 %v8882_v2  ;;  %v9185_v2 = vld [vmem:[#allocation8 + $0x6a8] sm:$0xf] }
 0x2c8   :  { %v9186_v29 = vor.u32 %v10574_v1, %v9185_v2  ;;  %5133 = vmatpush.bf16.msra.mxu0 %v9230_v5  ;;  %v9121_v49 = vld [vmem:[#allocation8 + $0x628] sm:$0xf]  ;;  %v8499_v2 = vld [vmem:[#allocation8 + $0x158] sm:$0xf0]  ;;  %v10364_v1 = vld [vmem:[#allocation8 + $0x2c] sm:$0xf]  ;;  %v8770_v5 = vor.u32 %v10470_v13, %v8769_v58 }
 0x2c9   :  { %5209 = vmatpush.bf16.msrb.mxu1 %v9010_v10  ;;  %v8566_v10 = vor.u32 %v10416_v32, %v8563_v4  ;;  %v8355_v32 = vld [vmem:[#allocation8 + $0x38] sm:$0xf0]  ;;  %v9122_v22 = vor.u32 %v10558_v18, %v9121_v49  ;;  %v10444_v58 = vld [vmem:[#allocation8 + $0x2ac] sm:$0xf] }
 0x2ca   :  { %5219 = vmatpush.bf16.msrb.mxu2 %v9186_v29  ;;  %v10466_v29 = vld [vmem:[#allocation8 + $0x354] sm:$0xf0]  ;;  %v8675_v49 = vld [vmem:[#allocation8 + $0x2b8] sm:$0xf0] }
 0x2cb   :  { %5197 = vmatpush.bf16.msra.mxu3 %v8866_v14  ;;  %v10570_v14 = vld [vmem:[#allocation8 + $0x694] sm:$0xf0]  ;;  %5134 = vmatmul.bf16.vlgmr.msra.gmra.mxu0 %v11497_v9  ;;  %v8754_v0 = vor.u32 %v10466_v29, %v8753_v7  ;;  %v9075_v18 = vld [vmem:[#allocation8 + $0x5d8] sm:$0xf0]  ;;  %v10440_v7 = vld [vmem:[#allocation8 + $0x28c] sm:$0xf] }
 0x2cc   :  { %5178 = vmatpush.bf16.msrb.mxu0 %v8834_v11  ;;  %v9170_v21 = vor.u32 %v10570_v14, %v9169_v6  ;;  %v8502_v11 = vor.u32 %v10400_v33, %v8499_v2  ;;  %v8358_v6 = vor.u32 %v10364_v1, %v8355_v32  ;;  %v8483_v14 = vld [vmem:[#allocation8 + $0x138] sm:$0xf0]  ;;  %v10508_v2 = vld [vmem:[#allocation8 + $0x4ac] sm:$0xf]  ;;  %v8678_v1 = vor.u32 %v10444_v58, %v8675_v49 }
 0x2cd   :  { %5210 = vmatpush.bf16.msrb.mxu1 %v8994_v63  ;;  %v8531_v63 = vld [vmem:[#allocation8 + $0x198] sm:$0xf0]  ;;  %v10540_v29 = vld [vmem:[#allocation8 + $0x5ac] sm:$0xf] }
 0x2ce   :  { %5220 = vmatpush.bf16.msrb.mxu2 %v9170_v21  ;;  %v8963_v21 = vld [vmem:[#allocation8 + $0x4f8] sm:$0xf0] }
 0x2cf   :  { %5198 = vmatpush.bf16.msra.mxu3 %v8850_v36  ;;  %v8534_v36 = vor.u32 %v10408_v28, %v8531_v63  ;;  %v10392_v28 = vld [vmem:[#allocation8 + $0x10c] sm:$0xf]  ;;  %v8467_v63 = vld [vmem:[#allocation8 + $0x118] sm:$0xf0] }
 0x2d0   :  { %5179 = vmatpush.bf16.msrb.mxu0 %v8818_v17  ;;  %v10516_v17 = vld [vmem:[#allocation8 + $0x4ec] sm:$0xf]  ;;  %v8867_v49 = vld [vmem:[#allocation8 + $0x438] sm:$0xf0] }
 0x2d1   :  { %5211 = vmatpush.bf16.msrb.mxu1 %v8978_v55  ;;  %v8518_v55 = vor.u32 %v10404_v40, %v8515_v50  ;;  %v8470_v40 = vor.u32 %v10392_v28, %v8467_v63  ;;  %v8721_v50 = vld [vmem:[#allocation8 + $0x308] sm:$0xf]  ;;  %v10432_v28 = vld [vmem:[#allocation8 + $0x24c] sm:$0xf] }
 0x2d2   :  { %5199 = vmatmul.bf16.vlgmr.msra.gmra.mxu3 %v11458_v16  ;;  %5221 = vmatpush.bf16.msrb.mxu2 %v9154_v61  ;;  %v8966_v61 = vor.u32 %v10516_v17, %v8963_v21  ;;  %v10536_v17 = vld [vmem:[#allocation8 + $0x58c] sm:$0xf]  ;;  %v9043_v21 = vld [vmem:[#allocation8 + $0x598] sm:$0xf0] }
 0x2d3   :  { %5243 = vmatpush.bf16.msrb.mxu3 %v8454_v46  ;;  %v10562_v46 = vld [vmem:[#allocation8 + $0x654] sm:$0xf0] }
 0x2d4   :  { %5212 = vmatmul.bf16.vlgmr.msrb.gmra.mxu1 %v11461_v35  ;;  %5180 = vmatpush.bf16.msrb.mxu0 %v8802_v47  ;;  %v9138_v53 = vor.u32 %v10562_v46, %v9137_v39  ;;  %v8738_v39 = vor.u32 %v10462_v30, %v8737_v23  ;;  %v8947_v46 = vld [vmem:[#allocation8 + $0x4d8] sm:$0xf0]  ;;  %v9046_v30 = vor.u32 %v10536_v17, %v9043_v21  ;;  %v10520_v17 = vld [vmem:[#allocation8 + $0x50c] sm:$0xf] }
 0x2d5   :  { %5256 = vmatpush.bf16.msra.mxu1 %v8582_v60  ;;  %v8374_v60 = vor.u32 %v10368_v44, %v8371_v45  ;;  %v4992_v42 = vpop.f32.mrf.mxu3  ;;  %v10458_v44 = vld [vmem:[#allocation8 + $0x314] sm:$0xf0]  ;;  %v8979_v21 = vld [vmem:[#allocation8 + $0x518] sm:$0xf0] }
 0x2d6   :  { %v4993_v4 = vadd.f32 %v4992_v42, %v11505_v56  ;;  %5222 = vmatpush.bf16.msrb.mxu2 %v9138_v53  ;;  %v8339_v56 = vld [vmem:[#allocation8 + $0x18] sm:$0xf0]  ;;  %v9345_v53 = vld [vmem:[#allocation8 + $0x7e8] sm:$0xf]  ;;  %v8722_v33 = vor.u32 %v10458_v44, %v8721_v50  ;;  %v10598_v50 = vld [vmem:[#allocation8 + $0x774] sm:$0xf0] }
 0x2d7   :  { %5244 = vmatpush.bf16.msrb.mxu3 %v8438_v62  ;;  %v5005_v62 = vpop.f32.mrf.mxu1  ;;  %v8342_v27 = vor.u32 %v10360_v59, %v8339_v56  ;;  %v8931_v42 = vld [vmem:[#allocation8 + $0x4b8] sm:$0xf0]  ;;  %v10436_v59 = vld [vmem:[#allocation8 + $0x26c] sm:$0xf] }
 0x2d8   :  { %5181 = vmatpush.bf16.msrb.mxu0 %v8786_v51  ;;  %v11512_v52 = vadd.f32 %v5005_v62, %v4993_v4  ;;  %v9094_v51 = vor.u32 %v10548_v37, %v9091_v38  ;;  %v9329_v4 = vld [vmem:[#allocation8 + $0x7c8] sm:$0xf]  ;;  %v3644_v38 = vperm.slane %v11501_v19, 1  ;;  %v10428_v44 = vld [vmem:[#allocation8 + $0x22c] sm:$0xf] }
 0x2d9   :  { %5257 = vmatpush.bf16.msra.mxu1 %v8566_v10  ;;  %v9105_v10 = vld [vmem:[#allocation8 + $0x608] sm:$0xf] }
 0x2da   :  { %5223 = vmatpush.bf16.msrb.mxu2 %v9122_v22  ;;  %v8934_v22 = vor.u32 %v10508_v2, %v8931_v42  ;;  %v9265_v19 = vld [vmem:[#allocation8 + $0x748] sm:$0xf]  ;;  %v10594_v42 = vld [vmem:[#allocation8 + $0x754] sm:$0xf0] }
 0x2db   :  { %5245 = vmatpush.bf16.msrb.mxu3 %v8422_v8  ;;  %v10396_v8 = vld [vmem:[#allocation8 + $0x12c] sm:$0xf] }
 0x2dc   :  { %5182 = vmatpush.bf16.msrb.mxu0 %v8770_v5  ;;  %v8486_v41 = vor.u32 %v10396_v8, %v8483_v14  ;;  %v10610_v5 = vld [vmem:[#allocation8 + $0x7d4] sm:$0xf0] }
 0x2dd   :  { %5258 = vmatpush.bf16.msra.mxu1 %v8550_v20  ;;  %v9106_v20 = vor.u32 %v10554_v12, %v9105_v10  ;;  %v4994_v31 = vpop.f32.mrf.mxu3  ;;  %v9059_v10 = vld [vmem:[#allocation8 + $0x5b8] sm:$0xf0]  ;;  %v10504_v12 = vld [vmem:[#allocation8 + $0x48c] sm:$0xf] }
 0x2de   :  { %v9062_v14 = vor.u32 %v10540_v29, %v9059_v10  ;;  %v10532_v31 = vld [vmem:[#allocation8 + $0x56c] sm:$0xf]  ;;  %v8851_v10 = vld [vmem:[#allocation8 + $0x418] sm:$0xf0] }
 0x2df   :  { %5246 = vmatpush.bf16.msrb.mxu3 %v8406_v24  ;;  %v8710_v24 = vor.u32 %v10452_v25, %v8707_v15  ;;  %v5007_v47 = vpop.f32.mrf.mxu1  ;;  %5224 = vmatpush.bf16.msrb.mxu2 %v9106_v20  ;;  %v9313_v25 = vld [vmem:[#allocation8 + $0x7a8] sm:$0xf]  ;;  %v10606_v15 = vld [vmem:[#allocation8 + $0x7b4] sm:$0xf0]  ;;  %v10500_v20 = vld [vmem:[#allocation8 + $0x46c] sm:$0xf] }
 0x2e0   :  { %5183 = vmatpush.bf16.msrb.mxu0 %v8754_v0  ;;  %v8643_v0 = vld [vmem:[#allocation8 + $0x278] sm:$0xf0]  ;;  %v10488_v29 = vld [vmem:[#allocation8 + $0x40c] sm:$0xf] }
 0x2e1   :  { %5259 = vmatpush.bf16.msra.mxu1 %v8534_v36  ;;  %v8691_v36 = vld [vmem:[#allocation8 + $0x2d8] sm:$0xf0]  ;;  %v8646_v23 = vor.u32 %v10436_v59, %v8643_v0  ;;  %v10590_v59 = vld [vmem:[#allocation8 + $0x734] sm:$0xf0]  ;;  %v8854_v0 = vor.u32 %v10488_v29, %v8851_v10 }
 0x2e2   :  { %v8694_v45 = vor.u32 %v10448_v34, %v8691_v36  ;;  %5225 = vmatmul.bf16.vlgmr.msrb.gmra.mxu2 %v11486_v3  ;;  %v8627_v34 = vld [vmem:[#allocation8 + $0x258] sm:$0xf0] }
 0x2e3   :  { %5247 = vmatpush.bf16.msrb.mxu3 %v8390_v57  ;;  %v10512_v57 = vld [vmem:[#allocation8 + $0x4cc] sm:$0xf]  ;;  %5269 = vmatpush.bf16.msra.mxu2 %v8710_v24  ;;  %v9297_v24 = vld [vmem:[#allocation8 + $0x788] sm:$0xf]  ;;  %v9027_v47 = vld [vmem:[#allocation8 + $0x578] sm:$0xf0] }
 0x2e4   :  { %v8950_v13 = vor.u32 %v10512_v57, %v8947_v46  ;;  %5184 = vmatpush.bf16.msrb.mxu0 %v8738_v39  ;;  %v8883_v36 = vld [vmem:[#allocation8 + $0x458] sm:$0xf0]  ;;  %v8630_v57 = vor.u32 %v10432_v28, %v8627_v34  ;;  %v9030_v46 = vor.u32 %v10532_v31, %v9027_v47  ;;  %v8982_v28 = vor.u32 %v10520_v17, %v8979_v21  ;;  %v10586_v34 = vld [vmem:[#allocation8 + $0x714] sm:$0xf0]  ;;  %v10484_v47 = vld [vmem:[#allocation8 + $0x3ec] sm:$0xf] }
 0x2e5   :  { %5260 = vmatpush.bf16.msra.mxu1 %v8518_v55  ;;  %v10614_v55 = vld [vmem:[#allocation8 + $0x7f4] sm:$0xf0]  ;;  %v8787_v29 = vld [vmem:[#allocation8 + $0x398] sm:$0xf0]  ;;  %v10468_v21 = vld [vmem:[#allocation8 + $0x36c] sm:$0xf] }
 0x2e6   :  { %v9346_v62 = vor.u32 %v10614_v55, %v9345_v53  ;;  %v10528_v53 = vld [vmem:[#allocation8 + $0x54c] sm:$0xf]  ;;  %v9011_v55 = vld [vmem:[#allocation8 + $0x558] sm:$0xf0] }
 0x2e7   :  { %5248 = vmatpush.bf16.msrb.mxu3 %v8374_v60  ;;  %v10544_v60 = vld [vmem:[#allocation8 + $0x5cc] sm:$0xf]  ;;  %5270 = vmatpush.bf16.msra.mxu2 %v8694_v45  ;;  %v9014_v2 = vor.u32 %v10528_v53, %v9011_v55  ;;  %v9171_v53 = vld [vmem:[#allocation8 + $0x698] sm:$0xf0] }
 0x2e8   :  { %v9078_v32 = vor.u32 %v10544_v60, %v9075_v18  ;;  %5185 = vmatpush.bf16.msrb.mxu0 %v8722_v33 }
 0x2e9   :  { %5261 = vmatpush.bf16.msra.mxu1 %v8502_v11  ;;  %v8659_v11 = vld [vmem:[#allocation8 + $0x298] sm:$0xf0] }
 0x2ea   :  { %v8662_v8 = vor.u32 %v10440_v7, %v8659_v11  ;;  %v10580_v7 = vld [vmem:[#allocation8 + $0x6ec] sm:$0xf]  ;;  %v9219_v11 = vld [vmem:[#allocation8 + $0x6f8] sm:$0xf0] }
 0x2eb   :  { %5249 = vmatpush.bf16.msrb.mxu3 %v8358_v6  ;;  %v8915_v6 = vld [vmem:[#allocation8 + $0x498] sm:$0xf0]  ;;  %5271 = vmatpush.bf16.msra.mxu2 %v8678_v1 }
 0x2ec   :  { %5230 = vmatpush.bf16.msra.mxu0 %v9346_v62  ;;  %v8918_v56 = vor.u32 %v10504_v12, %v8915_v6  ;;  %v10424_v62 = vld [vmem:[#allocation8 + $0x20c] sm:$0xf]  ;;  %v8595_v1 = vld [vmem:[#allocation8 + $0x218] sm:$0xf0]  ;;  %v9266_v6 = vor.u32 %v10594_v42, %v9265_v19 }
 0x2ed   :  { %5262 = vmatpush.bf16.msra.mxu1 %v8486_v41  ;;  %5186 = vmatmul.bf16.vlgmr.msrb.gmra.mxu0 %v11447_v48  ;;  %v9314_v41 = vor.u32 %v10606_v15, %v9313_v25  ;;  %v9249_v15 = vld [vmem:[#allocation8 + $0x728] sm:$0xf]  ;;  %v8803_v19 = vld [vmem:[#allocation8 + $0x3b8] sm:$0xf0] }
 0x2ee   :  { %v9155_v42 = vld [vmem:[#allocation8 + $0x678] sm:$0xf0] }
 0x2ef   :  { %5250 = vmatpush.bf16.msrb.mxu3 %v8342_v27  ;;  %5272 = vmatpush.bf16.msra.mxu2 %v8662_v8  ;;  %v10602_v27 = vld [vmem:[#allocation8 + $0x794] sm:$0xf0]  ;;  %v10630_v8 = vld [vmem:[#allocation11 + $0x74] sm:$0xf0] }
 0x2f0   :  { %v9298_v39 = vor.u32 %v10602_v27, %v9297_v24  ;;  %v9401_v24 = vld [vmem:[#allocation11 + $0x60] sm:$0xf]  ;;  %v10628_v27 = vld [vmem:[#allocation11 + $0x64] sm:$0xf0] }
 0x2f1   :  { %5263 = vmatpush.bf16.msra.mxu1 %v8470_v40  ;;  %v5057_v37 = vpop.f32.mrf.mxu1  ;;  %v9281_v40 = vld [vmem:[#allocation8 + $0x768] sm:$0xf] }
 0x2f2   :  { %5251 = vmatmul.bf16.vlgmr.msrb.gmra.mxu3 %v11425_v26  ;;  %v9330_v26 = vor.u32 %v10610_v5, %v9329_v4  ;;  %v9282_v18 = vor.u32 %v10598_v50, %v9281_v40  ;;  %v10524_v4 = vld [vmem:[#allocation8 + $0x52c] sm:$0xf]  ;;  %v8995_v5 = vld [vmem:[#allocation8 + $0x538] sm:$0xf0] }
 0x2f3   :  { %5295 = vmatpush.bf16.msra.mxu3 %v8966_v61  ;;  %v10496_v61 = vld [vmem:[#allocation8 + $0x44c] sm:$0xf]  ;;  %5273 = vmatpush.bf16.msra.mxu2 %v8646_v23  ;;  %v8998_v25 = vor.u32 %v10524_v4, %v8995_v5  ;;  %v9465_v4 = vld [vmem:[#allocation11 + $0xe0] sm:$0xf] }
 0x2f4   :  { %5264 = vmatmul.bf16.vlgmr.msra.gmra.mxu1 %v11440_v54  ;;  %v8899_v54 = vld [vmem:[#allocation8 + $0x478] sm:$0xf0]  ;;  %5231 = vmatpush.bf16.msra.mxu0 %v9330_v26  ;;  %v8886_v45 = vor.u32 %v10496_v61, %v8883_v36  ;;  %v9409_v26 = vld [vmem:[#allocation11 + $0x70] sm:$0xf]  ;;  %v10572_v36 = vld [vmem:[#allocation8 + $0x6ac] sm:$0xf] }
 0x2f5   :  { %5308 = vmatpush.bf16.msrb.mxu1 %v9094_v51  ;;  %v8902_v63 = vor.u32 %v10500_v20, %v8899_v54  ;;  %v8611_v51 = vld [vmem:[#allocation8 + $0x238] sm:$0xf0]  ;;  %v5044_v58 = vpop.f32.mrf.mxu3  ;;  %v10576_v54 = vld [vmem:[#allocation8 + $0x6cc] sm:$0xf]  ;;  %v9410_v23 = vor.u32 %v10630_v8, %v9409_v26 }
 0x2f6   :  { %v5045_v60 = vadd.f32 %v5044_v58, %v3644_v38  ;;  %v8614_v33 = vor.u32 %v10428_v44, %v8611_v51  ;;  %v8835_v61 = vld [vmem:[#allocation8 + $0x3f8] sm:$0xf0]  ;;  %v9402_v38 = vor.u32 %v10628_v27, %v9401_v24  ;;  %v10480_v44 = vld [vmem:[#allocation8 + $0x3cc] sm:$0xf]  ;;  %v9361_v27 = vld [vmem:[#allocation11 + $0x10] sm:$0xf] }
 0x2f7   :  { %5296 = vmatpush.bf16.msra.mxu3 %v8950_v13  ;;  %v10492_v13 = vld [vmem:[#allocation8 + $0x42c] sm:$0xf]  ;;  %5274 = vmatpush.bf16.msra.mxu2 %v8630_v57  ;;  %v9393_v57 = vld [vmem:[#allocation11 + $0x50] sm:$0xf]  ;;  %v8838_v40 = vor.u32 %v10484_v47, %v8835_v61 }
 0x2f8   :  { %5232 = vmatpush.bf16.msra.mxu0 %v9314_v41  ;;  %v9203_v41 = vld [vmem:[#allocation8 + $0x6d8] sm:$0xf0]  ;;  %v10568_v51 = vld [vmem:[#allocation8 + $0x68c] sm:$0xf] }
 0x2f9   :  { %5309 = vmatpush.bf16.msrb.mxu1 %v9078_v32  ;;  %v8870_v32 = vor.u32 %v10492_v13, %v8867_v49  ;;  %v5059_v12 = vpop.f32.mrf.mxu1  ;;  %v9206_v31 = vor.u32 %v10576_v54, %v9203_v41  ;;  %v10624_v58 = vld [vmem:[#allocation11 + $0x44] sm:$0xf0]  ;;  %v9473_v49 = vld [vmem:[#allocation11 + $0xf0] sm:$0xf] }
 0x2fa   :  { %v10644_v5 = vld [vmem:[#allocation11 + $0xe4] sm:$0xf0] }
 0x2fb   :  { %5297 = vmatpush.bf16.msra.mxu3 %v8934_v22  ;;  %v11519_v22 = vadd.f32 %v5057_v37, %v5045_v60  ;;  %5275 = vmatpush.bf16.msra.mxu2 %v8614_v33  ;;  %v9187_v37 = vld [vmem:[#allocation8 + $0x6b8] sm:$0xf0]  ;;  %v9466_v10 = vor.u32 %v10644_v5, %v9465_v4  ;;  %v10560_v12 = vld [vmem:[#allocation8 + $0x64c] sm:$0xf] }
 0x2fc   :  { %5233 = vmatpush.bf16.msra.mxu0 %v9298_v39  ;;  %v9190_v50 = vor.u32 %v10572_v36, %v9187_v37  ;;  %v10646_v60 = vld [vmem:[#allocation11 + $0xf4] sm:$0xf0]  ;;  %v10556_v41 = vld [vmem:[#allocation8 + $0x62c] sm:$0xf] }
 0x2fd   :  { %5310 = vmatpush.bf16.msrb.mxu1 %v9062_v14  ;;  %v8598_v14 = vor.u32 %v10424_v62, %v8595_v1  ;;  %v5046_v20 = vpop.f32.mrf.mxu3  ;;  %v9474_v33 = vor.u32 %v10646_v60, %v9473_v49  ;;  %v9377_v1 = vld [vmem:[#allocation11 + $0x30] sm:$0xf]  ;;  %v10464_v61 = vld [vmem:[#allocation8 + $0x34c] sm:$0xf]  ;;  %v8755_v36 = vld [vmem:[#allocation8 + $0x358] sm:$0xf0] }
 0x2fe   :  { %v8771_v20 = vld [vmem:[#allocation8 + $0x378] sm:$0xf0]  ;;  %v10612_v5 = vld [vmem:[#allocation8 + $0x7ec] sm:$0xf] }
 0x2ff   :  { %5298 = vmatpush.bf16.msra.mxu3 %v8918_v56  ;;  %v9222_v56 = vor.u32 %v10580_v7, %v9219_v11  ;;  %5276 = vmatpush.bf16.msra.mxu2 %v8598_v14  ;;  %v10472_v11 = vld [vmem:[#allocation8 + $0x38c] sm:$0xf]  ;;  %v9369_v14 = vld [vmem:[#allocation11 + $0x20] sm:$0xf]  ;;  %v8739_v49 = vld [vmem:[#allocation8 + $0x338] sm:$0xf0] }
 0x300   :  { %5234 = vmatpush.bf16.msra.mxu0 %v9282_v18  ;;  %v10476_v18 = vld [vmem:[#allocation8 + $0x3ac] sm:$0xf] }
 0x301   :  { %5311 = vmatpush.bf16.msrb.mxu1 %v9046_v30  ;;  %v9250_v30 = vor.u32 %v10590_v59, %v9249_v15  ;;  %v8790_v59 = vor.u32 %v10472_v11, %v8787_v29 }
 0x302   :  { %5277 = vmatmul.bf16.vlgmr.msra.gmra.mxu2 %v11442_v43  ;;  %v9385_v43 = vld [vmem:[#allocation11 + $0x40] sm:$0xf] }
 0x303   :  { %5299 = vmatpush.bf16.msra.mxu3 %v8902_v63  ;;  %v9233_v63 = vld [vmem:[#allocation8 + $0x708] sm:$0xf]  ;;  %5321 = vmatpush.bf16.msrb.mxu2 %v9222_v56  ;;  %v9386_v62 = vor.u32 %v10624_v58, %v9385_v43  ;;  %v11525_v8 = vpop.f32.mrf.mxu2  ;;  %v9457_v56 = vld [vmem:[#allocation11 + $0xd0] sm:$0xf]  ;;  %v10638_v43 = vld [vmem:[#allocation11 + $0xb4] sm:$0xf0] }
 0x304   :  { %5235 = vmatpush.bf16.msra.mxu0 %v9266_v6  ;;  %v9234_v39 = vor.u32 %v10586_v34, %v9233_v63  ;;  %v9139_v6 = vld [vmem:[#allocation8 + $0x658] sm:$0xf0]  ;;  %v8774_v63 = vor.u32 %v10468_v21, %v8771_v20  ;;  %v9449_v34 = vld [vmem:[#allocation11 + $0xc0] sm:$0xf]  ;;  %v10623_v21 = vld [vmem:[#allocation11 + $0x44] sm:$0xf] }
 0x305   :  { %5312 = vmatpush.bf16.msrb.mxu1 %v9030_v46  ;;  %v10626_v46 = vld [vmem:[#allocation11 + $0x54] sm:$0xf0]  ;;  %v9142_v17 = vor.u32 %v10560_v12, %v9139_v6  ;;  %v9395_v6 = vld [vmem:[#allocation11 + $0x58] sm:$0xf0]  ;;  %v9387_v20 = vld [vmem:[#allocation11 + $0x48] sm:$0xf0] }
 0x306   :  { %v9394_v55 = vor.u32 %v10626_v46, %v9393_v57 }
 0x307   :  { %5300 = vmatpush.bf16.msra.mxu3 %v8886_v45  ;;  %5322 = vmatpush.bf16.msrb.mxu2 %v9206_v31  ;;  %v8819_v45 = vld [vmem:[#allocation8 + $0x3d8] sm:$0xf0]  ;;  %v10640_v31 = vld [vmem:[#allocation11 + $0xc4] sm:$0xf0] }
 0x308   :  { %5236 = vmatpush.bf16.msra.mxu0 %v9250_v30  ;;  %v8822_v13 = vor.u32 %v10480_v44, %v8819_v45  ;;  %v9450_v37 = vor.u32 %v10640_v31, %v9449_v34  ;;  %v10629_v44 = vld [vmem:[#allocation11 + $0x74] sm:$0xf] }
 0x309   :  { %5313 = vmatpush.bf16.msrb.mxu1 %v9014_v2  ;;  %v10564_v2 = vld [vmem:[#allocation8 + $0x66c] sm:$0xf] }
 0x30a   :  { %v9158_v7 = vor.u32 %v10564_v2, %v9155_v42  ;;  %v9403_v42 = vld [vmem:[#allocation11 + $0x68] sm:$0xf0] }
 0x30b   :  { %5301 = vmatpush.bf16.msra.mxu3 %v8870_v32  ;;  %5323 = vmatpush.bf16.msrb.mxu2 %v9190_v50  ;;  %v10622_v32 = vld [vmem:[#allocation11 + $0x34] sm:$0xf0]  ;;  %v5020_v46 = vpop.f32.mrf.mxu2  ;;  %v10616_v50 = vld [vmem:[#allocation11 + $0x4] sm:$0xf0] }
 0x30c   :  { %5237 = vmatpush.bf16.msra.mxu0 %v9234_v39  ;;  %v9378_v26 = vor.u32 %v10622_v32, %v9377_v1  ;;  %v9107_v39 = vld [vmem:[#allocation8 + $0x618] sm:$0xf0]  ;;  %v10636_v1 = vld [vmem:[#allocation11 + $0xa4] sm:$0xf0] }
 0x30d   :  { %5314 = vmatpush.bf16.msrb.mxu1 %v8998_v25  ;;  %v10620_v25 = vld [vmem:[#allocation11 + $0x24] sm:$0xf0]  ;;  %v9299_v46 = vld [vmem:[#allocation8 + $0x798] sm:$0xf0] }
 0x30e   :  { %v9370_v30 = vor.u32 %v10620_v25, %v9369_v14  ;;  %v10456_v32 = vld [vmem:[#allocation8 + $0x30c] sm:$0xf]  ;;  %v10634_v14 = vld [vmem:[#allocation11 + $0x94] sm:$0xf0] }
 0x30f   :  { %5302 = vmatpush.bf16.msra.mxu3 %v8854_v0  ;;  %5238 = vmatmul.bf16.vlgmr.msra.gmra.mxu0 %v11497_v9  ;;  %v10642_v0 = vld [vmem:[#allocation11 + $0xd4] sm:$0xf0] }
 0x310   :  { %5282 = vmatpush.bf16.msrb.mxu0 %v8838_v40  ;;  %v9458_v54 = vor.u32 %v10642_v0, %v9457_v56  ;;  %v9353_v40 = vld [vmem:[#allocation11] sm:$0xf]  ;;  %v10608_v56 = vld [vmem:[#allocation8 + $0x7cc] sm:$0xf]  ;;  %v9331_v0 = vld [vmem:[#allocation8 + $0x7d8] sm:$0xf0] }
 0x311   :  { %5315 = vmatpush.bf16.msrb.mxu1 %v8982_v28  ;;  %v11527_v15 = vpop.f32.mrf.mxu1  ;;  %v10618_v28 = vld [vmem:[#allocation11 + $0x14] sm:$0xf0] }
 0x312   :  { %5303 = vmatmul.bf16.vlgmr.msra.gmra.mxu3 %v11458_v16  ;;  %v9174_v16 = vor.u32 %v10568_v51, %v9171_v53  ;;  %v9362_v57 = vor.u32 %v10618_v28, %v9361_v27  ;;  %v8758_v51 = vor.u32 %v10464_v61, %v8755_v36  ;;  %v9411_v53 = vld [vmem:[#allocation11 + $0x78] sm:$0xf0]  ;;  %v10604_v28 = vld [vmem:[#allocation8 + $0x7ac] sm:$0xf]  ;;  %v10621_v61 = vld [vmem:[#allocation11 + $0x34] sm:$0xf] }
 0x313   :  { %5753 = vmatpush.bf16.msrb.mxu3 %v9410_v23  ;;  %v9123_v23 = vld [vmem:[#allocation8 + $0x638] sm:$0xf0]  ;;  %v11531_v11 = vpop.f32.mrf.mxu2  ;;  %v9475_v27 = vld [vmem:[#allocation11 + $0xf8] sm:$0xf0] }
 0x314   :  { %5316 = vmatmul.bf16.vlgmr.msrb.gmra.mxu1 %v11461_v35  ;;  %5283 = vmatpush.bf16.msrb.mxu0 %v8822_v13  ;;  %v8806_v35 = vor.u32 %v10476_v18, %v8803_v19  ;;  %v9126_v47 = vor.u32 %v10556_v41, %v9123_v23  ;;  %v10460_v13 = vld [vmem:[#allocation8 + $0x32c] sm:$0xf]  ;;  %v9414_v19 = vor.u32 %v10629_v44, %v9411_v53  ;;  %v9379_v36 = vld [vmem:[#allocation11 + $0x38] sm:$0xf0] }
 0x315   :  { %5766 = vmatpush.bf16.msra.mxu1 %v9474_v33  ;;  %5324 = vmatpush.bf16.msrb.mxu2 %v9174_v16  ;;  %v11529_v24 = vpop.f32.mrf.mxu3  ;;  %v9354_v16 = vor.u32 %v10616_v50, %v9353_v40  ;;  %v10627_v33 = vld [vmem:[#allocation11 + $0x64] sm:$0xf]  ;;  %v8742_v2 = vor.u32 %v10460_v13, %v8739_v49  ;;  %v10632_v41 = vld [vmem:[#allocation11 + $0x84] sm:$0xf0]  ;;  %v9334_v23 = vor.u32 %v10608_v56, %v9331_v0  ;;  %v10641_v13 = vld [vmem:[#allocation11 + $0xd4] sm:$0xf] }
 0x316   :  { %v9406_v29 = vor.u32 %v10627_v33, %v9403_v42  ;;  %v9382_v50 = vor.u32 %v10621_v61, %v9379_v36  ;;  %v5019_v44 = vadd.f32 %v11525_v8, %v11512_v52  ;;  %v9459_v49 = vld [vmem:[#allocation11 + $0xd8] sm:$0xf0]  ;;  %v10617_v8 = vld [vmem:[#allocation11 + $0x14] sm:$0xf]  ;;  %v10584_v61 = vld [vmem:[#allocation8 + $0x70c] sm:$0xf] }
 0x317   :  { %5754 = vmatpush.bf16.msrb.mxu3 %v9402_v38  ;;  %v10552_v38 = vld [vmem:[#allocation8 + $0x60c] sm:$0xf]  ;;  %v9235_v36 = vld [vmem:[#allocation8 + $0x718] sm:$0xf0] }
 0x318   :  { %5284 = vmatpush.bf16.msrb.mxu0 %v8806_v35  ;;  %v9110_v58 = vor.u32 %v10552_v38, %v9107_v39  ;;  %v8723_v35 = vld [vmem:[#allocation8 + $0x318] sm:$0xf0]  ;;  %v10643_v38 = vld [vmem:[#allocation11 + $0xe4] sm:$0xf]  ;;  %v9467_v39 = vld [vmem:[#allocation11 + $0xe8] sm:$0xf0] }
 0x319   :  { %5767 = vmatpush.bf16.msra.mxu1 %v9466_v10  ;;  %5325 = vmatpush.bf16.msrb.mxu2 %v9158_v7  ;;  %v5111_v45 = vpop.f32.mrf.mxu1  ;;  %v9347_v7 = vld [vmem:[#allocation8 + $0x7f8] sm:$0xf0]  ;;  %v10625_v10 = vld [vmem:[#allocation11 + $0x54] sm:$0xf]  ;;  %v8726_v12 = vor.u32 %v10456_v32, %v8723_v35  ;;  %v9470_v40 = vor.u32 %v10643_v38, %v9467_v39  ;;  %v10639_v35 = vld [vmem:[#allocation11 + $0xc4] sm:$0xf] }
 0x31a   :  { %v9350_v25 = vor.u32 %v10612_v5, %v9347_v7  ;;  %v10619_v45 = vld [vmem:[#allocation11 + $0x24] sm:$0xf]  ;;  %v10592_v7 = vld [vmem:[#allocation8 + $0x74c] sm:$0xf]  ;;  %v10633_v38 = vld [vmem:[#allocation11 + $0x94] sm:$0xf] }
 0x31b   :  { %5755 = vmatpush.bf16.msrb.mxu3 %v9394_v55  ;;  %v9441_v55 = vld [vmem:[#allocation11 + $0xb0] sm:$0xf]  ;;  %v5072_v31 = vpop.f32.mrf.mxu2  ;;  %v9427_v39 = vld [vmem:[#allocation11 + $0x98] sm:$0xf0] }
 0x31c   :  { %5285 = vmatpush.bf16.msrb.mxu0 %v8790_v59  ;;  %v9442_v60 = vor.u32 %v10638_v43, %v9441_v55  ;;  %v11537_v55 = vld [vmem:[#allocation10] sm:$0xf] }
 0x31d   :  { %5768 = vmatpush.bf16.msra.mxu1 %v9458_v54  ;;  %5326 = vmatpush.bf16.msrb.mxu2 %v9142_v17  ;;  %v5098_v18 = vpop.f32.mrf.mxu3  ;;  %v9398_v17 = vor.u32 %v10625_v10, %v9395_v6  ;;  %v9417_v54 = vld [vmem:[#allocation11 + $0x80] sm:$0xf]  ;;  %v3645_v43 = vperm.slane %v11537_v55, 2 }
 0x31e   :  { %v9283_v18 = vld [vmem:[#allocation8 + $0x778] sm:$0xf0] }
 0x31f   :  { %5756 = vmatpush.bf16.msrb.mxu3 %v9386_v62  ;;  %v9433_v62 = vld [vmem:[#allocation11 + $0xa0] sm:$0xf] }
 0x320   :  { %5286 = vmatpush.bf16.msrb.mxu0 %v8774_v63  ;;  %v9434_v4 = vor.u32 %v10636_v1, %v9433_v62  ;;  %v9315_v63 = vld [vmem:[#allocation8 + $0x7b8] sm:$0xf0]  ;;  %v9363_v62 = vld [vmem:[#allocation11 + $0x18] sm:$0xf0] }
 0x321   :  { %5769 = vmatpush.bf16.msra.mxu1 %v9450_v37  ;;  %5327 = vmatpush.bf16.msrb.mxu2 %v9126_v47  ;;  %v9390_v47 = vor.u32 %v10623_v21, %v9387_v20  ;;  %v9318_v37 = vor.u32 %v10604_v28, %v9315_v63  ;;  %v9366_v6 = vor.u32 %v10617_v8, %v9363_v62  ;;  %v9443_v21 = vld [vmem:[#allocation11 + $0xb8] sm:$0xf0]  ;;  %v10588_v20 = vld [vmem:[#allocation8 + $0x72c] sm:$0xf]  ;;  %v9537_v28 = vld [vmem:[#allocation11 + $0x170] sm:$0xf] }
 0x322   :  { %v10662_v63 = vld [vmem:[#allocation11 + $0x174] sm:$0xf0]  ;;  %v9513_v8 = vld [vmem:[#allocation11 + $0x140] sm:$0xf] }
 0x323   :  { %5757 = vmatpush.bf16.msrb.mxu3 %v9378_v26  ;;  %v9425_v26 = vld [vmem:[#allocation11 + $0x90] sm:$0xf]  ;;  %v11540_v33 = vpop.f32.mrf.mxu2  ;;  %v9538_v31 = vor.u32 %v10662_v63, %v9537_v28  ;;  %v9523_v28 = vld [vmem:[#allocation11 + $0x158] sm:$0xf0] }
 0x324   :  { %5287 = vmatpush.bf16.msrb.mxu0 %v8758_v51  ;;  %v9426_v59 = vor.u32 %v10634_v14, %v9425_v26  ;;  %v10615_v14 = vld [vmem:[#allocation11 + $0x4] sm:$0xf] }
 0x325   :  { %5770 = vmatpush.bf16.msra.mxu1 %v9442_v60  ;;  %5328 = vmatpush.bf16.msrb.mxu2 %v9110_v58 }
 0x327   :  { %5758 = vmatpush.bf16.msrb.mxu3 %v9370_v30  ;;  %v10645_v30 = vld [vmem:[#allocation11 + $0xf4] sm:$0xf]  ;;  %v5031_v53 = vpop.f32.mrf.mxu0 }
 0x328   :  { %5329 = vmatmul.bf16.vlgmr.msrb.gmra.mxu2 %v11486_v3  ;;  %5288 = vmatpush.bf16.msrb.mxu0 %v8742_v2  ;;  %v9418_v3 = vor.u32 %v10632_v41, %v9417_v54  ;;  %v9478_v34 = vor.u32 %v10645_v30, %v9475_v27  ;;  %v5032_v60 = vadd.f32 %v5031_v53, %v5019_v44  ;;  %v9251_v54 = vld [vmem:[#allocation8 + $0x738] sm:$0xf0]  ;;  %v9435_v27 = vld [vmem:[#allocation11 + $0xa8] sm:$0xf0]  ;;  %v10631_v44 = vld [vmem:[#allocation11 + $0x84] sm:$0xf] }
 0x329   :  { %5771 = vmatpush.bf16.msra.mxu1 %v9434_v4  ;;  %v9451_v4 = vld [vmem:[#allocation11 + $0xc8] sm:$0xf0]  ;;  %5779 = vmatpush.bf16.msra.mxu2 %v9538_v31 }
 0x32a   :  { %vm5347_vm11 = vcmp.gt.f32.partialorder %v5032_v60, 0.0  ;;  %v5351_v2 = vmul.f32 0.01, %v5032_v60  ;;  %v9454_v10 = vor.u32 %v10639_v35, %v9451_v4 }
 0x32b   :  { %5759 = vmatpush.bf16.msrb.mxu3 %v9362_v57  ;;  %v10600_v57 = vld [vmem:[#allocation8 + $0x78c] sm:$0xf] }
 0x32c   :  { %5289 = vmatpush.bf16.msrb.mxu0 %v8726_v12  ;;  %v9302_v58 = vor.u32 %v10600_v57, %v9299_v46  ;;  %v5355_v5 = vsel %vm5347_vm11, %v5032_v60, %v5351_v2  ;;  %v9238_v46 = vor.u32 %v10584_v61, %v9235_v36  ;;  %v10658_v60 = vld [vmem:[#allocation11 + $0x154] sm:$0xf0]  ;;  %v10656_v2 = vld [vmem:[#allocation11 + $0x144] sm:$0xf0] }
 0x32d   :  { %5772 = vmatpush.bf16.msra.mxu1 %v9426_v59  ;;  %v5359_v12 = vpack.c.bf16 %v5355_v5, %v5355_v5  ;;  %v9514_v62 = vor.u32 %v10656_v2, %v9513_v8 }
 0x32f   :  { %5760 = vmatpush.bf16.msrb.mxu3 %v9354_v16  ;;  %5290 = vmatmul.bf16.vlgmr.msrb.gmra.mxu0 %v11447_v48  ;;  %v9371_v48 = vld [vmem:[#allocation11 + $0x28] sm:$0xf0]  ;;  %v10596_v16 = vld [vmem:[#allocation8 + $0x76c] sm:$0xf]  ;;  %v5033_v56 = vpop.f32.mrf.mxu0 }
 0x330   :  { %5334 = vmatpush.bf16.msra.mxu0 %v9350_v25  ;;  %v9374_v52 = vor.u32 %v10619_v45, %v9371_v48  ;;  %v9286_v32 = vor.u32 %v10596_v16, %v9283_v18  ;;  %v9355_v25 = vld [vmem:[#allocation11 + $0x8] sm:$0xf0] }
 0x331   :  { %5773 = vmatpush.bf16.msra.mxu1 %v9418_v3  ;;  %v5161_v51 = vpop.f32.mrf.mxu1  ;;  %v5124_v3 = vpop.f32.mrf.mxu2  ;;  %v9358_v30 = vor.u32 %v10615_v14, %v9355_v25  ;;  %v9419_v45 = vld [vmem:[#allocation11 + $0x88] sm:$0xf0]  ;;  %v9489_v25 = vld [vmem:[#allocation11 + $0x110] sm:$0xf] }
 0x332   :  { %5761 = vmatmul.bf16.vlgmr.msrb.gmra.mxu3 %v5359_v12  ;;  %v9531_v3 = vld [vmem:[#allocation11 + $0x168] sm:$0xf0] }
 0x333   :  { %5805 = vmatpush.bf16.msra.mxu3 %v9414_v19  ;;  %v9462_v19 = vor.u32 %v10641_v13, %v9459_v49  ;;  %v10660_v13 = vld [vmem:[#allocation11 + $0x164] sm:$0xf0] }
 0x334   :  { %5335 = vmatpush.bf16.msra.mxu0 %v9334_v23  ;;  %v10635_v23 = vld [vmem:[#allocation11 + $0xa4] sm:$0xf] }
 0x335   :  { %5818 = vmatpush.bf16.msrb.mxu1 %v9478_v34  ;;  %v5148_v42 = vpop.f32.mrf.mxu3 }
 0x336   :  { %v5149_v1 = vadd.f32 %v5148_v42, %v3645_v43 }
 0x337   :  { %5806 = vmatpush.bf16.msra.mxu3 %v9406_v29  ;;  %v9267_v29 = vld [vmem:[#allocation8 + $0x758] sm:$0xf0]  ;;  %v5083_v57 = vpop.f32.mrf.mxu0 }
 0x338   :  { %5336 = vmatpush.bf16.msra.mxu0 %v9318_v37  ;;  %v11542_v26 = vadd.f32 %v5161_v51, %v5149_v1  ;;  %v9270_v0 = vor.u32 %v10592_v7, %v9267_v29  ;;  %v9438_v37 = vor.u32 %v10635_v23, %v9435_v27  ;;  %v9422_v51 = vor.u32 %v10631_v44, %v9419_v45  ;;  %v9505_v1 = vld [vmem:[#allocation11 + $0x130] sm:$0xf]  ;;  %v9497_v7 = vld [vmem:[#allocation11 + $0x120] sm:$0xf]  ;;  %v10652_v29 = vld [vmem:[#allocation11 + $0x124] sm:$0xf0] }
 0x339   :  { %5819 = vmatpush.bf16.msrb.mxu1 %v9470_v40  ;;  %v5163_v59 = vpop.f32.mrf.mxu1  ;;  %v5071_v40 = vadd.f32 %v11531_v11, %v11519_v22  ;;  %v9521_v11 = vld [vmem:[#allocation11 + $0x150] sm:$0xf]  ;;  %v10659_v23 = vld [vmem:[#allocation11 + $0x164] sm:$0xf]  ;;  %v10657_v27 = vld [vmem:[#allocation11 + $0x154] sm:$0xf] }
 0x33a   :  { %v9522_v18 = vor.u32 %v10658_v60, %v9521_v11  ;;  %v10650_v59 = vld [vmem:[#allocation11 + $0x114] sm:$0xf0]  ;;  %v9526_v31 = vor.u32 %v10657_v27, %v9523_v28  ;;  %v9491_v11 = vld [vmem:[#allocation11 + $0x118] sm:$0xf0]  ;;  %v9553_v27 = vld [vmem:[#allocation11 + $0x190] sm:$0xf] }
 0x33b   :  { %5807 = vmatpush.bf16.msra.mxu3 %v9398_v17  ;;  %v10637_v17 = vld [vmem:[#allocation11 + $0xb4] sm:$0xf]  ;;  %v5084_v48 = vadd.f32 %v5083_v57, %v5071_v40  ;;  %v9490_v56 = vor.u32 %v10650_v59, %v9489_v25  ;;  %v10670_v59 = vld [vmem:[#allocation11 + $0x1b4] sm:$0xf0] }
 0x33c   :  { %5337 = vmatpush.bf16.msra.mxu0 %v9302_v58  ;;  %v9446_v41 = vor.u32 %v10637_v17, %v9443_v21  ;;  %v9529_v58 = vld [vmem:[#allocation11 + $0x160] sm:$0xf]  ;;  %v10648_v17 = vld [vmem:[#allocation11 + $0x104] sm:$0xf0]  ;;  %v10661_v21 = vld [vmem:[#allocation11 + $0x174] sm:$0xf] }
 0x33d   :  { %5820 = vmatpush.bf16.msrb.mxu1 %v9462_v19  ;;  %v5150_v34 = vpop.f32.mrf.mxu3  ;;  %v5097_v53 = vadd.f32 %v11529_v24, %v5084_v48  ;;  %v9530_v49 = vor.u32 %v10660_v13, %v9529_v58  ;;  %v10653_v40 = vld [vmem:[#allocation11 + $0x134] sm:$0xf]  ;;  %v10651_v48 = vld [vmem:[#allocation11 + $0x124] sm:$0xf]  ;;  %v10678_v58 = vld [vmem:[#allocation11 + $0x1f4] sm:$0xf0] }
 0x33e   :  { %v3646_v34 = vperm.slane %v11537_v55, 3  ;;  %v10666_v28 = vld [vmem:[#allocation11 + $0x194] sm:$0xf0] }
 0x33f   :  { %5808 = vmatpush.bf16.msra.mxu3 %v9390_v47  ;;  %v9254_v47 = vor.u32 %v10588_v20, %v9251_v54  ;;  %v5085_v43 = vpop.f32.mrf.mxu0  ;;  %v5110_v22 = vadd.f32 %v11527_v15, %v5097_v53  ;;  %5780 = vmatpush.bf16.msra.mxu2 %v9530_v49  ;;  %v9539_v20 = vld [vmem:[#allocation11 + $0x178] sm:$0xf0] }
 0x340   :  { %5338 = vmatpush.bf16.msra.mxu0 %v9286_v32  ;;  %v10654_v32 = vld [vmem:[#allocation11 + $0x134] sm:$0xf0]  ;;  %v9601_v43 = vld [vmem:[#allocation11 + $0x1f0] sm:$0xf] }
 0x341   :  { %5821 = vmatpush.bf16.msrb.mxu1 %v9454_v10  ;;  %v5123_v24 = vadd.f32 %v11540_v33, %v5110_v22  ;;  %v9506_v5 = vor.u32 %v10654_v32, %v9505_v1  ;;  %v10649_v22 = vld [vmem:[#allocation11 + $0x114] sm:$0xf]  ;;  %v9602_v60 = vor.u32 %v10678_v58, %v9601_v43  ;;  %v10676_v1 = vld [vmem:[#allocation11 + $0x1e4] sm:$0xf0]  ;;  %v9571_v58 = vld [vmem:[#allocation11 + $0x1b8] sm:$0xf0] }
 0x342   :  { %v10669_v43 = vld [vmem:[#allocation11 + $0x1b4] sm:$0xf] }
 0x343   :  { %5809 = vmatpush.bf16.msra.mxu3 %v9382_v50  ;;  %v9430_v50 = vor.u32 %v10633_v38, %v9427_v39  ;;  %5781 = vmatpush.bf16.msra.mxu2 %v9522_v18  ;;  %v9515_v38 = vld [vmem:[#allocation11 + $0x148] sm:$0xf0]  ;;  %v9494_v18 = vor.u32 %v10649_v22, %v9491_v11 }
 0x344   :  { %5339 = vmatpush.bf16.msra.mxu0 %v9270_v0  ;;  %v11551_v19 = vpop.f32.mrf.mxu2  ;;  %v9481_v0 = vld [vmem:[#allocation11 + $0x100] sm:$0xf]  ;;  %v9563_v22 = vld [vmem:[#allocation11 + $0x1a8] sm:$0xf0] }
 0x345   :  { %5822 = vmatpush.bf16.msrb.mxu1 %v9446_v41  ;;  %v9482_v54 = vor.u32 %v10648_v17, %v9481_v0  ;;  %v9542_v41 = vor.u32 %v10661_v21, %v9539_v20  ;;  %v5175_v8 = vadd.f32 %v11551_v19, %v11542_v26  ;;  %v9561_v21 = vld [vmem:[#allocation11 + $0x1a0] sm:$0xf]  ;;  %v10668_v20 = vld [vmem:[#allocation11 + $0x1a4] sm:$0xf0] }
 0x347   :  { %5810 = vmatpush.bf16.msra.mxu3 %v9374_v52  ;;  %5782 = vmatpush.bf16.msra.mxu2 %v9514_v62 }
 0x348   :  { %5340 = vmatpush.bf16.msra.mxu0 %v9254_v47  ;;  %v5135_v52 = vpop.f32.mrf.mxu0 }
 0x349   :  { %5823 = vmatpush.bf16.msrb.mxu1 %v9438_v37  ;;  %v5136_v42 = vadd.f32 %v5135_v52, %v5123_v24  ;;  %v10655_v37 = vld [vmem:[#allocation11 + $0x144] sm:$0xf]  ;;  %v9483_v52 = vld [vmem:[#allocation11 + $0x108] sm:$0xf0] }
 0x34a   :  { %v9518_v57 = vor.u32 %v10655_v37, %v9515_v38  ;;  %v10647_v24 = vld [vmem:[#allocation11 + $0x104] sm:$0xf] }
 0x34b   :  { %5811 = vmatpush.bf16.msra.mxu3 %v9366_v6  ;;  %vm5348_vm12 = vcmp.gt.f32.partialorder %v5136_v42, 0.0  ;;  %v5352_v15 = vmul.f32 0.01, %v5136_v42  ;;  %5783 = vmatpush.bf16.msra.mxu2 %v9506_v5  ;;  %v9486_v2 = vor.u32 %v10647_v24, %v9483_v52  ;;  %v10674_v5 = vld [vmem:[#allocation11 + $0x1d4] sm:$0xf0] }
 0x34c   :  { %5341 = vmatpush.bf16.msra.mxu0 %v9238_v46  ;;  %v5176_v33 = vpop.f32.mrf.mxu2  ;;  %v10675_v38 = vld [vmem:[#allocation11 + $0x1e4] sm:$0xf]  ;;  %v10665_v24 = vld [vmem:[#allocation11 + $0x194] sm:$0xf]  ;;  %v9555_v52 = vld [vmem:[#allocation11 + $0x198] sm:$0xf0] }
 0x34d   :  { %5824 = vmatpush.bf16.msrb.mxu1 %v9430_v50  ;;  %v5356_v35 = vsel %vm5348_vm12, %v5136_v42, %v5352_v15  ;;  %v9507_v50 = vld [vmem:[#allocation11 + $0x138] sm:$0xf0]  ;;  %v9593_v15 = vld [vmem:[#allocation11 + $0x1e0] sm:$0xf] }
 0x34e   :  { %v5360_v10 = vpack.c.bf16 %v5356_v35, %v5356_v35  ;;  %v9510_v45 = vor.u32 %v10653_v40, %v9507_v50  ;;  %v9594_v32 = vor.u32 %v10676_v1, %v9593_v15  ;;  %v10673_v40 = vld [vmem:[#allocation11 + $0x1d4] sm:$0xf]  ;;  %v9587_v50 = vld [vmem:[#allocation11 + $0x1d8] sm:$0xf0] }
 0x34f   :  { %5812 = vmatpush.bf16.msra.mxu3 %v9358_v30  ;;  %5342 = vmatmul.bf16.vlgmr.msra.gmra.mxu0 %v11497_v9  ;;  %v9534_v30 = vor.u32 %v10659_v23, %v9531_v3  ;;  %v9562_v23 = vor.u32 %v10668_v20, %v9561_v21 }
 0x350   :  { %v5137_v14 = vpop.f32.mrf.mxu0  ;;  %5774 = vmatmul.bf16.vlgmr.msra.gmra.mxu1 %v5360_v10  ;;  %5792 = vmatpush.bf16.msrb.mxu0 %v9602_v60 }
 0x351   :  { %5825 = vmatpush.bf16.msrb.mxu1 %v9422_v51  ;;  %v11549_v16 = vpop.f32.mrf.mxu1  ;;  %v9499_v51 = vld [vmem:[#allocation11 + $0x128] sm:$0xf0] }
 0x352   :  { %5813 = vmatmul.bf16.vlgmr.msra.gmra.mxu3 %v5359_v12  ;;  %v9498_v12 = vor.u32 %v10652_v29, %v9497_v7  ;;  %v9502_v55 = vor.u32 %v10651_v48, %v9499_v51  ;;  %v10671_v51 = vld [vmem:[#allocation11 + $0x1c4] sm:$0xf] }
 0x354   :  { %5784 = vmatpush.bf16.msra.mxu2 %v9498_v12  ;;  %5793 = vmatpush.bf16.msrb.mxu0 %v9594_v32  ;;  %v9577_v12 = vld [vmem:[#allocation11 + $0x1c0] sm:$0xf] }
 0x355   :  { %v11554_v9 = vpop.f32.mrf.mxu3 }
 0x358   :  { %5785 = vmatpush.bf16.msra.mxu2 %v9490_v56 }
 0x359   :  { %v5215_v4 = vpop.f32.mrf.mxu1 }
 0x35a   :  { %v9585_v4 = vld [vmem:[#allocation11 + $0x1d0] sm:$0xf] }
 0x35b   :  { %v9586_v29 = vor.u32 %v10674_v5, %v9585_v4 }
 0x35c   :  { %5786 = vmatpush.bf16.msra.mxu2 %v9482_v54 }
 0x35d   :  { %v5202_v6 = vpop.f32.mrf.mxu3  ;;  %5794 = vmatpush.bf16.msrb.mxu0 %v9586_v29 }
 0x360   :  { %5831 = vmatpush.bf16.msrb.mxu2 %v9542_v41  ;;  %5826 = vmatmul.bf16.vlgmr.msrb.gmra.mxu1 %v5360_v10 }
 0x364   :  { %5832 = vmatpush.bf16.msrb.mxu2 %v9534_v30 }
 0x365   :  { %v5226_v47 = vpop.f32.mrf.mxu2 }
 0x368   :  { %5833 = vmatpush.bf16.msrb.mxu2 %v9526_v31  ;;  %v10664_v31 = vld [vmem:[#allocation11 + $0x184] sm:$0xf0] }
 0x36a   :  { %v5187_v61 = vpop.f32.mrf.mxu0 }
 0x36b   :  { %v5188_v42 = vadd.f32 %v5187_v61, %v5175_v8  ;;  %v10677_v61 = vld [vmem:[#allocation11 + $0x1f4] sm:$0xf]  ;;  %v9558_v8 = vor.u32 %v10665_v24, %v9555_v52 }
 0x36c   :  { %5834 = vmatpush.bf16.msrb.mxu2 %v9518_v57 }
 0x36d   :  { %v5228_v53 = vpop.f32.mrf.mxu2  ;;  %v5201_v62 = vadd.f32 %v11554_v9, %v5188_v42  ;;  %v10672_v9 = vld [vmem:[#allocation11 + $0x1c4] sm:$0xf0]  ;;  %v10663_v42 = vld [vmem:[#allocation11 + $0x184] sm:$0xf] }
 0x36e   :  { %v9578_v14 = vor.u32 %v10672_v9, %v9577_v12  ;;  %v9579_v53 = vld [vmem:[#allocation11 + $0x1c8] sm:$0xf0] }
 0x36f   :  { %v5214_v35 = vadd.f32 %v11549_v16, %v5201_v62  ;;  %v9569_v16 = vld [vmem:[#allocation11 + $0x1b0] sm:$0xf]  ;;  %v9547_v62 = vld [vmem:[#allocation11 + $0x188] sm:$0xf0] }
 0x370   :  { %5835 = vmatpush.bf16.msrb.mxu2 %v9510_v45  ;;  %5795 = vmatpush.bf16.msrb.mxu0 %v9578_v14  ;;  %v9570_v17 = vor.u32 %v10670_v59, %v9569_v16  ;;  %v9550_v1 = vor.u32 %v10663_v42, %v9547_v62  ;;  %v5427_v14 = vld [vmem:[#allocation13] sm:$0x3] }
 0x371   :  { %v5265_v63 = vpop.f32.mrf.mxu1  ;;  %v5227_v26 = vadd.f32 %v5226_v47, %v5214_v35 }
 0x372   :  { %v5189_v13 = vpop.f32.mrf.mxu0 }
 0x373   :  { %v9574_v13 = vor.u32 %v10669_v43, %v9571_v58 }
 0x374   :  { %5836 = vmatpush.bf16.msrb.mxu2 %v9502_v55  ;;  %5796 = vmatpush.bf16.msrb.mxu0 %v9570_v17  ;;  %v9582_v55 = vor.u32 %v10671_v51, %v9579_v53  ;;  %v10701_v51 = vld [vmem:[%s11643_s9 + $0x30] sm:$0xff]  ;;  %v10700_v53 = vld [vmem:[%s11643_s9 + $0x28] sm:$0xff] }
 0x375   :  { %v5252_v36 = vpop.f32.mrf.mxu3 }
 0x376   :  { %v5253_v39 = vadd.f32 %v5252_v36, %v3646_v34  ;;  %v9545_v34 = vld [vmem:[#allocation11 + $0x180] sm:$0xf]  ;;  %v9603_v36 = vld [vmem:[#allocation11 + $0x1f8] sm:$0xf0] }
 0x377   :  { %v9546_v47 = vor.u32 %v10664_v31, %v9545_v34  ;;  %v9606_v37 = vor.u32 %v10677_v61, %v9603_v36  ;;  %v10682_v34 = vld [vmem:[#allocation14 + $0x18] sm:$0xff]  ;;  %v10680_v36 = vld [vmem:[#allocation14 + $0x8] sm:$0xff] }
 0x378   :  { %v11557_v46 = vadd.f32 %v5265_v63, %v5253_v39  ;;  %5837 = vmatpush.bf16.msrb.mxu2 %v9494_v18  ;;  %5797 = vmatpush.bf16.msrb.mxu0 %v9562_v23  ;;  %v9554_v63 = vor.u32 %v10666_v28, %v9553_v27  ;;  %v9595_v39 = vld [vmem:[#allocation11 + $0x1e8] sm:$0xf0]  ;;  %v10694_v23 = vld [vmem:[#allocation14 + $0x78] sm:$0xff] }
 0x379   :  { %v5267_v44 = vpop.f32.mrf.mxu1  ;;  %v9598_v57 = vor.u32 %v10675_v38, %v9595_v39  ;;  %6010 = vmatpush.bf16.msra.mxu1 %v10694_v23  ;;  %v10684_v27 = vld [vmem:[#allocation14 + $0x28] sm:$0xff]  ;;  %v10679_v39 = vld [vmem:[#allocation14] sm:$0xff] }
 0x37a   :  { %v9590_v44 = vor.u32 %v10673_v40, %v9587_v50  ;;  %v10690_v40 = vld [vmem:[#allocation14 + $0x58] sm:$0xff]  ;;  %v10689_v50 = vld [vmem:[#allocation14 + $0x50] sm:$0xff] }
 0x37c   :  { %5838 = vmatpush.bf16.msrb.mxu2 %v9486_v2  ;;  %5798 = vmatpush.bf16.msrb.mxu0 %v9554_v63  ;;  %v10683_v63 = vld [vmem:[#allocation14 + $0x20] sm:$0xff] }
 0x37d   :  { %v5254_v49 = vpop.f32.mrf.mxu3 }
 0x37e   :  { %v10667_v49 = vld [vmem:[#allocation11 + $0x1a4] sm:$0xf] }
 0x37f   :  { %v9566_v60 = vor.u32 %v10667_v49, %v9563_v22 }
 0x380   :  { %5799 = vmatpush.bf16.msrb.mxu0 %v9546_v47  ;;  %v10681_v47 = vld [vmem:[#allocation14 + $0x10] sm:$0xff] }
 0x384   :  { %5844 = vmatpush.bf16.msra.mxu0 %v9606_v37  ;;  %v10692_v37 = vld [vmem:[#allocation14 + $0x68] sm:$0xff] }
 0x385   :  { %v11565_v10 = vpop.f32.mrf.mxu2 }
 0x386   :  { %v5279_v2 = vadd.f32 %v11565_v10, %v11557_v46 }
 0x388   :  { %5845 = vmatpush.bf16.msra.mxu0 %v9598_v57  ;;  %v10691_v57 = vld [vmem:[#allocation14 + $0x60] sm:$0xff] }
 0x38c   :  { %v5239_v19 = vpop.f32.mrf.mxu0  ;;  %5846 = vmatpush.bf16.msra.mxu0 %v9590_v44  ;;  %v10688_v44 = vld [vmem:[#allocation14 + $0x48] sm:$0xff] }
 0x38d   :  { %v5240_v6 = vadd.f32 %v5239_v19, %v5227_v26  ;;  %v5280_v41 = vpop.f32.mrf.mxu2 }
 0x38e   :  { %v10686_v41 = vld [vmem:[#allocation14 + $0x38] sm:$0xff] }
 0x38f   :  { %vm5349_vm13 = vcmp.gt.f32.partialorder %v5240_v6, 0.0  ;;  %v5353_v25 = vmul.f32 0.01, %v5240_v6  ;;  %5997 = vmatpush.bf16.msrb.mxu3 %v10686_v41  ;;  %v10745_v41 = vld [vmem:[#allocation19 + $0x14c] sm:$0xf0] }
 0x390   :  { %5847 = vmatpush.bf16.msra.mxu0 %v9582_v55 }
 0x391   :  { %v11563_v7 = vpop.f32.mrf.mxu1  ;;  %v5357_v56 = vsel %vm5349_vm13, %v5240_v6, %v5353_v25  ;;  %v5429_v25 = vperm.slane %v5427_v14, 0 }
 0x392   :  { %v5361_v54 = vpack.c.bf16 %v5357_v56, %v5357_v56 }
 0x394   :  { %v5241_v3 = vpop.f32.mrf.mxu0  ;;  %5787 = vmatmul.bf16.vlgmr.msra.gmra.mxu2 %v5361_v54  ;;  %5848 = vmatpush.bf16.msra.mxu0 %v9574_v13  ;;  %v10699_v13 = vld [vmem:[%s11643_s9 + $0x20] sm:$0xff] }
 0x395   :  { %v11567_v33 = vpop.f32.mrf.mxu3  ;;  %v10685_v3 = vld [vmem:[#allocation14 + $0x30] sm:$0xff] }
 0x396   :  { %5998 = vmatpush.bf16.msrb.mxu3 %v10685_v3 }
 0x398   :  { %5849 = vmatpush.bf16.msra.mxu0 %v9566_v60 }
 0x399   :  { %v5319_v0 = vpop.f32.mrf.mxu1 }
 0x39a   :  { %5999 = vmatpush.bf16.msrb.mxu3 %v10684_v27 }
 0x39c   :  { %5850 = vmatpush.bf16.msra.mxu0 %v9558_v8 }
 0x39d   :  { %v5306_v30 = vpop.f32.mrf.mxu3 }
 0x39e   :  { %v10693_v30 = vld [vmem:[#allocation14 + $0x70] sm:$0xff]  ;;  %6000 = vmatpush.bf16.msrb.mxu3 %v10683_v63 }
 0x39f   :  { %6011 = vmatpush.bf16.msra.mxu1 %v10693_v30  ;;  %v10790_v30 = vld [vmem:[#allocation16] ss:$0 sm:$0xff] }
 0x3a0   :  { %5851 = vmatpush.bf16.msra.mxu0 %v9550_v1  ;;  %v10697_v1 = vld [vmem:[%s11643_s9 + $0x10] sm:$0xff] }
 0x3a2   :  { %6001 = vmatpush.bf16.msrb.mxu3 %v10682_v34 }
 0x3a3   :  { %6012 = vmatpush.bf16.msra.mxu1 %v10692_v37  ;;  %v9769_v37 = vld [vmem:[#allocation19 + $0x80] sm:$0xf] }
 0x3a4   :  { %5839 = vmatmul.bf16.vlgmr.msrb.gmra.mxu2 %v5361_v54 }
 0x3a6   :  { %6002 = vmatpush.bf16.msrb.mxu3 %v10681_v47 }
 0x3a7   :  { %6013 = vmatpush.bf16.msra.mxu1 %v10691_v57 }
 0x3aa   :  { %6003 = vmatpush.bf16.msrb.mxu3 %v10680_v36 }
 0x3ab   :  { %v5330_v45 = vpop.f32.mrf.mxu2  ;;  %6014 = vmatpush.bf16.msra.mxu1 %v10690_v40  ;;  %v9771_v40 = vld [vmem:[#allocation19 + $0xc0] sm:$0xf0] }
 0x3ac   :  { %v5291_v48 = vpop.f32.mrf.mxu0 }
 0x3ad   :  { %v5292_v15 = vadd.f32 %v5291_v48, %v5279_v2  ;;  %v10702_v48 = vld [vmem:[%s11643_s9 + $0x38] sm:$0xff] }
 0x3ae   :  { %6004 = vmatpush.bf16.msrb.mxu3 %v10679_v39  ;;  %6095 = vmatpush.bf16.msra.mxu2 %v10702_v48  ;;  %v10719_v39 = vld [vmem:[#allocation19 + $0x84] sm:$0xf] }
 0x3af   :  { %v5305_v32 = vadd.f32 %v11567_v33, %v5292_v15  ;;  %6015 = vmatpush.bf16.msra.mxu1 %v10689_v50  ;;  %v10698_v15 = vld [vmem:[%s11643_s9 + $0x18] sm:$0xff] }
 0x3b0   :  { %v10720_v50 = vld [vmem:[#allocation19 + $0x8c] sm:$0xf] }
 0x3b1   :  { %v5318_v4 = vadd.f32 %v11563_v7, %v5305_v32  ;;  %v5430_v7 = vperm.slane %v5427_v14, 1  ;;  %v10696_v32 = vld [vmem:[%s11643_s9 + $0x8] sm:$0xff]  ;;  %v10761_v14 = vld [vmem:[#allocation19 + $0x1cc] sm:$0xf0] }
 0x3b2   :  { %6096 = vmatpush.bf16.msra.mxu2 %v10701_v51  ;;  %v9785_v51 = vld [vmem:[#allocation19 + $0x90] sm:$0xf] }
 0x3b3   :  { %v5332_v11 = vpop.f32.mrf.mxu2  ;;  %v5331_v5 = vadd.f32 %v5330_v45, %v5318_v4  ;;  %6016 = vmatpush.bf16.msra.mxu1 %v10688_v44  ;;  %v10687_v45 = vld [vmem:[#allocation14 + $0x40] sm:$0xff]  ;;  %v9779_v44 = vld [vmem:[#allocation19 + $0xc8] sm:$0xf0] }
 0x3b4   :  { %v5293_v18 = vpop.f32.mrf.mxu0  ;;  %v9897_v4 = vld [vmem:[#allocation19 + $0x180] sm:$0xf]  ;;  %v9782_v48 = vor.u32 %v10720_v50, %v9779_v44 }
 0x3b5   :  { %v5762_v35 = vpop.f32.mrf.mxu3 }
 0x3b6   :  { %v5763_v59 = vadd.f32 %v5762_v35, %v5429_v25  ;;  %6097 = vmatpush.bf16.msra.mxu2 %v10700_v53  ;;  %v10695_v35 = vld [vmem:[%s11643_s9] sm:$0xff]  ;;  %v9833_v25 = vld [vmem:[#allocation19 + $0x100] sm:$0xf]  ;;  %s11145_s9 = smov [#allocation22]  }
 0x3b7   :  { %6017 = vmatpush.bf16.msra.mxu1 %v10687_v45  ;;  %v9774_v45 = vor.u32 %v10719_v39, %v9771_v40  ;;  %v10729_v53 = vld [vmem:[#allocation19 + $0xcc] sm:$0xf0]  ;;  %v9737_v39 = vld [vmem:[#allocation19 + $0x20] sm:$0xf]  ;;  %s6765_s20 = sshll.u32 %s11145_s9, 4  ;;  %s6766_s20 = int_to_ptr.vmem [resolvable:$true] %s6765_s20 }
 0x3ba   :  { %6098 = vmatpush.bf16.msra.mxu2 %v10699_v13  ;;  %v10703_v13 = vld [vmem:[#allocation19 + $0x4] sm:$0xf] }
 0x3bd   :  { %v5764_v29 = vpop.f32.mrf.mxu3 }
 0x3be   :  { %6099 = vmatpush.bf16.msra.mxu2 %v10698_v15  ;;  %v10751_v29 = vld [vmem:[#allocation19 + $0x184] sm:$0xf]  ;;  %v10753_v15 = vld [vmem:[#allocation19 + $0x194] sm:$0xf] }
 0x3c2   :  { %6100 = vmatpush.bf16.msra.mxu2 %v10697_v1 }
 0x3c6   :  { %6101 = vmatpush.bf16.msra.mxu2 %v10696_v32  ;;  %v9915_v32 = vld [vmem:[#allocation19 + $0x1d0] sm:$0xf0] }
 0x3ca   :  { %6102 = vmatpush.bf16.msra.mxu2 %v10695_v35  ;;  %v10754_v35 = vld [vmem:[#allocation19 + $0x19c] sm:$0xf] }
 0x3cc   :  { %v5343_v26 = vpop.f32.mrf.mxu0 }
 0x3cd   :  { %v5344_v19 = vadd.f32 %v5343_v26, %v5331_v5  ;;  %v5775_v56 = vpop.f32.mrf.mxu1  ;;  %v10759_v5 = vld [vmem:[#allocation19 + $0x1bc] sm:$0xf0] }
 0x3ce   :  { %v5776_v33 = vadd.f32 %v5775_v56, %v5763_v59  ;;  %v9898_v26 = vor.u32 %v10759_v5, %v9897_v4  ;;  %v10743_v59 = vld [vmem:[#allocation19 + $0x13c] sm:$0xf0]  ;;  %v10735_v56 = vld [vmem:[#allocation19 + $0x104] sm:$0xf]  ;;  %v9918_v4 = vor.u32 %v10753_v15, %v9915_v32  ;;  %v9923_v5 = vld [vmem:[#allocation19 + $0x1d8] sm:$0xf0] }
 0x3cf   :  { %vm5350_vm14 = vcmp.gt.f32.partialorder %v5344_v19, 0.0  ;;  %v5354_v12 = vmul.f32 0.01, %v5344_v19  ;;  %v10739_v32 = vld [vmem:[#allocation19 + $0x124] sm:$0xf] }
 0x3d1   :  { %v5358_v9 = vsel %vm5350_vm14, %v5344_v19, %v5354_v12  ;;  %v9899_v19 = vld [vmem:[#allocation19 + $0x1c0] sm:$0xf0]  ;;  %v10752_v12 = vld [vmem:[#allocation19 + $0x18c] sm:$0xf] }
 0x3d2   :  { %v5362_v6 = vpack.c.bf16 %v5358_v9, %v5358_v9  ;;  %v9907_v9 = vld [vmem:[#allocation19 + $0x1c8] sm:$0xf0] }
 0x3d4   :  { %v5345_v10 = vpop.f32.mrf.mxu0  ;;  %5800 = vmatmul.bf16.vlgmr.msrb.gmra.mxu0 %v5362_v6 }
 0x3d5   :  { %v5814_v46 = vpop.f32.mrf.mxu3  ;;  %v5777_v0 = vpop.f32.mrf.mxu1  ;;  %v9913_v10 = vld [vmem:[#allocation19 + $0x190] sm:$0xf]  ;;  %6540 = vmatpush.bf16.msrb.mxu0 %v9898_v26  ;;  %v10763_v26 = vld [vmem:[#allocation19 + $0x1dc] sm:$0xf0] }
 0x3d6   :  { %v5815_v17 = vadd.f32 %v5814_v46, %v5430_v7  ;;  %v9910_v46 = vor.u32 %v10752_v12, %v9907_v9  ;;  %v9834_v0 = vor.u32 %v10743_v59, %v9833_v25  ;;  %v9841_v9 = vld [vmem:[#allocation19 + $0x108] sm:$0xf]  ;;  %v10738_v25 = vld [vmem:[#allocation19 + $0x11c] sm:$0xf] }
 0x3d8   :  { %6579 = vmatpush.bf16.msrb.mxu1 %v9910_v46  ;;  %v10737_v46 = vld [vmem:[#allocation19 + $0x114] sm:$0xf] }
 0x3d9   :  { %6541 = vmatpush.bf16.msrb.mxu0 %v9834_v0  ;;  %v10747_v0 = vld [vmem:[#allocation19 + $0x15c] sm:$0xf0] }
 0x3dd   :  { %v5816_v16 = vpop.f32.mrf.mxu3  ;;  %v5827_v21 = vpop.f32.mrf.mxu1 }
 0x3de   :  { %v5828_v20 = vadd.f32 %v5827_v21, %v5815_v17  ;;  %v9914_v16 = vor.u32 %v10761_v14, %v9913_v10  ;;  %v10736_v17 = vld [vmem:[#allocation19 + $0x10c] sm:$0xf]  ;;  %v9851_v14 = vld [vmem:[#allocation19 + $0x150] sm:$0xf0] }
 0x3df   :  { %v9843_v21 = vld [vmem:[#allocation19 + $0x148] sm:$0xf0]  ;;  %v9854_v59 = vor.u32 %v10737_v46, %v9851_v14  ;;  %v10730_v46 = vld [vmem:[#allocation19 + $0xd4] sm:$0xf0] }
 0x3e0   :  { %6592 = vmatpush.bf16.msrb.mxu2 %v9914_v16  ;;  %v9859_v16 = vld [vmem:[#allocation19 + $0x158] sm:$0xf0] }
 0x3e4   :  { %5852 = vmatmul.bf16.vlgmr.msra.gmra.mxu0 %v5362_v6  ;;  %v9902_v6 = vor.u32 %v10751_v29, %v9899_v19  ;;  %v9929_v29 = vld [vmem:[#allocation19 + $0x1a0] sm:$0xf]  ;;  %v9926_v19 = vor.u32 %v10754_v35, %v9923_v5  ;;  %v9867_v35 = vld [vmem:[#allocation19 + $0x160] sm:$0xf0] }
 0x3e5   :  { %v5829_v54 = vpop.f32.mrf.mxu1  ;;  %v9930_v12 = vor.u32 %v10763_v26, %v9929_v29  ;;  %v9875_v29 = vld [vmem:[#allocation19 + $0x168] sm:$0xf0]  ;;  %v9881_v26 = vld [vmem:[#allocation19 + $0x130] sm:$0xf] }
 0x3e6   :  { %6553 = vmatpush.bf16.msra.mxu3 %v9902_v6  ;;  %v9846_v54 = vor.u32 %v10736_v17, %v9843_v21  ;;  %v10744_v6 = vld [vmem:[#allocation19 + $0x144] sm:$0xf0] }
 0x3e7   :  { %v9842_v10 = vor.u32 %v10744_v6, %v9841_v9  ;;  %v10728_v21 = vld [vmem:[#allocation19 + $0xc4] sm:$0xf0]  ;;  %v9870_v9 = vor.u32 %v10739_v32, %v9867_v35  ;;  %v9793_v6 = vld [vmem:[#allocation19 + $0x98] sm:$0xf]  ;;  %v10709_v35 = vld [vmem:[#allocation19 + $0x34] sm:$0xf] }
 0x3e8   :  { %6580 = vmatpush.bf16.msrb.mxu1 %v9846_v54  ;;  %v9787_v54 = vld [vmem:[#allocation19 + $0xd0] sm:$0xf0]  ;;  %v10716_v32 = vld [vmem:[#allocation19 + $0x64] sm:$0xf0] }
 0x3ec   :  { %6581 = vmatpush.bf16.msrb.mxu1 %v9782_v48  ;;  %v10791_v48 = vld [vmem:[#allocation17] ss:$0 sm:$0xff] }
 0x417   :  { %v5788_v28 = vpop.f32.mrf.mxu2 }
 0x418   :  { %v5789_v55 = vadd.f32 %v5788_v28, %v5776_v33  ;;  %v9835_v33 = vld [vmem:[#allocation19 + $0x140] sm:$0xf0] }
 0x419   :  { %v9838_v7 = vor.u32 %v10735_v56, %v9835_v33  ;;  %v9862_v56 = vor.u32 %v10738_v25, %v9859_v16  ;;  %v9865_v33 = vld [vmem:[#allocation19 + $0x120] sm:$0xf]  ;;  %v10723_v25 = vld [vmem:[#allocation19 + $0xa4] sm:$0xf] }
 0x41a   :  { %v9866_v17 = vor.u32 %v10747_v0, %v9865_v33  ;;  %v9803_v16 = vld [vmem:[#allocation19 + $0xe0] sm:$0xf0]  ;;  %v9817_v33 = vld [vmem:[#allocation19 + $0xb0] sm:$0xf] }
 0x41b   :  { %6554 = vmatpush.bf16.msra.mxu3 %v9838_v7  ;;  %v9777_v7 = vld [vmem:[#allocation19 + $0x88] sm:$0xf]  ;;  %v10733_v0 = vld [vmem:[#allocation19 + $0xec] sm:$0xf0] }
 0x41f   :  { %v5790_v31 = vpop.f32.mrf.mxu2  ;;  %6555 = vmatpush.bf16.msra.mxu3 %v9774_v45 }
 0x427   :  { %v5840_v61 = vpop.f32.mrf.mxu2 }
 0x428   :  { %v5841_v18 = vadd.f32 %v5840_v61, %v5828_v20  ;;  %v9849_v20 = vld [vmem:[#allocation19 + $0x110] sm:$0xf] }
 0x429   :  { %v9850_v23 = vor.u32 %v10745_v41, %v9849_v20  ;;  %v10721_v20 = vld [vmem:[#allocation19 + $0x94] sm:$0xf]  ;;  %v9778_v41 = vor.u32 %v10728_v21, %v9777_v7  ;;  %v9794_v7 = vor.u32 %v10730_v46, %v9793_v6  ;;  %v9729_v21 = vld [vmem:[#allocation19 + $0x18] sm:$0xf] }
 0x42a   :  { %v10766_v6 = vld [vmem:[#allocation19 + $0x1f4] sm:$0xf0] }
 0x42b   :  { %6593 = vmatpush.bf16.msrb.mxu2 %v9850_v23  ;;  %v10722_v23 = vld [vmem:[#allocation19 + $0x9c] sm:$0xf] }
 0x42f   :  { %v5842_v38 = vpop.f32.mrf.mxu2 }
 0x430   :  { %v10727_v38 = vld [vmem:[#allocation19 + $0xbc] sm:$0xf0] }
 0x431   :  { %v9770_v57 = vor.u32 %v10727_v38, %v9769_v37  ;;  %v10706_v37 = vld [vmem:[#allocation19 + $0x1c] sm:$0xf] }
 0x432   :  { %v9731_v38 = vld [vmem:[#allocation19 + $0x58] sm:$0xf0] }
 0x433   :  { %6542 = vmatpush.bf16.msrb.mxu0 %v9770_v57  ;;  %v10715_v57 = vld [vmem:[#allocation19 + $0x5c] sm:$0xf0]  ;;  %v9734_v44 = vor.u32 %v10706_v37, %v9731_v38  ;;  %v10764_v37 = vld [vmem:[#allocation19 + $0x1e4] sm:$0xf0]  ;;  %v10757_v38 = vld [vmem:[#allocation19 + $0x1b4] sm:$0xf] }
 0x434   :  { %v9738_v45 = vor.u32 %v10715_v57, %v9737_v39  ;;  %v9947_v39 = vld [vmem:[#allocation19 + $0x1f0] sm:$0xf0]  ;;  %v10758_v57 = vld [vmem:[#allocation19 + $0x1bc] sm:$0xf] }
 0x451   :  { %v5801_v43 = vpop.f32.mrf.mxu0 }
 0x452   :  { %v5802_v58 = vadd.f32 %v5801_v43, %v5789_v55  ;;  %v9786_v55 = vor.u32 %v10729_v53, %v9785_v51  ;;  %v9705_v43 = vld [vmem:[#allocation19] sm:$0xf] }
 0x454   :  { %vm5857_vm15 = vcmp.gt.f32.partialorder %v5802_v58, 0.0  ;;  %v5859_v49 = vmul.f32 0.01, %v5802_v58  ;;  %6594 = vmatpush.bf16.msrb.mxu2 %v9786_v55  ;;  %v9921_v55 = vld [vmem:[#allocation19 + $0x198] sm:$0xf] }
 0x456   :  { %v5861_v22 = vsel %vm5857_vm15, %v5802_v58, %v5859_v49  ;;  %v10711_v58 = vld [vmem:[#allocation19 + $0x3c] sm:$0xf0] }
 0x457   :  { %v5863_v11 = vpack.c.bf16 %v5861_v22, %v5861_v22  ;;  %v9706_v49 = vor.u32 %v10711_v58, %v9705_v43  ;;  %v9707_v22 = vld [vmem:[#allocation19 + $0x40] sm:$0xf0]  ;;  %v10762_v43 = vld [vmem:[#allocation19 + $0x1d4] sm:$0xf0] }
 0x458   :  { %v10755_v58 = vld [vmem:[#allocation19 + $0x1a4] sm:$0xf] }
 0x459   :  { %v5803_v60 = vpop.f32.mrf.mxu0  ;;  %6005 = vmatmul.bf16.vlgmr.msrb.gmra.mxu3 %v5863_v11  ;;  %v10704_v11 = vld [vmem:[#allocation19 + $0xc] sm:$0xf]  ;;  %6543 = vmatpush.bf16.msrb.mxu0 %v9706_v49 }
 0x45a   :  { %v9715_v60 = vld [vmem:[#allocation19 + $0x48] sm:$0xf0] }
 0x461   :  { %v5853_v24 = vpop.f32.mrf.mxu0 }
 0x462   :  { %v5854_v52 = vadd.f32 %v5853_v24, %v5841_v18  ;;  %v9710_v18 = vor.u32 %v10703_v13, %v9707_v22  ;;  %v9718_v24 = vor.u32 %v10704_v11, %v9715_v60  ;;  %v9931_v13 = vld [vmem:[#allocation19 + $0x1e0] sm:$0xf0]  ;;  %v10756_v22 = vld [vmem:[#allocation19 + $0x1ac] sm:$0xf]  ;;  %v9945_v60 = vld [vmem:[#allocation19 + $0x1b0] sm:$0xf] }
 0x463   :  { %v9939_v11 = vld [vmem:[#allocation19 + $0x1e8] sm:$0xf0] }
 0x464   :  { %vm5858_vm0 = vcmp.gt.f32.partialorder %v5854_v52, 0.0  ;;  %v5860_v8 = vmul.f32 0.01, %v5854_v52  ;;  %6556 = vmatpush.bf16.msra.mxu3 %v9710_v18  ;;  %6582 = vmatpush.bf16.msrb.mxu1 %v9718_v24  ;;  %v10765_v18 = vld [vmem:[#allocation19 + $0x1ec] sm:$0xf0]  ;;  %v9942_v15 = vor.u32 %v10756_v22, %v9939_v11 }
 0x465   :  { %v9809_v22 = vld [vmem:[#allocation19 + $0xa8] sm:$0xf] }
 0x466   :  { %v5862_v2 = vsel %vm5858_vm0, %v5854_v52, %v5860_v8  ;;  %v9721_v52 = vld [vmem:[#allocation19 + $0x10] sm:$0xf] }
 0x467   :  { %v5864_v42 = vpack.c.bf16 %v5862_v2, %v5862_v2  ;;  %v10713_v8 = vld [vmem:[#allocation19 + $0x4c] sm:$0xf0] }
 0x468   :  { %v9722_v2 = vor.u32 %v10713_v8, %v9721_v52  ;;  %6605 = vmatpush.bf16.msrb.mxu3 %v9918_v4  ;;  %v9922_v8 = vor.u32 %v10762_v43, %v9921_v55  ;;  %v10740_v4 = vld [vmem:[#allocation19 + $0x12c] sm:$0xf]  ;;  %v9883_v55 = vld [vmem:[#allocation19 + $0x170] sm:$0xf0]  ;;  %v10742_v43 = vld [vmem:[#allocation19 + $0x13c] sm:$0xf] }
 0x469   :  { %v5855_v62 = vpop.f32.mrf.mxu0  ;;  %6018 = vmatmul.bf16.vlgmr.msra.gmra.mxu1 %v5864_v42  ;;  %v9905_v42 = vld [vmem:[#allocation19 + $0x188] sm:$0xf] }
 0x46a   :  { %v10760_v62 = vld [vmem:[#allocation19 + $0x1c4] sm:$0xf0]  ;;  %6595 = vmatpush.bf16.msrb.mxu2 %v9722_v2  ;;  %6631 = vmatpush.bf16.msra.mxu1 %v9926_v19  ;;  %v9934_v2 = vor.u32 %v10755_v58, %v9931_v13  ;;  %v10749_v19 = vld [vmem:[#allocation19 + $0x16c] sm:$0xf0]  ;;  %v9891_v58 = vld [vmem:[#allocation19 + $0x178] sm:$0xf0] }
 0x46b   :  { %v9906_v1 = vor.u32 %v10760_v62, %v9905_v42  ;;  %v9857_v42 = vld [vmem:[#allocation19 + $0x118] sm:$0xf]  ;;  %v9882_v14 = vor.u32 %v10749_v19, %v9881_v26  ;;  %v9894_v11 = vor.u32 %v10742_v43, %v9891_v58 }
 0x46c   :  { %6606 = vmatpush.bf16.msrb.mxu3 %v9854_v59  ;;  %v10746_v62 = vld [vmem:[#allocation19 + $0x154] sm:$0xf0]  ;;  %v10724_v59 = vld [vmem:[#allocation19 + $0xac] sm:$0xf] }
 0x46d   :  { %6566 = vmatpush.bf16.msra.mxu0 %v9906_v1  ;;  %v9946_v1 = vor.u32 %v10765_v18, %v9945_v60  ;;  %v10732_v60 = vld [vmem:[#allocation19 + $0xe4] sm:$0xf0]  ;;  %v10725_v18 = vld [vmem:[#allocation19 + $0xb4] sm:$0xf] }
 0x46e   :  { %6632 = vmatpush.bf16.msra.mxu1 %v9862_v56  ;;  %v9811_v56 = vld [vmem:[#allocation19 + $0xe8] sm:$0xf0] }
 0x471   :  { %6567 = vmatpush.bf16.msra.mxu0 %v9842_v10  ;;  %v9878_v10 = vor.u32 %v10740_v4, %v9875_v29  ;;  %v9755_v4 = vld [vmem:[#allocation19 + $0x70] sm:$0xf0]  ;;  %v9763_v29 = vld [vmem:[#allocation19 + $0x78] sm:$0xf0] }
 0x472   :  { %v9758_v19 = vor.u32 %v10709_v35, %v9755_v4 }
 0x475   :  { %6568 = vmatpush.bf16.msra.mxu0 %v9778_v41  ;;  %v9818_v41 = vor.u32 %v10733_v0, %v9817_v33  ;;  %v9761_v33 = vld [vmem:[#allocation19 + $0x38] sm:$0xf] }
 0x476   :  { %v10718_v0 = vld [vmem:[#allocation19 + $0x74] sm:$0xf0] }
 0x4dc   :  { %v6006_v3 = vpop.f32.mrf.mxu3 }
 0x4dd   :  { %v6007_v28 = vadd.f32 %v10790_v30, %v6006_v3  ;;  %v9795_v3 = vld [vmem:[#allocation19 + $0xd8] sm:$0xf0]  ;;  %v9801_v30 = vld [vmem:[#allocation19 + $0xa0] sm:$0xf] }
 0x4e4   :  { %v6008_v27 = vpop.f32.mrf.mxu3 }
 0x4e5   :  { %v9790_v27 = vor.u32 %v10721_v20, %v9787_v54  ;;  %v10714_v20 = vld [vmem:[#allocation19 + $0x54] sm:$0xf0]  ;;  %v9814_v54 = vor.u32 %v10724_v59, %v9811_v56 }
 0x4e6   :  { %v6019_v63 = vpop.f32.mrf.mxu1  ;;  %v10734_v59 = vld [vmem:[#allocation19 + $0xf4] sm:$0xf0] }
 0x4e7   :  { %v6020_v34 = vadd.f32 %v6019_v63, %v6007_v28  ;;  %v10731_v28 = vld [vmem:[#allocation19 + $0xdc] sm:$0xf0]  ;;  %v9713_v63 = vld [vmem:[#allocation19 + $0x8] sm:$0xf]  ;;  %6607 = vmatpush.bf16.msrb.mxu3 %v9790_v27  ;;  %v9747_v27 = vld [vmem:[#allocation19 + $0x68] sm:$0xf0] }
 0x4e9   :  { %vm6023_vm1 = vcmp.gt.f32.partialorder %v6020_v34, 0.0  ;;  %v6024_v31 = vmul.f32 0.01, %v6020_v34 }
 0x4eb   :  { %v6025_v47 = vsel %vm6023_vm1, %v6020_v34, %v6024_v31  ;;  %v10712_v34 = vld [vmem:[#allocation19 + $0x44] sm:$0xf0]  ;;  %v9798_v31 = vor.u32 %v10722_v23, %v9795_v3  ;;  %v10707_v23 = vld [vmem:[#allocation19 + $0x24] sm:$0xf] }
 0x4ec   :  { %v6026_v61 = vpack.c.bf16 %v6025_v47, %v6025_v47  ;;  %v9802_v47 = vor.u32 %v10731_v28, %v9801_v30  ;;  %v9714_v40 = vor.u32 %v10712_v34, %v9713_v63  ;;  %v9739_v3 = vld [vmem:[#allocation19 + $0x60] sm:$0xf0]  ;;  %v10708_v30 = vld [vmem:[#allocation19 + $0x2c] sm:$0xf]  ;;  %v9753_v28 = vld [vmem:[#allocation19 + $0x30] sm:$0xf]  ;;  %v9730_v34 = vor.u32 %v10714_v20, %v9729_v21 }
 0x4ed   :  { %6633 = vmatpush.bf16.msra.mxu1 %v9798_v31  ;;  %v10717_v63 = vld [vmem:[#allocation19 + $0x6c] sm:$0xf0]  ;;  %v9742_v31 = vor.u32 %v10707_v23, %v9739_v3 }
 0x4ee   :  { %v6021_v36 = vpop.f32.mrf.mxu1  ;;  %6103 = vmatmul.bf16.vlgmr.msra.gmra.mxu2 %v6026_v61  ;;  %v10705_v61 = vld [vmem:[#allocation19 + $0x14] sm:$0xf]  ;;  %6569 = vmatpush.bf16.msra.mxu0 %v9714_v40  ;;  %v9955_v40 = vld [vmem:[#allocation19 + $0x1f8] sm:$0xf0] }
 0x4ef   :  { %6644 = vmatpush.bf16.msra.mxu2 %v9930_v12  ;;  %v9723_v36 = vld [vmem:[#allocation19 + $0x50] sm:$0xf0]  ;;  %v9858_v12 = vor.u32 %v10746_v62, %v9857_v42  ;;  %v9810_v42 = vor.u32 %v10732_v60, %v9809_v22 }
 0x4f0   :  { %v9726_v50 = vor.u32 %v10705_v61, %v9723_v36  ;;  %v9750_v61 = vor.u32 %v10708_v30, %v9747_v27  ;;  %v9754_v36 = vor.u32 %v10717_v63, %v9753_v28 }
 0x4f1   :  { %6634 = vmatpush.bf16.msra.mxu1 %v9734_v44  ;;  %v9950_v44 = vor.u32 %v10757_v38, %v9947_v39 }
 0x4f2   :  { %6608 = vmatpush.bf16.msrb.mxu3 %v9726_v50 }
 0x4f3   :  { %6645 = vmatpush.bf16.msra.mxu2 %v9866_v17  ;;  %v9806_v17 = vor.u32 %v10723_v25, %v9803_v16  ;;  %v9825_v16 = vld [vmem:[#allocation19 + $0xb8] sm:$0xf] }
 0x4f4   :  { %v9826_v56 = vor.u32 %v10734_v59, %v9825_v16 }
 0x4f7   :  { %6646 = vmatpush.bf16.msra.mxu2 %v9802_v47  ;;  %v9937_v47 = vld [vmem:[#allocation19 + $0x1a8] sm:$0xf] }
 0x4f8   :  { %v9938_v50 = vor.u32 %v10764_v37, %v9937_v47 }
 0x4fb   :  { %6647 = vmatpush.bf16.msra.mxu2 %v9738_v45  ;;  %v9873_v45 = vld [vmem:[#allocation19 + $0x128] sm:$0xf] }
 0x571   :  { %v6104_v51 = vpop.f32.mrf.mxu2 }
 0x572   :  { %v6105_v53 = vadd.f32 %v10791_v48, %v6104_v51  ;;  %v9958_v48 = vor.u32 %v10758_v57, %v9955_v40  ;;  %v10748_v51 = vld [vmem:[#allocation19 + $0x164] sm:$0xf0] }
 0x573   :  { %v9874_v13 = vor.u32 %v10748_v51, %v9873_v45 }
 0x574   :  { %vm6108_vm2 = vcmp.gt.f32.partialorder %v6105_v53, 0.0  ;;  %v6109_v49 = vmul.f32 0.01, %v6105_v53 }
 0x576   :  { %v6110_v24 = vsel %vm6108_vm2, %v6105_v53, %v6109_v49  ;;  %v10741_v53 = vld [vmem:[#allocation19 + $0x134] sm:$0xf] }
 0x577   :  { %v11597_v52 = vpack.c.bf16 %v6110_v24, %v6110_v24  ;;  %v9886_v49 = vor.u32 %v10741_v53, %v9883_v55  ;;  %v9819_v24 = vld [vmem:[#allocation19 + $0xf0] sm:$0xf0] }
 0x578   :  { %v9822_v62 = vor.u32 %v10725_v18, %v9819_v24 }
 0x579   :  { %v6106_v5 = vpop.f32.mrf.mxu2  ;;  %9959 = vmatmul.msk.bf16.vlgmr.msrb.gmra.mxu0 %vm6532_vm3, %v11597_v52  ;;  %9960 = vmatmul.msk.bf16.vlgmr.msra.gmra.mxu3 %vm6532_vm3, %v11597_v52 }
 0x57a   :  { %9962 = vmatmul.msk.bf16.vlgmr.msrb.gmra.mxu1 %vm6532_vm3, %v11597_v52  ;;  %9963 = vmatmul.msk.bf16.vlgmr.msrb.gmra.mxu2 %vm6532_vm3, %v11597_v52  ;;  %v10710_v5 = vld [vmem:[#allocation19 + $0x3c] sm:$0xf] }
 0x57b   :  { %6618 = vmatpush.bf16.msrb.mxu0 %v9922_v8  ;;  %6657 = vmatpush.bf16.msra.mxu3 %v9934_v2  ;;  %v10726_v8 = vld [vmem:[#allocation19 + $0xbc] sm:$0xf] }
 0x57c   :  { %6683 = vmatpush.bf16.msrb.mxu1 %v9942_v15  ;;  %6696 = vmatpush.bf16.msrb.mxu2 %v9946_v1  ;;  %v9827_v2 = vld [vmem:[#allocation19 + $0xf8] sm:$0xf0]  ;;  %v9745_v15 = vld [vmem:[#allocation19 + $0x28] sm:$0xf] }
 0x57d   :  { %v9830_v1 = vor.u32 %v10726_v8, %v9827_v2  ;;  %v9746_v26 = vor.u32 %v10716_v32, %v9745_v15 }
 0x57f   :  { %6619 = vmatpush.bf16.msrb.mxu0 %v9858_v12  ;;  %6658 = vmatpush.bf16.msra.mxu3 %v9870_v9  ;;  %v9766_v12 = vor.u32 %v10710_v5, %v9763_v29  ;;  %v9953_v9 = vld [vmem:[#allocation19 + $0x1b8] sm:$0xf] }
 0x580   :  { %6684 = vmatpush.bf16.msrb.mxu1 %v9878_v10  ;;  %6697 = vmatpush.bf16.msrb.mxu2 %v9882_v14  ;;  %v9954_v46 = vor.u32 %v10766_v6, %v9953_v9  ;;  %v9889_v10 = vld [vmem:[#allocation19 + $0x138] sm:$0xf] }
 0x581   :  { %v10750_v14 = vld [vmem:[#allocation19 + $0x174] sm:$0xf0] }
 0x582   :  { %v9890_v25 = vor.u32 %v10750_v14, %v9889_v10 }
 0x583   :  { %6620 = vmatpush.bf16.msrb.mxu0 %v9794_v7  ;;  %6659 = vmatpush.bf16.msra.mxu3 %v9806_v17  ;;  %v9762_v7 = vor.u32 %v10718_v0, %v9761_v33  ;;  %v6176_v17 = vld [vmem:[#allocation20] sm:$0xff] }
 0x584   :  { %6685 = vmatpush.bf16.msrb.mxu1 %v9814_v54  ;;  %6698 = vmatpush.bf16.msrb.mxu2 %v9818_v41  ;;  %v6180_v54 = vperm.slane %v6176_v17, 0  ;;  %v6181_v41 = vperm.slane %v6176_v17, 1  ;;  %v6182_v47 = vperm.slane %v6176_v17, 2  ;;  %v6184_v57 = vperm.slane %v6176_v17, 4 }
 0x585   :  { %v6187_v58 = vperm.slane %v6176_v17, 7 }
 0x587   :  { %6621 = vmatpush.bf16.msrb.mxu0 %v9730_v34  ;;  %6660 = vmatpush.bf16.msra.mxu3 %v9742_v31  ;;  %v6183_v31 = vperm.slane %v6176_v17, 3 }
 0x588   :  { %6686 = vmatpush.bf16.msrb.mxu1 %v9750_v61  ;;  %6699 = vmatpush.bf16.msrb.mxu2 %v9754_v36 }
 0x589   :  { %9961 = vmatmul.msk.bf16.vlgmr.msra.gmra.mxu0 %vm6532_vm3, %v11597_v52  ;;  %9964 = vmatmul.msk.bf16.vlgmr.msrb.gmra.mxu3 %vm6532_vm3, %v11597_v52 }
 0x58a   :  { %9966 = vmatmul.msk.bf16.vlgmr.msra.gmra.mxu1 %vm6532_vm3, %v11597_v52  ;;  %9967 = vmatmul.msk.bf16.vlgmr.msra.gmra.mxu2 %vm6532_vm3, %v11597_v52 }
 0x58b   :  { %6670 = vmatpush.bf16.msra.mxu0 %v9938_v50  ;;  %6709 = vmatpush.bf16.msrb.mxu3 %v9950_v44  ;;  %v6185_v50 = vperm.slane %v6176_v17, 5 }
 0x58c   :  { %6735 = vmatpush.bf16.msra.mxu1 %v9958_v48 }
 0x58f   :  { %6671 = vmatpush.bf16.msra.mxu0 %v9874_v13  ;;  %6710 = vmatpush.bf16.msrb.mxu3 %v9886_v49  ;;  %v6186_v13 = vperm.slane %v6176_v17, 6 }
 0x590   :  { %6736 = vmatpush.bf16.msra.mxu1 %v9894_v11  ;;  %v6177_v11 = vld [vmem:[#allocation20 + $0x8] sm:$0xff] }
 0x591   :  { %v6188_v2 = vperm.slane %v6177_v11, 0  ;;  %v6193_v59 = vperm.slane %v6177_v11, 5 }
 0x593   :  { %6672 = vmatpush.bf16.msra.mxu0 %v9810_v42  ;;  %6711 = vmatpush.bf16.msrb.mxu3 %v9822_v62  ;;  %v6189_v62 = vperm.slane %v6177_v11, 1 }
 0x594   :  { %6737 = vmatpush.bf16.msra.mxu1 %v9830_v1 }
 0x597   :  { %6673 = vmatpush.bf16.msra.mxu0 %v9746_v26  ;;  %6712 = vmatpush.bf16.msrb.mxu3 %v9758_v19  ;;  %v6191_v26 = vperm.slane %v6177_v11, 3  ;;  %v6190_v19 = vperm.slane %v6177_v11, 2 }
 0x598   :  { %6738 = vmatpush.bf16.msra.mxu1 %v9766_v12 }
 0x599   :  { %9965 = vmatmul.msk.bf16.vlgmr.msrb.gmra.mxu0 %vm6532_vm3, %v11597_v52  ;;  %9968 = vmatmul.msk.bf16.vlgmr.msra.gmra.mxu3 %vm6532_vm3, %v11597_v52 }
 0x59a   :  { %9970 = vmatmul.msk.bf16.vlgmr.msrb.gmra.mxu1 %vm6532_vm3, %v11597_v52  ;;  %9971 = vmatmul.msk.bf16.vlgmr.msrb.gmra.mxu2 %vm6532_vm3, %v11597_v52 }
 0x59b   :  { %6722 = vmatpush.bf16.msrb.mxu0 %v9954_v46 }
 0x59f   :  { %6723 = vmatpush.bf16.msrb.mxu0 %v9890_v25  ;;  %v6192_v25 = vperm.slane %v6177_v11, 4 }
 0x5a3   :  { %6724 = vmatpush.bf16.msrb.mxu0 %v9826_v56 }
 0x5a7   :  { %6725 = vmatpush.bf16.msrb.mxu0 %v9762_v7 }
 0x5a9   :  { %9969 = vmatmul.msk.bf16.vlgmr.msra.gmra.mxu0 %vm6532_vm3, %v11597_v52  ;;  %9972 = vmatmul.msk.bf16.vlgmr.msrb.gmra.mxu3 %vm6532_vm3, %v11597_v52 }
 0x5aa   :  { %9974 = vmatmul.msk.bf16.vlgmr.msra.gmra.mxu1 %vm6532_vm3, %v11597_v52 }
 0x5b9   :  { %9973 = vmatmul.msk.bf16.vlgmr.msrb.gmra.mxu0 %vm6532_vm3, %v11597_v52 }
 0x5f6   :  { %v6545_v21 = vpop.f32.mrf.mxu0 }
 0x5f7   :  { %v6584_v20 = vpop.f32.mrf.mxu1  ;;  %v6546_v3 = vadd.f32 %v6545_v21, %v6180_v54  ;;  %v6194_v54 = vperm.slane %v6177_v11, 6 }
 0x5f8   :  { %v6585_v38 = vadd.f32 %v6584_v20, %v6183_v31  ;;  %v6195_v20 = vperm.slane %v6177_v11, 7 }
 0x5fc   :  { %v6558_v23 = vpop.f32.mrf.mxu3 }
 0x5fd   :  { %v6559_v30 = vadd.f32 %v6558_v23, %v6181_v41  ;;  %v6597_v27 = vpop.f32.mrf.mxu2 }
 0x5fe   :  { %v6547_v28 = vpop.f32.mrf.mxu0  ;;  %v6598_v45 = vadd.f32 %v6597_v27, %v6184_v57 }
 0x5ff   :  { %v6744_v63 = vpack.c.bf16 %v6559_v30, %v6546_v3  ;;  %v6586_v34 = vpop.f32.mrf.mxu1 }
 0x601   :  { %6752 = vst [vmem:[#allocation22] sm:$0xff] %v6744_v63 }
 0x604   :  { %v6560_v61 = vpop.f32.mrf.mxu3 }
 0x605   :  { %v6599_v36 = vpop.f32.mrf.mxu2 }
 0x606   :  { %v6571_v37 = vpop.f32.mrf.mxu0 }
 0x607   :  { %v6572_v52 = vadd.f32 %v6571_v37, %v6182_v47  ;;  %v6636_v39 = vpop.f32.mrf.mxu1 }
 0x608   :  { %v6637_v18 = vadd.f32 %v6636_v39, %v6187_v58 }
 0x609   :  { %v6745_v40 = vpack.c.bf16 %v6585_v38, %v6572_v52 }
 0x60b   :  { %6753 = vst [vmem:[#allocation22 + $0x8] sm:$0xff] %v6745_v40 }
 0x60c   :  { %v6610_v44 = vpop.f32.mrf.mxu3 }
 0x60d   :  { %v6611_v48 = vadd.f32 %v6610_v44, %v6185_v50  ;;  %v6649_v51 = vpop.f32.mrf.mxu2 }
 0x60e   :  { %v6573_v53 = vpop.f32.mrf.mxu0  ;;  %v6650_v1 = vadd.f32 %v6649_v51, %v6188_v2 }
 0x60f   :  { %v6746_v55 = vpack.c.bf16 %v6611_v48, %v6598_v45  ;;  %v6638_v43 = vpop.f32.mrf.mxu1 }
 0x611   :  { %6754 = vst [vmem:[#allocation22 + $0x10] sm:$0xff] %v6746_v55 }
 0x614   :  { %v6612_v49 = vpop.f32.mrf.mxu3 }
 0x615   :  { %v6651_v22 = vpop.f32.mrf.mxu2 }
 0x616   :  { %v6623_v60 = vpop.f32.mrf.mxu0 }
 0x617   :  { %v6624_v24 = vadd.f32 %v6623_v60, %v6186_v13  ;;  %v6688_v8 = vpop.f32.mrf.mxu1 }
 0x618   :  { %v6689_v46 = vadd.f32 %v6688_v8, %v6191_v26 }
 0x619   :  { %v6747_v42 = vpack.c.bf16 %v6637_v18, %v6624_v24 }
 0x61b   :  { %6755 = vst [vmem:[#allocation22 + $0x18] sm:$0xff] %v6747_v42 }
 0x61c   :  { %v6662_v15 = vpop.f32.mrf.mxu3 }
 0x61d   :  { %v6663_v32 = vadd.f32 %v6662_v15, %v6189_v62  ;;  %v6701_v35 = vpop.f32.mrf.mxu2 }
 0x61e   :  { %v6625_v4 = vpop.f32.mrf.mxu0  ;;  %v6702_v33 = vadd.f32 %v6701_v35, %v6192_v25 }
 0x61f   :  { %v6748_v5 = vpack.c.bf16 %v6663_v32, %v6650_v1  ;;  %v6690_v29 = vpop.f32.mrf.mxu1 }
 0x621   :  { %6756 = vst [vmem:[#allocation22 + $0x20] sm:$0xff] %v6748_v5 }
 0x624   :  { %v6664_v12 = vpop.f32.mrf.mxu3 }
 0x625   :  { %v6703_v9 = vpop.f32.mrf.mxu2 }
 0x626   :  { %v6675_v6 = vpop.f32.mrf.mxu0 }
 0x627   :  { %v6676_v10 = vadd.f32 %v6675_v6, %v6190_v19  ;;  %v6740_v14 = vpop.f32.mrf.mxu1 }
 0x628   :  { %v6741_v3 = vadd.f32 %v6740_v14, %v6195_v20 }
 0x629   :  { %v6749_v16 = vpack.c.bf16 %v6689_v46, %v6676_v10 }
 0x62b   :  { %6757 = vst [vmem:[#allocation22 + $0x28] sm:$0xff] %v6749_v16 }
 0x62c   :  { %v6714_v56 = vpop.f32.mrf.mxu3 }
 0x62d   :  { %v6715_v0 = vadd.f32 %v6714_v56, %v6193_v59 }
 0x62e   :  { %v6677_v7 = vpop.f32.mrf.mxu0 }
 0x62f   :  { %v6750_v17 = vpack.c.bf16 %v6715_v0, %v6702_v33  ;;  %v6742_v21 = vpop.f32.mrf.mxu1 }
 0x631   :  { %6758 = vst [vmem:[#allocation22 + $0x30] sm:$0xff] %v6750_v17 }
 0x634   :  { %v6716_v41 = vpop.f32.mrf.mxu3 }
 0x636   :  { %v6727_v23 = vpop.f32.mrf.mxu0 }
 0x637   :  { %v6728_v30 = vadd.f32 %v6727_v23, %v6194_v54 }
 0x639   :  { %v6751_v27 = vpack.c.bf16 %v6741_v3, %v6728_v30 }
 0x63b   :  { %6759 = vst [vmem:[#allocation22 + $0x38] sm:$0xff] %v6751_v27 }
 0x63c   :  { %6770 = dma.vmem_to_hbm [thread:$0]  %s6766_s20, 1024, %s6768_s1, [#allocation4]  }
 0x63e   :  { %v6729_v28 = vpop.f32.mrf.mxu0 }
 0x63f   :  { %11121 = dma.done.wait [#allocation4], 1024  }
 0x640   :  { %11122 = vsyncadd [#allocation4], 4294966272 }
 0x641   :  { %6775 = vsyncpa [#allocation3], 1 }
 0x642   :  { %6776 = vsyncpa [#allocation6], 1 }
 0x643   :  { %6777 = vsyncpa [#allocation9], 1 }
 0x644   :  { %6778 = vsyncpa [#allocation12], 1 }
 0x645   :  { %6779 = vsyncpa [#allocation15], 1 }
 0x646   :  { %6780 = vsyncpa [#allocation18], 1 }
 0x647   :  { %6781 = vsyncpa [#allocation21], 1 }
 0x648   :  { %6782 = vsyncpa [#allocation4], 1 }

</bundles_post_ra>
